<compile_context>
chip_gen: v7x
topology: tpu7x:2x2x1
jax: 0.10.0
libtpu: 0.0.40
codegen_flags: <defaults>
</compile_context>

<pallas_src>
import math

import jax
import jax.numpy as jnp
from jax import lax
from jax.experimental import pallas as pl
from jax.experimental.pallas import tpu as pltpu


# ----------------------------------------------------------------------------
# Small helpers
# ----------------------------------------------------------------------------
def _round_up(x, m):
    return ((x + m - 1) // m) * m


def _choose_tm(M):
    """Adaptive M tile: one 16-aligned tile for small M, 128/256 tiles otherwise."""
    if M <= 256:
        return _round_up(M, 16)
    return 128 if _round_up(M, 128) < _round_up(M, 256) else 256


# ----------------------------------------------------------------------------
# Pallas kernels
# ----------------------------------------------------------------------------
def _conv_bn_relu_kernel(p_ref, w_ref, s_ref, b_ref, o_ref):
    # p_ref: (TM, K) bf16 im2col patches, w_ref: (K, Cp) bf16, s/b_ref: (1, Cp) f32.
    acc = jnp.dot(p_ref[...], w_ref[...], preferred_element_type=jnp.float32)
    o_ref[...] = jnp.maximum(acc * s_ref[...] + b_ref[...], 0.0)


def _avgpool_conv_bn_relu_kernel(p_ref, w_ref, s_ref, b_ref, o_ref):
    # p_ref: (KK, TM, Cin) f32 pooling-window patches; w_ref: (Cin, Cp) bf16.
    # avg-pool (count_include_pad semantics) fused with 1x1 conv + BN + ReLU.
    acc = p_ref[0]
    for k in range(1, p_ref.shape[0]):
        acc = acc + p_ref[k]
    pooled = (acc * (1.0 / p_ref.shape[0])).astype(jnp.bfloat16)
    y = jnp.dot(pooled, w_ref[...], preferred_element_type=jnp.float32)
    o_ref[...] = jnp.maximum(y * s_ref[...] + b_ref[...], 0.0)


def _maxpool_kernel(p_ref, o_ref):
    # p_ref: (KK, TM, C) f32 pooling-window patches; reduce over leading axis.
    acc = p_ref[0]
    for k in range(1, p_ref.shape[0]):
        acc = jnp.maximum(acc, p_ref[k])
    o_ref[...] = acc


# ----------------------------------------------------------------------------
# Pallas wrappers
# ----------------------------------------------------------------------------
def conv_bn_relu_pallas(patches, w2d, scale, bias):
    """relu((patches @ w2d) * scale + bias): bf16 MXU matmul, fp32 epilogue."""
    M, K = patches.shape
    Cout = w2d.shape[1]
    Cp = _round_up(Cout, 128)          # lane-dense output (unmasked stores)
    TM = _choose_tm(M)
    Mp = _round_up(M, TM)

    p = patches.astype(jnp.bfloat16)
    if Mp != M:
        p = jnp.pad(p, ((0, Mp - M), (0, 0)))
    w = w2d.astype(jnp.bfloat16)
    if Cp != Cout:
        w = jnp.pad(w, ((0, 0), (0, Cp - Cout)))
        scale = jnp.pad(scale, (0, Cp - Cout))
        bias = jnp.pad(bias, (0, Cp - Cout))

    out = pl.pallas_call(
        _conv_bn_relu_kernel,
        out_shape=jax.ShapeDtypeStruct((Mp, Cp), jnp.float32),
        grid=(Mp // TM,),
        in_specs=[
            pl.BlockSpec((TM, K), lambda i: (i, 0)),
            pl.BlockSpec((K, Cp), lambda i: (0, 0)),
            pl.BlockSpec((1, Cp), lambda i: (0, 0)),
            pl.BlockSpec((1, Cp), lambda i: (0, 0)),
        ],
        out_specs=pl.BlockSpec((TM, Cp), lambda i: (i, 0)),
        compiler_params=pltpu.CompilerParams(dimension_semantics=("parallel",)),
    )(p, w, scale.reshape(1, Cp), bias.reshape(1, Cp))
    return out[:M, :Cout]


def avgpool_conv_pallas(x, p):
    """Fused avg_pool2d(3, s=1, p=1, count_include_pad) + 1x1 conv + BN + ReLU."""
    patches = extract_patches(x, 3, 3, 1, 1)          # zero-padded windows
    N, oh, ow, KK, Cin = patches.shape
    M = N * oh * ow
    pk = jnp.moveaxis(patches, 3, 0).reshape(KK, M, Cin)

    Cout = p["w2d"].shape[1]
    Cp = _round_up(Cout, 128)
    TM = _choose_tm(M)
    Mp = _round_up(M, TM)
    if Mp != M:
        pk = jnp.pad(pk, ((0, 0), (0, Mp - M), (0, 0)))
    w = p["w2d"].astype(jnp.bfloat16)
    scale, bias = p["scale"], p["bias"]
    if Cp != Cout:
        w = jnp.pad(w, ((0, 0), (0, Cp - Cout)))
        scale = jnp.pad(scale, (0, Cp - Cout))
        bias = jnp.pad(bias, (0, Cp - Cout))

    out = pl.pallas_call(
        _avgpool_conv_bn_relu_kernel,
        out_shape=jax.ShapeDtypeStruct((Mp, Cp), jnp.float32),
        grid=(Mp // TM,),
        in_specs=[
            pl.BlockSpec((KK, TM, Cin), lambda i: (0, i, 0)),
            pl.BlockSpec((Cin, Cp), lambda i: (0, 0)),
            pl.BlockSpec((1, Cp), lambda i: (0, 0)),
            pl.BlockSpec((1, Cp), lambda i: (0, 0)),
        ],
        out_specs=pl.BlockSpec((TM, Cp), lambda i: (i, 0)),
        compiler_params=pltpu.CompilerParams(dimension_semantics=("parallel",)),
    )(pk, w, scale.reshape(1, Cp), bias.reshape(1, Cp))
    return out[:M, :Cout].reshape(N, oh, ow, Cout)


def max_pool3x3_s2(x):
    """max_pool2d(kernel=3, stride=2), M-gridded Pallas window reduction."""
    patches = extract_patches(x, 3, 3, 2, 0)
    N, oh, ow, KK, C = patches.shape
    M = N * oh * ow
    pk = jnp.moveaxis(patches, 3, 0).reshape(KK, M, C)
    TM = _choose_tm(M)
    Mp = _round_up(M, TM)
    if Mp != M:
        pk = jnp.pad(pk, ((0, 0), (0, Mp - M), (0, 0)))
    out = pl.pallas_call(
        _maxpool_kernel,
        out_shape=jax.ShapeDtypeStruct((Mp, C), jnp.float32),
        grid=(Mp // TM,),
        in_specs=[pl.BlockSpec((KK, TM, C), lambda i: (0, i, 0))],
        out_specs=pl.BlockSpec((TM, C), lambda i: (i, 0)),
        compiler_params=pltpu.CompilerParams(dimension_semantics=("parallel",)),
    )(pk)
    return out[:M].reshape(N, oh, ow, C)


# ----------------------------------------------------------------------------
# Plain-JAX glue: patch extraction (im2col), layer helpers
# ----------------------------------------------------------------------------
def extract_patches(x, kh, kw, stride, pad):
    """x: (N, H, W, C) -> (N, OH, OW, KH*KW, C) sliding-window patches."""
    if pad > 0:
        x = jnp.pad(x, ((0, 0), (pad, pad), (pad, pad), (0, 0)))
    N, H, W, C = x.shape
    oh = (H - kh) // stride + 1
    ow = (W - kw) // stride + 1
    cols = []
    for i in range(kh):
        for j in range(kw):
            cols.append(
                x[:, i : i + stride * (oh - 1) + 1 : stride,
                     j : j + stride * (ow - 1) + 1 : stride, :]
            )
    return jnp.stack(cols, axis=3)  # (N, oh, ow, kh*kw, C)


def basic_conv2d(x, p, k, stride, pad):
    """BasicConv2df: conv(bias=False) + BN(eval) + ReLU via Pallas matmul."""
    if k == 1:  # 1x1 convs here are always stride 1, pad 0
        N, H, W, C = x.shape
        out = conv_bn_relu_pallas(x.reshape(N * H * W, C), p["w2d"], p["scale"], p["bias"])
        return out.reshape(N, H, W, -1)
    patches = extract_patches(x, k, k, stride, pad)
    N, oh, ow, KK, C = patches.shape
    out = conv_bn_relu_pallas(
        patches.reshape(N * oh * ow, KK * C), p["w2d"], p["scale"], p["bias"]
    )
    return out.reshape(N, oh, ow, -1)


def inception_a(x, p):
    N, H, W, Cin = x.shape
    # Fuse the three same-input 1x1 branches into ONE lane-dense Pallas matmul.
    w_cat = jnp.concatenate(
        [p["branch1x1"]["w2d"], p["branch5x5_1"]["w2d"], p["branch3x3dbl_1"]["w2d"]], axis=1)
    s_cat = jnp.concatenate(
        [p["branch1x1"]["scale"], p["branch5x5_1"]["scale"], p["branch3x3dbl_1"]["scale"]])
    b_cat = jnp.concatenate(
        [p["branch1x1"]["bias"], p["branch5x5_1"]["bias"], p["branch3x3dbl_1"]["bias"]])
    fused = conv_bn_relu_pallas(x.reshape(N * H * W, Cin), w_cat, s_cat, b_cat)

    c1 = p["branch1x1"]["w2d"].shape[1]
    c2 = p["branch5x5_1"]["w2d"].shape[1]
    c3 = p["branch3x3dbl_1"]["w2d"].shape[1]
    b1 = fused[:, :c1].reshape(N, H, W, c1)
    b5 = fused[:, c1:c1 + c2].reshape(N, H, W, c2)
    b3 = fused[:, c1 + c2:c1 + c2 + c3].reshape(N, H, W, c3)

    b5 = basic_conv2d(b5, p["branch5x5_2"], 5, 1, 2)
    b3 = basic_conv2d(b3, p["branch3x3dbl_2"], 3, 1, 1)
    b3 = basic_conv2d(b3, p["branch3x3dbl_3"], 3, 1, 1)
    bp = avgpool_conv_pallas(x, p["branch_pool"])       # fused avg-pool + 1x1
    return jnp.concatenate([b1, b5, b3, bp], axis=-1)   # channel concat (NHWC)


def my_inception3_forward(params, x_nchw):
    # transform_input=False, aux_logits=False (module defaults).
    x = jnp.transpose(x_nchw, (0, 2, 3, 1))  # NCHW -> NHWC
    x = basic_conv2d(x, params["Conv2d_1a_3x3"], 3, 2, 0)
    x = basic_conv2d(x, params["Conv2d_2a_3x3"], 3, 1, 0)
    x = basic_conv2d(x, params["Conv2d_2b_3x3"], 3, 1, 1)
    x = max_pool3x3_s2(x)
    x = basic_conv2d(x, params["Conv2d_3b_1x1"], 1, 1, 0)
    x = basic_conv2d(x, params["Conv2d_4a_3x3"], 3, 1, 0)
    x = max_pool3x3_s2(x)
    x = inception_a(x, params["Mixed_5b"])
    x = inception_a(x, params["Mixed_5c"])
    x = inception_a(x, params["Mixed_5d"])
    return jnp.transpose(x, (0, 3, 1, 2))  # back to NCHW


# ----------------------------------------------------------------------------
# Deterministic parameter init (synthetic; BN applied in eval semantics)
# ----------------------------------------------------------------------------
def init_basic_conv(key, cin, cout, k, eps=0.001):
    k1, k2, k3, k4, k5 = jax.random.split(key, 5)
    w = jax.random.normal(k1, (k, k, cin, cout), jnp.float32) / math.sqrt(k * k * cin)
    gamma = 1.0 + 0.1 * jax.random.normal(k2, (cout,), jnp.float32)
    beta = 0.1 * jax.random.normal(k3, (cout,), jnp.float32)
    rmean = 0.1 * jax.random.normal(k4, (cout,), jnp.float32)
    rvar = 0.9 + 0.1 * jnp.abs(jax.random.normal(k5, (cout,), jnp.float32))
    scale = gamma / jnp.sqrt(rvar + eps)
    bias = beta - rmean * scale
    return {
        "w4d": w,                                   # HWIO, for the reference conv
        "w2d": w.reshape(k * k * cin, cout),        # im2col-ordered, for Pallas
        "scale": scale,
        "bias": bias,
    }


def init_params(key):
    keys = iter(jax.random.split(key, 64))
    nk = lambda: next(keys)
    p = {
        "Conv2d_1a_3x3": init_basic_conv(nk(), 3, 32, 3),
        "Conv2d_2a_3x3": init_basic_conv(nk(), 32, 32, 3),
        "Conv2d_2b_3x3": init_basic_conv(nk(), 32, 64, 3),
        "Conv2d_3b_1x1": init_basic_conv(nk(), 64, 80, 1),
        "Conv2d_4a_3x3": init_basic_conv(nk(), 80, 192, 3),
    }

    def inception_a_params(cin, pool_feat):
        return {
            "branch1x1": init_basic_conv(nk(), cin, 64, 1),
            "branch5x5_1": init_basic_conv(nk(), cin, 48, 1),
            "branch5x5_2": init_basic_conv(nk(), 48, 64, 5),
            "branch3x3dbl_1": init_basic_conv(nk(), cin, 64, 1),
            "branch3x3dbl_2": init_basic_conv(nk(), 64, 96, 3),
            "branch3x3dbl_3": init_basic_conv(nk(), 96, 96, 3),
            "branch_pool": init_basic_conv(nk(), cin, pool_feat, 1),
        }

    p["Mixed_5b"] = inception_a_params(192, 32)
    p["Mixed_5c"] = inception_a_params(256, 64)
    p["Mixed_5d"] = inception_a_params(288, 64)
    return p


# ----------------------------------------------------------------------------
# Pure-JAX reference. Matmul precision mirrors the kernel (bf16 inputs, fp32
# accumulation) so the check validates im2col ordering / BN folding / pooling /
# branch-fusion plumbing tightly; pooling and the BN epilogue stay fp32.
# ----------------------------------------------------------------------------
def _ref_conv(x, p, stride, pad):
    y = lax.conv_general_dilated(
        x.astype(jnp.bfloat16), p["w4d"].astype(jnp.bfloat16),
        (stride, stride), [(pad, pad), (pad, pad)],
        dimension_numbers=("NHWC", "HWIO", "NHWC"),
        preferred_element_type=jnp.float32,
    )
    return jnp.maximum(y * p["scale"] + p["bias"], 0.0)


def _ref_maxpool(x):
    return lax.reduce_window(x, -jnp.inf, lax.max, (1, 3, 3, 1), (1, 2, 2, 1), "VALID")


def _ref_avgpool(x):
    s = lax.reduce_window(
        x, 0.0, lax.add, (1, 3, 3, 1), (1, 1, 1, 1),
        [(0, 0), (1, 1), (1, 1), (0, 0)],
    )
    return s / 9.0


def _ref_inception_a(x, p):
    b1 = _ref_conv(x, p["branch1x1"], 1, 0)
    b5 = _ref_conv(_ref_conv(x, p["branch5x5_1"], 1, 0), p["branch5x5_2"], 1, 2)
    b3 = _ref_conv(x, p["branch3x3dbl_1"], 1, 0)
    b3 = _ref_conv(b3, p["branch3x3dbl_2"], 1, 1)
    b3 = _ref_conv(b3, p["branch3x3dbl_3"], 1, 1)
    bp = _ref_conv(_ref_avgpool(x), p["branch_pool"], 1, 0)
    return jnp.concatenate([b1, b5, b3, bp], axis=-1)


def reference_forward(params, x_nchw):
    x = jnp.transpose(x_nchw, (0, 2, 3, 1))
    x = _ref_conv(x, params["Conv2d_1a_3x3"], 2, 0)
    x = _ref_conv(x, params["Conv2d_2a_3x3"], 1, 0)
    x = _ref_conv(x, params["Conv2d_2b_3x3"], 1, 1)
    x = _ref_maxpool(x)
    x = _ref_conv(x, params["Conv2d_3b_1x1"], 1, 0)
    x = _ref_conv(x, params["Conv2d_4a_3x3"], 1, 0)
    x = _ref_maxpool(x)
    x = _ref_inception_a(x, params["Mixed_5b"])
    x = _ref_inception_a(x, params["Mixed_5c"])
    x = _ref_inception_a(x, params["Mixed_5d"])
    return jnp.transpose(x, (0, 3, 1, 2))


# ----------------------------------------------------------------------------
if __name__ == "__main__":
    key = jax.random.PRNGKey(0)
    pkey, xkey = jax.random.split(key)
    params = init_params(pkey)

    # Small Inception-compatible input: 35x35 keeps all strided convs/pools valid.
    x = jax.random.normal(xkey, (2, 3, 35, 35), jnp.float32)  # NCHW like PyTorch

    fwd = jax.jit(my_inception3_forward)
    out = fwd(params, x)
    out = jax.block_until_ready(out)

    assert out.shape == (2, 288, 2, 2), out.shape

    ref = jax.block_until_ready(jax.jit(reference_forward)(params, x))
    assert jnp.allclose(out, ref, atol=2e-2, rtol=2e-2), (
        float(jnp.max(jnp.abs(out - ref)))
    )

    print("KERNEL_OK")
</pallas_src>

<mosaic_0001>
module attributes {stable_mosaic.version = 11 : i64} {
  func.func @_conv_bn_relu_kernel(%arg0: i32, %arg1: memref<128x27xbf16, #tpu.memory_space<vmem>>, %arg2: memref<27x128xbf16, #tpu.memory_space<vmem>>, %arg3: memref<1x128xf32, #tpu.memory_space<vmem>>, %arg4: memref<1x128xf32, #tpu.memory_space<vmem>>, %arg5: memref<128x128xf32, #tpu.memory_space<vmem>>) attributes {dimension_semantics = [#tpu.dimension_semantics<parallel>], iteration_bounds = array<i64: 5>, scalar_prefetch = 0 : i64, scratch_operands = 0 : i64, tpu.core_type = #tpu.core_type<tc>, window_params = [{transform_indices = @transform_0, window_bounds = array<i64: 128, 27>}, {pipeline_mode = #tpu.pipeline_mode<synchronous>, transform_indices = @transform_1, window_bounds = array<i64: 27, 128>}, {pipeline_mode = #tpu.pipeline_mode<synchronous>, transform_indices = @transform_2, window_bounds = array<i64: 1, 128>}, {pipeline_mode = #tpu.pipeline_mode<synchronous>, transform_indices = @transform_3, window_bounds = array<i64: 1, 128>}, {transform_indices = @transform_4, window_bounds = array<i64: 128, 128>}]} {
    %c0 = arith.constant 0 : index
    %c0_0 = arith.constant 0 : index
    %0 = vector.load %arg1[%c0, %c0_0] : memref<128x27xbf16, #tpu.memory_space<vmem>>, vector<128x27xbf16>
    %c0_1 = arith.constant 0 : index
    %c0_2 = arith.constant 0 : index
    %1 = vector.load %arg2[%c0_1, %c0_2] : memref<27x128xbf16, #tpu.memory_space<vmem>>, vector<27x128xbf16>
    %cst = arith.constant dense<0.000000e+00> : vector<128x128xf32>
    %2 = tpu.matmul %0, %1, %cst {dimension_numbers = #tpu.dot_dimension_numbers<[1], [0], [0], [1], [0, 0, 1, 1], [], []>} : vector<128x27xbf16>, vector<27x128xbf16>, vector<128x128xf32> -> vector<128x128xf32>
    %c0_3 = arith.constant 0 : index
    %c0_4 = arith.constant 0 : index
    %3 = vector.load %arg3[%c0_3, %c0_4] : memref<1x128xf32, #tpu.memory_space<vmem>>, vector<1x128xf32>
    %4 = vector.broadcast %3 : vector<1x128xf32> to vector<128x128xf32>
    %5 = arith.mulf %2, %4 : vector<128x128xf32>
    %c0_5 = arith.constant 0 : index
    %c0_6 = arith.constant 0 : index
    %6 = vector.load %arg4[%c0_5, %c0_6] : memref<1x128xf32, #tpu.memory_space<vmem>>, vector<1x128xf32>
    %7 = vector.broadcast %6 : vector<1x128xf32> to vector<128x128xf32>
    %8 = arith.addf %5, %7 : vector<128x128xf32>
    %cst_7 = arith.constant 0.000000e+00 : f32
    %9 = vector.broadcast %cst_7 : f32 to vector<128x128xf32>
    %10 = arith.maximumf %8, %9 : vector<128x128xf32>
    %c0_8 = arith.constant 0 : index
    %c0_9 = arith.constant 0 : index
    %11 = vector.load %arg5[%c0_8, %c0_9] : memref<128x128xf32, #tpu.memory_space<vmem>>, vector<128x128xf32>
    tpu.vector_store %arg5[%c0_8, %c0_9], %10 {strides = array<i32>} : memref<128x128xf32, #tpu.memory_space<vmem>>, vector<128x128xf32>,
    return
  }
  func.func @transform_0(%arg0: i32) -> (i32, i32) {
    %c0_i32 = arith.constant 0 : i32
    %c0_i32_0 = arith.constant 0 : i32
    return %arg0, %c0_i32 : i32, i32
  }
  func.func @transform_1(%arg0: i32) -> (i32, i32) {
    %c0_i32 = arith.constant 0 : i32
    %c0_i32_0 = arith.constant 0 : i32
    %c0_i32_1 = arith.constant 0 : i32
    return %c0_i32, %c0_i32_0 : i32, i32
  }
  func.func @transform_2(%arg0: i32) -> (i32, i32) {
    %c0_i32 = arith.constant 0 : i32
    %c0_i32_0 = arith.constant 0 : i32
    %c0_i32_1 = arith.constant 0 : i32
    return %c0_i32, %c0_i32_0 : i32, i32
  }
  func.func @transform_3(%arg0: i32) -> (i32, i32) {
    %c0_i32 = arith.constant 0 : i32
    %c0_i32_0 = arith.constant 0 : i32
    %c0_i32_1 = arith.constant 0 : i32
    return %c0_i32, %c0_i32_0 : i32, i32
  }
  func.func @transform_4(%arg0: i32) -> (i32, i32) {
    %c0_i32 = arith.constant 0 : i32
    %c0_i32_0 = arith.constant 0 : i32
    return %arg0, %c0_i32 : i32, i32
  }
}

module attributes {stable_mosaic.version = 11 : i64} {
  func.func @_conv_bn_relu_kernel(%arg0: i32, %arg1: memref<256x288xbf16, #tpu.memory_space<vmem>>, %arg2: memref<288x128xbf16, #tpu.memory_space<vmem>>, %arg3: memref<1x128xf32, #tpu.memory_space<vmem>>, %arg4: memref<1x128xf32, #tpu.memory_space<vmem>>, %arg5: memref<256x128xf32, #tpu.memory_space<vmem>>) attributes {dimension_semantics = [#tpu.dimension_semantics<parallel>], iteration_bounds = array<i64: 2>, scalar_prefetch = 0 : i64, scratch_operands = 0 : i64, tpu.core_type = #tpu.core_type<tc>, window_params = [{transform_indices = @transform_0, window_bounds = array<i64: 256, 288>}, {pipeline_mode = #tpu.pipeline_mode<synchronous>, transform_indices = @transform_1, window_bounds = array<i64: 288, 128>}, {pipeline_mode = #tpu.pipeline_mode<synchronous>, transform_indices = @transform_2, window_bounds = array<i64: 1, 128>}, {pipeline_mode = #tpu.pipeline_mode<synchronous>, transform_indices = @transform_3, window_bounds = array<i64: 1, 128>}, {transform_indices = @transform_4, window_bounds = array<i64: 256, 128>}]} {
    %c0 = arith.constant 0 : index
    %c0_0 = arith.constant 0 : index
    %0 = vector.load %arg1[%c0, %c0_0] : memref<256x288xbf16, #tpu.memory_space<vmem>>, vector<256x288xbf16>
    %c0_1 = arith.constant 0 : index
    %c0_2 = arith.constant 0 : index
    %1 = vector.load %arg2[%c0_1, %c0_2] : memref<288x128xbf16, #tpu.memory_space<vmem>>, vector<288x128xbf16>
    %cst = arith.constant dense<0.000000e+00> : vector<256x128xf32>
    %2 = tpu.matmul %0, %1, %cst {dimension_numbers = #tpu.dot_dimension_numbers<[1], [0], [0], [1], [0, 0, 1, 1], [], []>} : vector<256x288xbf16>, vector<288x128xbf16>, vector<256x128xf32> -> vector<256x128xf32>
    %c0_3 = arith.constant 0 : index
    %c0_4 = arith.constant 0 : index
    %3 = vector.load %arg3[%c0_3, %c0_4] : memref<1x128xf32, #tpu.memory_space<vmem>>, vector<1x128xf32>
    %4 = vector.broadcast %3 : vector<1x128xf32> to vector<256x128xf32>
    %5 = arith.mulf %2, %4 : vector<256x128xf32>
    %c0_5 = arith.constant 0 : index
    %c0_6 = arith.constant 0 : index
    %6 = vector.load %arg4[%c0_5, %c0_6] : memref<1x128xf32, #tpu.memory_space<vmem>>, vector<1x128xf32>
    %7 = vector.broadcast %6 : vector<1x128xf32> to vector<256x128xf32>
    %8 = arith.addf %5, %7 : vector<256x128xf32>
    %cst_7 = arith.constant 0.000000e+00 : f32
    %9 = vector.broadcast %cst_7 : f32 to vector<256x128xf32>
    %10 = arith.maximumf %8, %9 : vector<256x128xf32>
    %c0_8 = arith.constant 0 : index
    %c0_9 = arith.constant 0 : index
    %11 = vector.load %arg5[%c0_8, %c0_9] : memref<256x128xf32, #tpu.memory_space<vmem>>, vector<256x128xf32>
    tpu.vector_store %arg5[%c0_8, %c0_9], %10 {strides = array<i32>} : memref<256x128xf32, #tpu.memory_space<vmem>>, vector<256x128xf32>,
    return
  }
  func.func @transform_0(%arg0: i32) -> (i32, i32) {
    %c0_i32 = arith.constant 0 : i32
    %c0_i32_0 = arith.constant 0 : i32
    return %arg0, %c0_i32 : i32, i32
  }
  func.func @transform_1(%arg0: i32) -> (i32, i32) {
    %c0_i32 = arith.constant 0 : i32
    %c0_i32_0 = arith.constant 0 : i32
    %c0_i32_1 = arith.constant 0 : i32
    return %c0_i32, %c0_i32_0 : i32, i32
  }
  func.func @transform_2(%arg0: i32) -> (i32, i32) {
    %c0_i32 = arith.constant 0 : i32
    %c0_i32_0 = arith.constant 0 : i32
    %c0_i32_1 = arith.constant 0 : i32
    return %c0_i32, %c0_i32_0 : i32, i32
  }
  func.func @transform_3(%arg0: i32) -> (i32, i32) {
    %c0_i32 = arith.constant 0 : i32
    %c0_i32_0 = arith.constant 0 : i32
    %c0_i32_1 = arith.constant 0 : i32
    return %c0_i32, %c0_i32_0 : i32, i32
  }
  func.func @transform_4(%arg0: i32) -> (i32, i32) {
    %c0_i32 = arith.constant 0 : i32
    %c0_i32_0 = arith.constant 0 : i32
    return %arg0, %c0_i32 : i32, i32
  }
}

module attributes {stable_mosaic.version = 11 : i64} {
  func.func @_maxpool_kernel(%arg0: i32, %arg1: memref<9x112x64xf32, #tpu.memory_space<vmem>>, %arg2: memref<112x64xf32, #tpu.memory_space<vmem>>) attributes {dimension_semantics = [#tpu.dimension_semantics<parallel>], iteration_bounds = array<i64: 1>, scalar_prefetch = 0 : i64, scratch_operands = 0 : i64, tpu.core_type = #tpu.core_type<tc>, window_params = [{transform_indices = @transform_0, window_bounds = array<i64: 9, 112, 64>}, {transform_indices = @transform_1, window_bounds = array<i64: 112, 64>}]} {
    %c0 = arith.constant 0 : index
    %c0_0 = arith.constant 0 : index
    %c0_1 = arith.constant 0 : index
    %0 = vector.load %arg1[%c0, %c0_0, %c0_1] : memref<9x112x64xf32, #tpu.memory_space<vmem>>, vector<1x112x64xf32>
    %1 = vector.shape_cast %0 : vector<1x112x64xf32> to vector<112x64xf32>
    %c1 = arith.constant 1 : index
    %c0_2 = arith.constant 0 : index
    %c0_3 = arith.constant 0 : index
    %2 = vector.load %arg1[%c1, %c0_2, %c0_3] : memref<9x112x64xf32, #tpu.memory_space<vmem>>, vector<1x112x64xf32>
    %3 = vector.shape_cast %2 : vector<1x112x64xf32> to vector<112x64xf32>
    %4 = arith.maximumf %1, %3 : vector<112x64xf32>
    %c2 = arith.constant 2 : index
    %c0_4 = arith.constant 0 : index
    %c0_5 = arith.constant 0 : index
    %5 = vector.load %arg1[%c2, %c0_4, %c0_5] : memref<9x112x64xf32, #tpu.memory_space<vmem>>, vector<1x112x64xf32>
    %6 = vector.shape_cast %5 : vector<1x112x64xf32> to vector<112x64xf32>
    %7 = arith.maximumf %4, %6 : vector<112x64xf32>
    %c3 = arith.constant 3 : index
    %c0_6 = arith.constant 0 : index
    %c0_7 = arith.constant 0 : index
    %8 = vector.load %arg1[%c3, %c0_6, %c0_7] : memref<9x112x64xf32, #tpu.memory_space<vmem>>, vector<1x112x64xf32>
    %9 = vector.shape_cast %8 : vector<1x112x64xf32> to vector<112x64xf32>
    %10 = arith.maximumf %7, %9 : vector<112x64xf32>
    %c4 = arith.constant 4 : index
    %c0_8 = arith.constant 0 : index
    %c0_9 = arith.constant 0 : index
    %11 = vector.load %arg1[%c4, %c0_8, %c0_9] : memref<9x112x64xf32, #tpu.memory_space<vmem>>, vector<1x112x64xf32>
    %12 = vector.shape_cast %11 : vector<1x112x64xf32> to vector<112x64xf32>
    %13 = arith.maximumf %10, %12 : vector<112x64xf32>
    %c5 = arith.constant 5 : index
    %c0_10 = arith.constant 0 : index
    %c0_11 = arith.constant 0 : index
    %14 = vector.load %arg1[%c5, %c0_10, %c0_11] : memref<9x112x64xf32, #tpu.memory_space<vmem>>, vector<1x112x64xf32>
    %15 = vector.shape_cast %14 : vector<1x112x64xf32> to vector<112x64xf32>
    %16 = arith.maximumf %13, %15 : vector<112x64xf32>
    %c6 = arith.constant 6 : index
    %c0_12 = arith.constant 0 : index
    %c0_13 = arith.constant 0 : index
    %17 = vector.load %arg1[%c6, %c0_12, %c0_13] : memref<9x112x64xf32, #tpu.memory_space<vmem>>, vector<1x112x64xf32>
    %18 = vector.shape_cast %17 : vector<1x112x64xf32> to vector<112x64xf32>
    %19 = arith.maximumf %16, %18 : vector<112x64xf32>
    %c7 = arith.constant 7 : index
    %c0_14 = arith.constant 0 : index
    %c0_15 = arith.constant 0 : index
    %20 = vector.load %arg1[%c7, %c0_14, %c0_15] : memref<9x112x64xf32, #tpu.memory_space<vmem>>, vector<1x112x64xf32>
    %21 = vector.shape_cast %20 : vector<1x112x64xf32> to vector<112x64xf32>
    %22 = arith.maximumf %19, %21 : vector<112x64xf32>
    %c8 = arith.constant 8 : index
    %c0_16 = arith.constant 0 : index
    %c0_17 = arith.constant 0 : index
    %23 = vector.load %arg1[%c8, %c0_16, %c0_17] : memref<9x112x64xf32, #tpu.memory_space<vmem>>, vector<1x112x64xf32>
    %24 = vector.shape_cast %23 : vector<1x112x64xf32> to vector<112x64xf32>
    %25 = arith.maximumf %22, %24 : vector<112x64xf32>
    %c0_18 = arith.constant 0 : index
    %c0_19 = arith.constant 0 : index
    %26 = vector.load %arg2[%c0_18, %c0_19] : memref<112x64xf32, #tpu.memory_space<vmem>>, vector<112x64xf32>
    tpu.vector_store %arg2[%c0_18, %c0_19], %25 {strides = array<i32>} : memref<112x64xf32, #tpu.memory_space<vmem>>, vector<112x64xf32>,
    return
  }
  func.func @transform_0(%arg0: i32) -> (i32, i32, i32) {
    %c0_i32 = arith.constant 0 : i32
    %c0_i32_0 = arith.constant 0 : i32
    %c0_i32_1 = arith.constant 0 : i32
    return %c0_i32, %arg0, %c0_i32_0 : i32, i32, i32
  }
  func.func @transform_1(%arg0: i32) -> (i32, i32) {
    %c0_i32 = arith.constant 0 : i32
    %c0_i32_0 = arith.constant 0 : i32
    return %arg0, %c0_i32 : i32, i32
  }
}

module attributes {stable_mosaic.version = 11 : i64} {
  func.func @_conv_bn_relu_kernel(%arg0: i32, %arg1: memref<112x64xbf16, #tpu.memory_space<vmem>>, %arg2: memref<64x128xbf16, #tpu.memory_space<vmem>>, %arg3: memref<1x128xf32, #tpu.memory_space<vmem>>, %arg4: memref<1x128xf32, #tpu.memory_space<vmem>>, %arg5: memref<112x128xf32, #tpu.memory_space<vmem>>) attributes {dimension_semantics = [#tpu.dimension_semantics<parallel>], iteration_bounds = array<i64: 1>, scalar_prefetch = 0 : i64, scratch_operands = 0 : i64, tpu.core_type = #tpu.core_type<tc>, window_params = [{transform_indices = @transform_0, window_bounds = array<i64: 112, 64>}, {pipeline_mode = #tpu.pipeline_mode<synchronous>, transform_indices = @transform_1, window_bounds = array<i64: 64, 128>}, {pipeline_mode = #tpu.pipeline_mode<synchronous>, transform_indices = @transform_2, window_bounds = array<i64: 1, 128>}, {pipeline_mode = #tpu.pipeline_mode<synchronous>, transform_indices = @transform_3, window_bounds = array<i64: 1, 128>}, {transform_indices = @transform_4, window_bounds = array<i64: 112, 128>}]} {
    %c0 = arith.constant 0 : index
    %c0_0 = arith.constant 0 : index
    %0 = vector.load %arg1[%c0, %c0_0] : memref<112x64xbf16, #tpu.memory_space<vmem>>, vector<112x64xbf16>
    %c0_1 = arith.constant 0 : index
    %c0_2 = arith.constant 0 : index
    %1 = vector.load %arg2[%c0_1, %c0_2] : memref<64x128xbf16, #tpu.memory_space<vmem>>, vector<64x128xbf16>
    %cst = arith.constant dense<0.000000e+00> : vector<112x128xf32>
    %2 = tpu.matmul %0, %1, %cst {dimension_numbers = #tpu.dot_dimension_numbers<[1], [0], [0], [1], [0, 0, 1, 1], [], []>} : vector<112x64xbf16>, vector<64x128xbf16>, vector<112x128xf32> -> vector<112x128xf32>
    %c0_3 = arith.constant 0 : index
    %c0_4 = arith.constant 0 : index
    %3 = vector.load %arg3[%c0_3, %c0_4] : memref<1x128xf32, #tpu.memory_space<vmem>>, vector<1x128xf32>
    %4 = vector.broadcast %3 : vector<1x128xf32> to vector<112x128xf32>
    %5 = arith.mulf %2, %4 : vector<112x128xf32>
    %c0_5 = arith.constant 0 : index
    %c0_6 = arith.constant 0 : index
    %6 = vector.load %arg4[%c0_5, %c0_6] : memref<1x128xf32, #tpu.memory_space<vmem>>, vector<1x128xf32>
    %7 = vector.broadcast %6 : vector<1x128xf32> to vector<112x128xf32>
    %8 = arith.addf %5, %7 : vector<112x128xf32>
    %cst_7 = arith.constant 0.000000e+00 : f32
    %9 = vector.broadcast %cst_7 : f32 to vector<112x128xf32>
    %10 = arith.maximumf %8, %9 : vector<112x128xf32>
    %c0_8 = arith.constant 0 : index
    %c0_9 = arith.constant 0 : index
    %11 = vector.load %arg5[%c0_8, %c0_9] : memref<112x128xf32, #tpu.memory_space<vmem>>, vector<112x128xf32>
    tpu.vector_store %arg5[%c0_8, %c0_9], %10 {strides = array<i32>} : memref<112x128xf32, #tpu.memory_space<vmem>>, vector<112x128xf32>,
    return
  }
  func.func @transform_0(%arg0: i32) -> (i32, i32) {
    %c0_i32 = arith.constant 0 : i32
    %c0_i32_0 = arith.constant 0 : i32
    return %arg0, %c0_i32 : i32, i32
  }
  func.func @transform_1(%arg0: i32) -> (i32, i32) {
    %c0_i32 = arith.constant 0 : i32
    %c0_i32_0 = arith.constant 0 : i32
    %c0_i32_1 = arith.constant 0 : i32
    return %c0_i32, %c0_i32_0 : i32, i32
  }
  func.func @transform_2(%arg0: i32) -> (i32, i32) {
    %c0_i32 = arith.constant 0 : i32
    %c0_i32_0 = arith.constant 0 : i32
    %c0_i32_1 = arith.constant 0 : i32
    return %c0_i32, %c0_i32_0 : i32, i32
  }
  func.func @transform_3(%arg0: i32) -> (i32, i32) {
    %c0_i32 = arith.constant 0 : i32
    %c0_i32_0 = arith.constant 0 : i32
    %c0_i32_1 = arith.constant 0 : i32
    return %c0_i32, %c0_i32_0 : i32, i32
  }
  func.func @transform_4(%arg0: i32) -> (i32, i32) {
    %c0_i32 = arith.constant 0 : i32
    %c0_i32_0 = arith.constant 0 : i32
    return %arg0, %c0_i32 : i32, i32
  }
}

module attributes {stable_mosaic.version = 11 : i64} {
  func.func @_conv_bn_relu_kernel(%arg0: i32, %arg1: memref<64x720xbf16, #tpu.memory_space<vmem>>, %arg2: memref<720x256xbf16, #tpu.memory_space<vmem>>, %arg3: memref<1x256xf32, #tpu.memory_space<vmem>>, %arg4: memref<1x256xf32, #tpu.memory_space<vmem>>, %arg5: memref<64x256xf32, #tpu.memory_space<vmem>>) attributes {dimension_semantics = [#tpu.dimension_semantics<parallel>], iteration_bounds = array<i64: 1>, scalar_prefetch = 0 : i64, scratch_operands = 0 : i64, tpu.core_type = #tpu.core_type<tc>, window_params = [{transform_indices = @transform_0, window_bounds = array<i64: 64, 720>}, {pipeline_mode = #tpu.pipeline_mode<synchronous>, transform_indices = @transform_1, window_bounds = array<i64: 720, 256>}, {pipeline_mode = #tpu.pipeline_mode<synchronous>, transform_indices = @transform_2, window_bounds = array<i64: 1, 256>}, {pipeline_mode = #tpu.pipeline_mode<synchronous>, transform_indices = @transform_3, window_bounds = array<i64: 1, 256>}, {transform_indices = @transform_4, window_bounds = array<i64: 64, 256>}]} {
    %c0 = arith.constant 0 : index
    %c0_0 = arith.constant 0 : index
    %0 = vector.load %arg1[%c0, %c0_0] : memref<64x720xbf16, #tpu.memory_space<vmem>>, vector<64x720xbf16>
    %c0_1 = arith.constant 0 : index
    %c0_2 = arith.constant 0 : index
    %1 = vector.load %arg2[%c0_1, %c0_2] : memref<720x256xbf16, #tpu.memory_space<vmem>>, vector<720x256xbf16>
    %cst = arith.constant dense<0.000000e+00> : vector<64x256xf32>
    %2 = tpu.matmul %0, %1, %cst {dimension_numbers = #tpu.dot_dimension_numbers<[1], [0], [0], [1], [0, 0, 1, 1], [], []>} : vector<64x720xbf16>, vector<720x256xbf16>, vector<64x256xf32> -> vector<64x256xf32>
    %c0_3 = arith.constant 0 : index
    %c0_4 = arith.constant 0 : index
    %3 = vector.load %arg3[%c0_3, %c0_4] : memref<1x256xf32, #tpu.memory_space<vmem>>, vector<1x256xf32>
    %4 = vector.broadcast %3 : vector<1x256xf32> to vector<64x256xf32>
    %5 = arith.mulf %2, %4 : vector<64x256xf32>
    %c0_5 = arith.constant 0 : index
    %c0_6 = arith.constant 0 : index
    %6 = vector.load %arg4[%c0_5, %c0_6] : memref<1x256xf32, #tpu.memory_space<vmem>>, vector<1x256xf32>
    %7 = vector.broadcast %6 : vector<1x256xf32> to vector<64x256xf32>
    %8 = arith.addf %5, %7 : vector<64x256xf32>
    %cst_7 = arith.constant 0.000000e+00 : f32
    %9 = vector.broadcast %cst_7 : f32 to vector<64x256xf32>
    %10 = arith.maximumf %8, %9 : vector<64x256xf32>
    %c0_8 = arith.constant 0 : index
    %c0_9 = arith.constant 0 : index
    %11 = vector.load %arg5[%c0_8, %c0_9] : memref<64x256xf32, #tpu.memory_space<vmem>>, vector<64x256xf32>
    tpu.vector_store %arg5[%c0_8, %c0_9], %10 {strides = array<i32>} : memref<64x256xf32, #tpu.memory_space<vmem>>, vector<64x256xf32>,
    return
  }
  func.func @transform_0(%arg0: i32) -> (i32, i32) {
    %c0_i32 = arith.constant 0 : i32
    %c0_i32_0 = arith.constant 0 : i32
    return %arg0, %c0_i32 : i32, i32
  }
  func.func @transform_1(%arg0: i32) -> (i32, i32) {
    %c0_i32 = arith.constant 0 : i32
    %c0_i32_0 = arith.constant 0 : i32
    %c0_i32_1 = arith.constant 0 : i32
    return %c0_i32, %c0_i32_0 : i32, i32
  }
  func.func @transform_2(%arg0: i32) -> (i32, i32) {
    %c0_i32 = arith.constant 0 : i32
    %c0_i32_0 = arith.constant 0 : i32
    %c0_i32_1 = arith.constant 0 : i32
    return %c0_i32, %c0_i32_0 : i32, i32
  }
  func.func @transform_3(%arg0: i32) -> (i32, i32) {
    %c0_i32 = arith.constant 0 : i32
    %c0_i32_0 = arith.constant 0 : i32
    %c0_i32_1 = arith.constant 0 : i32
    return %c0_i32, %c0_i32_0 : i32, i32
  }
  func.func @transform_4(%arg0: i32) -> (i32, i32) {
    %c0_i32 = arith.constant 0 : i32
    %c0_i32_0 = arith.constant 0 : i32
    return %arg0, %c0_i32 : i32, i32
  }
}

module attributes {stable_mosaic.version = 11 : i64} {
  func.func @_maxpool_kernel(%arg0: i32, %arg1: memref<9x16x192xf32, #tpu.memory_space<vmem>>, %arg2: memref<16x192xf32, #tpu.memory_space<vmem>>) attributes {dimension_semantics = [#tpu.dimension_semantics<parallel>], iteration_bounds = array<i64: 1>, scalar_prefetch = 0 : i64, scratch_operands = 0 : i64, tpu.core_type = #tpu.core_type<tc>, window_params = [{transform_indices = @transform_0, window_bounds = array<i64: 9, 16, 192>}, {transform_indices = @transform_1, window_bounds = array<i64: 16, 192>}]} {
    %c0 = arith.constant 0 : index
    %c0_0 = arith.constant 0 : index
    %c0_1 = arith.constant 0 : index
    %0 = vector.load %arg1[%c0, %c0_0, %c0_1] : memref<9x16x192xf32, #tpu.memory_space<vmem>>, vector<1x16x192xf32>
    %1 = vector.shape_cast %0 : vector<1x16x192xf32> to vector<16x192xf32>
    %c1 = arith.constant 1 : index
    %c0_2 = arith.constant 0 : index
    %c0_3 = arith.constant 0 : index
    %2 = vector.load %arg1[%c1, %c0_2, %c0_3] : memref<9x16x192xf32, #tpu.memory_space<vmem>>, vector<1x16x192xf32>
    %3 = vector.shape_cast %2 : vector<1x16x192xf32> to vector<16x192xf32>
    %4 = arith.maximumf %1, %3 : vector<16x192xf32>
    %c2 = arith.constant 2 : index
    %c0_4 = arith.constant 0 : index
    %c0_5 = arith.constant 0 : index
    %5 = vector.load %arg1[%c2, %c0_4, %c0_5] : memref<9x16x192xf32, #tpu.memory_space<vmem>>, vector<1x16x192xf32>
    %6 = vector.shape_cast %5 : vector<1x16x192xf32> to vector<16x192xf32>
    %7 = arith.maximumf %4, %6 : vector<16x192xf32>
    %c3 = arith.constant 3 : index
    %c0_6 = arith.constant 0 : index
    %c0_7 = arith.constant 0 : index
    %8 = vector.load %arg1[%c3, %c0_6, %c0_7] : memref<9x16x192xf32, #tpu.memory_space<vmem>>, vector<1x16x192xf32>
    %9 = vector.shape_cast %8 : vector<1x16x192xf32> to vector<16x192xf32>
    %10 = arith.maximumf %7, %9 : vector<16x192xf32>
    %c4 = arith.constant 4 : index
    %c0_8 = arith.constant 0 : index
    %c0_9 = arith.constant 0 : index
    %11 = vector.load %arg1[%c4, %c0_8, %c0_9] : memref<9x16x192xf32, #tpu.memory_space<vmem>>, vector<1x16x192xf32>
    %12 = vector.shape_cast %11 : vector<1x16x192xf32> to vector<16x192xf32>
    %13 = arith.maximumf %10, %12 : vector<16x192xf32>
    %c5 = arith.constant 5 : index
    %c0_10 = arith.constant 0 : index
    %c0_11 = arith.constant 0 : index
    %14 = vector.load %arg1[%c5, %c0_10, %c0_11] : memref<9x16x192xf32, #tpu.memory_space<vmem>>, vector<1x16x192xf32>
    %15 = vector.shape_cast %14 : vector<1x16x192xf32> to vector<16x192xf32>
    %16 = arith.maximumf %13, %15 : vector<16x192xf32>
    %c6 = arith.constant 6 : index
    %c0_12 = arith.constant 0 : index
    %c0_13 = arith.constant 0 : index
    %17 = vector.load %arg1[%c6, %c0_12, %c0_13] : memref<9x16x192xf32, #tpu.memory_space<vmem>>, vector<1x16x192xf32>
    %18 = vector.shape_cast %17 : vector<1x16x192xf32> to vector<16x192xf32>
    %19 = arith.maximumf %16, %18 : vector<16x192xf32>
    %c7 = arith.constant 7 : index
    %c0_14 = arith.constant 0 : index
    %c0_15 = arith.constant 0 : index
    %20 = vector.load %arg1[%c7, %c0_14, %c0_15] : memref<9x16x192xf32, #tpu.memory_space<vmem>>, vector<1x16x192xf32>
    %21 = vector.shape_cast %20 : vector<1x16x192xf32> to vector<16x192xf32>
    %22 = arith.maximumf %19, %21 : vector<16x192xf32>
    %c8 = arith.constant 8 : index
    %c0_16 = arith.constant 0 : index
    %c0_17 = arith.constant 0 : index
    %23 = vector.load %arg1[%c8, %c0_16, %c0_17] : memref<9x16x192xf32, #tpu.memory_space<vmem>>, vector<1x16x192xf32>
    %24 = vector.shape_cast %23 : vector<1x16x192xf32> to vector<16x192xf32>
    %25 = arith.maximumf %22, %24 : vector<16x192xf32>
    %c0_18 = arith.constant 0 : index
    %c0_19 = arith.constant 0 : index
    %26 = vector.load %arg2[%c0_18, %c0_19] : memref<16x192xf32, #tpu.memory_space<vmem>>, vector<16x192xf32>
    tpu.vector_store %arg2[%c0_18, %c0_19], %25 {strides = array<i32>} : memref<16x192xf32, #tpu.memory_space<vmem>>, vector<16x192xf32>,
    return
  }
  func.func @transform_0(%arg0: i32) -> (i32, i32, i32) {
    %c0_i32 = arith.constant 0 : i32
    %c0_i32_0 = arith.constant 0 : i32
    %c0_i32_1 = arith.constant 0 : i32
    return %c0_i32, %arg0, %c0_i32_0 : i32, i32, i32
  }
  func.func @transform_1(%arg0: i32) -> (i32, i32) {
    %c0_i32 = arith.constant 0 : i32
    %c0_i32_0 = arith.constant 0 : i32
    return %arg0, %c0_i32 : i32, i32
  }
}

module attributes {stable_mosaic.version = 11 : i64} {
  func.func @_conv_bn_relu_kernel(%arg0: i32, %arg1: memref<16x192xbf16, #tpu.memory_space<vmem>>, %arg2: memref<192x256xbf16, #tpu.memory_space<vmem>>, %arg3: memref<1x256xf32, #tpu.memory_space<vmem>>, %arg4: memref<1x256xf32, #tpu.memory_space<vmem>>, %arg5: memref<16x256xf32, #tpu.memory_space<vmem>>) attributes {dimension_semantics = [#tpu.dimension_semantics<parallel>], iteration_bounds = array<i64: 1>, scalar_prefetch = 0 : i64, scratch_operands = 0 : i64, tpu.core_type = #tpu.core_type<tc>, window_params = [{transform_indices = @transform_0, window_bounds = array<i64: 16, 192>}, {pipeline_mode = #tpu.pipeline_mode<synchronous>, transform_indices = @transform_1, window_bounds = array<i64: 192, 256>}, {pipeline_mode = #tpu.pipeline_mode<synchronous>, transform_indices = @transform_2, window_bounds = array<i64: 1, 256>}, {pipeline_mode = #tpu.pipeline_mode<synchronous>, transform_indices = @transform_3, window_bounds = array<i64: 1, 256>}, {transform_indices = @transform_4, window_bounds = array<i64: 16, 256>}]} {
    %c0 = arith.constant 0 : index
    %c0_0 = arith.constant 0 : index
    %0 = vector.load %arg1[%c0, %c0_0] : memref<16x192xbf16, #tpu.memory_space<vmem>>, vector<16x192xbf16>
    %c0_1 = arith.constant 0 : index
    %c0_2 = arith.constant 0 : index
    %1 = vector.load %arg2[%c0_1, %c0_2] : memref<192x256xbf16, #tpu.memory_space<vmem>>, vector<192x256xbf16>
    %cst = arith.constant dense<0.000000e+00> : vector<16x256xf32>
    %2 = tpu.matmul %0, %1, %cst {dimension_numbers = #tpu.dot_dimension_numbers<[1], [0], [0], [1], [0, 0, 1, 1], [], []>} : vector<16x192xbf16>, vector<192x256xbf16>, vector<16x256xf32> -> vector<16x256xf32>
    %c0_3 = arith.constant 0 : index
    %c0_4 = arith.constant 0 : index
    %3 = vector.load %arg3[%c0_3, %c0_4] : memref<1x256xf32, #tpu.memory_space<vmem>>, vector<1x256xf32>
    %4 = vector.broadcast %3 : vector<1x256xf32> to vector<16x256xf32>
    %5 = arith.mulf %2, %4 : vector<16x256xf32>
    %c0_5 = arith.constant 0 : index
    %c0_6 = arith.constant 0 : index
    %6 = vector.load %arg4[%c0_5, %c0_6] : memref<1x256xf32, #tpu.memory_space<vmem>>, vector<1x256xf32>
    %7 = vector.broadcast %6 : vector<1x256xf32> to vector<16x256xf32>
    %8 = arith.addf %5, %7 : vector<16x256xf32>
    %cst_7 = arith.constant 0.000000e+00 : f32
    %9 = vector.broadcast %cst_7 : f32 to vector<16x256xf32>
    %10 = arith.maximumf %8, %9 : vector<16x256xf32>
    %c0_8 = arith.constant 0 : index
    %c0_9 = arith.constant 0 : index
    %11 = vector.load %arg5[%c0_8, %c0_9] : memref<16x256xf32, #tpu.memory_space<vmem>>, vector<16x256xf32>
    tpu.vector_store %arg5[%c0_8, %c0_9], %10 {strides = array<i32>} : memref<16x256xf32, #tpu.memory_space<vmem>>, vector<16x256xf32>,
    return
  }
  func.func @transform_0(%arg0: i32) -> (i32, i32) {
    %c0_i32 = arith.constant 0 : i32
    %c0_i32_0 = arith.constant 0 : i32
    return %arg0, %c0_i32 : i32, i32
  }
  func.func @transform_1(%arg0: i32) -> (i32, i32) {
    %c0_i32 = arith.constant 0 : i32
    %c0_i32_0 = arith.constant 0 : i32
    %c0_i32_1 = arith.constant 0 : i32
    return %c0_i32, %c0_i32_0 : i32, i32
  }
  func.func @transform_2(%arg0: i32) -> (i32, i32) {
    %c0_i32 = arith.constant 0 : i32
    %c0_i32_0 = arith.constant 0 : i32
    %c0_i32_1 = arith.constant 0 : i32
    return %c0_i32, %c0_i32_0 : i32, i32
  }
  func.func @transform_3(%arg0: i32) -> (i32, i32) {
    %c0_i32 = arith.constant 0 : i32
    %c0_i32_0 = arith.constant 0 : i32
    %c0_i32_1 = arith.constant 0 : i32
    return %c0_i32, %c0_i32_0 : i32, i32
  }
  func.func @transform_4(%arg0: i32) -> (i32, i32) {
    %c0_i32 = arith.constant 0 : i32
    %c0_i32_0 = arith.constant 0 : i32
    return %arg0, %c0_i32 : i32, i32
  }
}

module attributes {stable_mosaic.version = 11 : i64} {
  func.func @_conv_bn_relu_kernel(%arg0: i32, %arg1: memref<16x1200xbf16, #tpu.memory_space<vmem>>, %arg2: memref<1200x128xbf16, #tpu.memory_space<vmem>>, %arg3: memref<1x128xf32, #tpu.memory_space<vmem>>, %arg4: memref<1x128xf32, #tpu.memory_space<vmem>>, %arg5: memref<16x128xf32, #tpu.memory_space<vmem>>) attributes {dimension_semantics = [#tpu.dimension_semantics<parallel>], iteration_bounds = array<i64: 1>, scalar_prefetch = 0 : i64, scratch_operands = 0 : i64, tpu.core_type = #tpu.core_type<tc>, window_params = [{transform_indices = @transform_0, window_bounds = array<i64: 16, 1200>}, {pipeline_mode = #tpu.pipeline_mode<synchronous>, transform_indices = @transform_1, window_bounds = array<i64: 1200, 128>}, {pipeline_mode = #tpu.pipeline_mode<synchronous>, transform_indices = @transform_2, window_bounds = array<i64: 1, 128>}, {pipeline_mode = #tpu.pipeline_mode<synchronous>, transform_indices = @transform_3, window_bounds = array<i64: 1, 128>}, {transform_indices = @transform_4, window_bounds = array<i64: 16, 128>}]} {
    %c0 = arith.constant 0 : index
    %c0_0 = arith.constant 0 : index
    %0 = vector.load %arg1[%c0, %c0_0] : memref<16x1200xbf16, #tpu.memory_space<vmem>>, vector<16x1200xbf16>
    %c0_1 = arith.constant 0 : index
    %c0_2 = arith.constant 0 : index
    %1 = vector.load %arg2[%c0_1, %c0_2] : memref<1200x128xbf16, #tpu.memory_space<vmem>>, vector<1200x128xbf16>
    %cst = arith.constant dense<0.000000e+00> : vector<16x128xf32>
    %2 = tpu.matmul %0, %1, %cst {dimension_numbers = #tpu.dot_dimension_numbers<[1], [0], [0], [1], [0, 0, 1, 1], [], []>} : vector<16x1200xbf16>, vector<1200x128xbf16>, vector<16x128xf32> -> vector<16x128xf32>
    %c0_3 = arith.constant 0 : index
    %c0_4 = arith.constant 0 : index
    %3 = vector.load %arg3[%c0_3, %c0_4] : memref<1x128xf32, #tpu.memory_space<vmem>>, vector<1x128xf32>
    %4 = vector.broadcast %3 : vector<1x128xf32> to vector<16x128xf32>
    %5 = arith.mulf %2, %4 : vector<16x128xf32>
    %c0_5 = arith.constant 0 : index
    %c0_6 = arith.constant 0 : index
    %6 = vector.load %arg4[%c0_5, %c0_6] : memref<1x128xf32, #tpu.memory_space<vmem>>, vector<1x128xf32>
    %7 = vector.broadcast %6 : vector<1x128xf32> to vector<16x128xf32>
    %8 = arith.addf %5, %7 : vector<16x128xf32>
    %cst_7 = arith.constant 0.000000e+00 : f32
    %9 = vector.broadcast %cst_7 : f32 to vector<16x128xf32>
    %10 = arith.maximumf %8, %9 : vector<16x128xf32>
    %c0_8 = arith.constant 0 : index
    %c0_9 = arith.constant 0 : index
    %11 = vector.load %arg5[%c0_8, %c0_9] : memref<16x128xf32, #tpu.memory_space<vmem>>, vector<16x128xf32>
    tpu.vector_store %arg5[%c0_8, %c0_9], %10 {strides = array<i32>} : memref<16x128xf32, #tpu.memory_space<vmem>>, vector<16x128xf32>,
    return
  }
  func.func @transform_0(%arg0: i32) -> (i32, i32) {
    %c0_i32 = arith.constant 0 : i32
    %c0_i32_0 = arith.constant 0 : i32
    return %arg0, %c0_i32 : i32, i32
  }
  func.func @transform_1(%arg0: i32) -> (i32, i32) {
    %c0_i32 = arith.constant 0 : i32
    %c0_i32_0 = arith.constant 0 : i32
    %c0_i32_1 = arith.constant 0 : i32
    return %c0_i32, %c0_i32_0 : i32, i32
  }
  func.func @transform_2(%arg0: i32) -> (i32, i32) {
    %c0_i32 = arith.constant 0 : i32
    %c0_i32_0 = arith.constant 0 : i32
    %c0_i32_1 = arith.constant 0 : i32
    return %c0_i32, %c0_i32_0 : i32, i32
  }
  func.func @transform_3(%arg0: i32) -> (i32, i32) {
    %c0_i32 = arith.constant 0 : i32
    %c0_i32_0 = arith.constant 0 : i32
    %c0_i32_1 = arith.constant 0 : i32
    return %c0_i32, %c0_i32_0 : i32, i32
  }
  func.func @transform_4(%arg0: i32) -> (i32, i32) {
    %c0_i32 = arith.constant 0 : i32
    %c0_i32_0 = arith.constant 0 : i32
    return %arg0, %c0_i32 : i32, i32
  }
}

module attributes {stable_mosaic.version = 11 : i64} {
  func.func @_conv_bn_relu_kernel(%arg0: i32, %arg1: memref<16x576xbf16, #tpu.memory_space<vmem>>, %arg2: memref<576x128xbf16, #tpu.memory_space<vmem>>, %arg3: memref<1x128xf32, #tpu.memory_space<vmem>>, %arg4: memref<1x128xf32, #tpu.memory_space<vmem>>, %arg5: memref<16x128xf32, #tpu.memory_space<vmem>>) attributes {dimension_semantics = [#tpu.dimension_semantics<parallel>], iteration_bounds = array<i64: 1>, scalar_prefetch = 0 : i64, scratch_operands = 0 : i64, tpu.core_type = #tpu.core_type<tc>, window_params = [{transform_indices = @transform_0, window_bounds = array<i64: 16, 576>}, {pipeline_mode = #tpu.pipeline_mode<synchronous>, transform_indices = @transform_1, window_bounds = array<i64: 576, 128>}, {pipeline_mode = #tpu.pipeline_mode<synchronous>, transform_indices = @transform_2, window_bounds = array<i64: 1, 128>}, {pipeline_mode = #tpu.pipeline_mode<synchronous>, transform_indices = @transform_3, window_bounds = array<i64: 1, 128>}, {transform_indices = @transform_4, window_bounds = array<i64: 16, 128>}]} {
    %c0 = arith.constant 0 : index
    %c0_0 = arith.constant 0 : index
    %0 = vector.load %arg1[%c0, %c0_0] : memref<16x576xbf16, #tpu.memory_space<vmem>>, vector<16x576xbf16>
    %c0_1 = arith.constant 0 : index
    %c0_2 = arith.constant 0 : index
    %1 = vector.load %arg2[%c0_1, %c0_2] : memref<576x128xbf16, #tpu.memory_space<vmem>>, vector<576x128xbf16>
    %cst = arith.constant dense<0.000000e+00> : vector<16x128xf32>
    %2 = tpu.matmul %0, %1, %cst {dimension_numbers = #tpu.dot_dimension_numbers<[1], [0], [0], [1], [0, 0, 1, 1], [], []>} : vector<16x576xbf16>, vector<576x128xbf16>, vector<16x128xf32> -> vector<16x128xf32>
    %c0_3 = arith.constant 0 : index
    %c0_4 = arith.constant 0 : index
    %3 = vector.load %arg3[%c0_3, %c0_4] : memref<1x128xf32, #tpu.memory_space<vmem>>, vector<1x128xf32>
    %4 = vector.broadcast %3 : vector<1x128xf32> to vector<16x128xf32>
    %5 = arith.mulf %2, %4 : vector<16x128xf32>
    %c0_5 = arith.constant 0 : index
    %c0_6 = arith.constant 0 : index
    %6 = vector.load %arg4[%c0_5, %c0_6] : memref<1x128xf32, #tpu.memory_space<vmem>>, vector<1x128xf32>
    %7 = vector.broadcast %6 : vector<1x128xf32> to vector<16x128xf32>
    %8 = arith.addf %5, %7 : vector<16x128xf32>
    %cst_7 = arith.constant 0.000000e+00 : f32
    %9 = vector.broadcast %cst_7 : f32 to vector<16x128xf32>
    %10 = arith.maximumf %8, %9 : vector<16x128xf32>
    %c0_8 = arith.constant 0 : index
    %c0_9 = arith.constant 0 : index
    %11 = vector.load %arg5[%c0_8, %c0_9] : memref<16x128xf32, #tpu.memory_space<vmem>>, vector<16x128xf32>
    tpu.vector_store %arg5[%c0_8, %c0_9], %10 {strides = array<i32>} : memref<16x128xf32, #tpu.memory_space<vmem>>, vector<16x128xf32>,
    return
  }
  func.func @transform_0(%arg0: i32) -> (i32, i32) {
    %c0_i32 = arith.constant 0 : i32
    %c0_i32_0 = arith.constant 0 : i32
    return %arg0, %c0_i32 : i32, i32
  }
  func.func @transform_1(%arg0: i32) -> (i32, i32) {
    %c0_i32 = arith.constant 0 : i32
    %c0_i32_0 = arith.constant 0 : i32
    %c0_i32_1 = arith.constant 0 : i32
    return %c0_i32, %c0_i32_0 : i32, i32
  }
  func.func @transform_2(%arg0: i32) -> (i32, i32) {
    %c0_i32 = arith.constant 0 : i32
    %c0_i32_0 = arith.constant 0 : i32
    %c0_i32_1 = arith.constant 0 : i32
    return %c0_i32, %c0_i32_0 : i32, i32
  }
  func.func @transform_3(%arg0: i32) -> (i32, i32) {
    %c0_i32 = arith.constant 0 : i32
    %c0_i32_0 = arith.constant 0 : i32
    %c0_i32_1 = arith.constant 0 : i32
    return %c0_i32, %c0_i32_0 : i32, i32
  }
  func.func @transform_4(%arg0: i32) -> (i32, i32) {
    %c0_i32 = arith.constant 0 : i32
    %c0_i32_0 = arith.constant 0 : i32
    return %arg0, %c0_i32 : i32, i32
  }
}

module attributes {stable_mosaic.version = 11 : i64} {
  func.func @_conv_bn_relu_kernel(%arg0: i32, %arg1: memref<16x864xbf16, #tpu.memory_space<vmem>>, %arg2: memref<864x128xbf16, #tpu.memory_space<vmem>>, %arg3: memref<1x128xf32, #tpu.memory_space<vmem>>, %arg4: memref<1x128xf32, #tpu.memory_space<vmem>>, %arg5: memref<16x128xf32, #tpu.memory_space<vmem>>) attributes {dimension_semantics = [#tpu.dimension_semantics<parallel>], iteration_bounds = array<i64: 1>, scalar_prefetch = 0 : i64, scratch_operands = 0 : i64, tpu.core_type = #tpu.core_type<tc>, window_params = [{transform_indices = @transform_0, window_bounds = array<i64: 16, 864>}, {pipeline_mode = #tpu.pipeline_mode<synchronous>, transform_indices = @transform_1, window_bounds = array<i64: 864, 128>}, {pipeline_mode = #tpu.pipeline_mode<synchronous>, transform_indices = @transform_2, window_bounds = array<i64: 1, 128>}, {pipeline_mode = #tpu.pipeline_mode<synchronous>, transform_indices = @transform_3, window_bounds = array<i64: 1, 128>}, {transform_indices = @transform_4, window_bounds = array<i64: 16, 128>}]} {
    %c0 = arith.constant 0 : index
    %c0_0 = arith.constant 0 : index
    %0 = vector.load %arg1[%c0, %c0_0] : memref<16x864xbf16, #tpu.memory_space<vmem>>, vector<16x864xbf16>
    %c0_1 = arith.constant 0 : index
    %c0_2 = arith.constant 0 : index
    %1 = vector.load %arg2[%c0_1, %c0_2] : memref<864x128xbf16, #tpu.memory_space<vmem>>, vector<864x128xbf16>
    %cst = arith.constant dense<0.000000e+00> : vector<16x128xf32>
    %2 = tpu.matmul %0, %1, %cst {dimension_numbers = #tpu.dot_dimension_numbers<[1], [0], [0], [1], [0, 0, 1, 1], [], []>} : vector<16x864xbf16>, vector<864x128xbf16>, vector<16x128xf32> -> vector<16x128xf32>
    %c0_3 = arith.constant 0 : index
    %c0_4 = arith.constant 0 : index
    %3 = vector.load %arg3[%c0_3, %c0_4] : memref<1x128xf32, #tpu.memory_space<vmem>>, vector<1x128xf32>
    %4 = vector.broadcast %3 : vector<1x128xf32> to vector<16x128xf32>
    %5 = arith.mulf %2, %4 : vector<16x128xf32>
    %c0_5 = arith.constant 0 : index
    %c0_6 = arith.constant 0 : index
    %6 = vector.load %arg4[%c0_5, %c0_6] : memref<1x128xf32, #tpu.memory_space<vmem>>, vector<1x128xf32>
    %7 = vector.broadcast %6 : vector<1x128xf32> to vector<16x128xf32>
    %8 = arith.addf %5, %7 : vector<16x128xf32>
    %cst_7 = arith.constant 0.000000e+00 : f32
    %9 = vector.broadcast %cst_7 : f32 to vector<16x128xf32>
    %10 = arith.maximumf %8, %9 : vector<16x128xf32>
    %c0_8 = arith.constant 0 : index
    %c0_9 = arith.constant 0 : index
    %11 = vector.load %arg5[%c0_8, %c0_9] : memref<16x128xf32, #tpu.memory_space<vmem>>, vector<16x128xf32>
    tpu.vector_store %arg5[%c0_8, %c0_9], %10 {strides = array<i32>} : memref<16x128xf32, #tpu.memory_space<vmem>>, vector<16x128xf32>,
    return
  }
  func.func @transform_0(%arg0: i32) -> (i32, i32) {
    %c0_i32 = arith.constant 0 : i32
    %c0_i32_0 = arith.constant 0 : i32
    return %arg0, %c0_i32 : i32, i32
  }
  func.func @transform_1(%arg0: i32) -> (i32, i32) {
    %c0_i32 = arith.constant 0 : i32
    %c0_i32_0 = arith.constant 0 : i32
    %c0_i32_1 = arith.constant 0 : i32
    return %c0_i32, %c0_i32_0 : i32, i32
  }
  func.func @transform_2(%arg0: i32) -> (i32, i32) {
    %c0_i32 = arith.constant 0 : i32
    %c0_i32_0 = arith.constant 0 : i32
    %c0_i32_1 = arith.constant 0 : i32
    return %c0_i32, %c0_i32_0 : i32, i32
  }
  func.func @transform_3(%arg0: i32) -> (i32, i32) {
    %c0_i32 = arith.constant 0 : i32
    %c0_i32_0 = arith.constant 0 : i32
    %c0_i32_1 = arith.constant 0 : i32
    return %c0_i32, %c0_i32_0 : i32, i32
  }
  func.func @transform_4(%arg0: i32) -> (i32, i32) {
    %c0_i32 = arith.constant 0 : i32
    %c0_i32_0 = arith.constant 0 : i32
    return %arg0, %c0_i32 : i32, i32
  }
}

module attributes {stable_mosaic.version = 11 : i64} {
  func.func @_avgpool_conv_bn_relu_kernel(%arg0: i32, %arg1: memref<9x16x192xf32, #tpu.memory_space<vmem>>, %arg2: memref<192x128xbf16, #tpu.memory_space<vmem>>, %arg3: memref<1x128xf32, #tpu.memory_space<vmem>>, %arg4: memref<1x128xf32, #tpu.memory_space<vmem>>, %arg5: memref<16x128xf32, #tpu.memory_space<vmem>>) attributes {dimension_semantics = [#tpu.dimension_semantics<parallel>], iteration_bounds = array<i64: 1>, scalar_prefetch = 0 : i64, scratch_operands = 0 : i64, tpu.core_type = #tpu.core_type<tc>, window_params = [{transform_indices = @transform_0, window_bounds = array<i64: 9, 16, 192>}, {pipeline_mode = #tpu.pipeline_mode<synchronous>, transform_indices = @transform_1, window_bounds = array<i64: 192, 128>}, {pipeline_mode = #tpu.pipeline_mode<synchronous>, transform_indices = @transform_2, window_bounds = array<i64: 1, 128>}, {pipeline_mode = #tpu.pipeline_mode<synchronous>, transform_indices = @transform_3, window_bounds = array<i64: 1, 128>}, {transform_indices = @transform_4, window_bounds = array<i64: 16, 128>}]} {
    %c0 = arith.constant 0 : index
    %c0_0 = arith.constant 0 : index
    %c0_1 = arith.constant 0 : index
    %0 = vector.load %arg1[%c0, %c0_0, %c0_1] : memref<9x16x192xf32, #tpu.memory_space<vmem>>, vector<1x16x192xf32>
    %1 = vector.shape_cast %0 : vector<1x16x192xf32> to vector<16x192xf32>
    %c1 = arith.constant 1 : index
    %c0_2 = arith.constant 0 : index
    %c0_3 = arith.constant 0 : index
    %2 = vector.load %arg1[%c1, %c0_2, %c0_3] : memref<9x16x192xf32, #tpu.memory_space<vmem>>, vector<1x16x192xf32>
    %3 = vector.shape_cast %2 : vector<1x16x192xf32> to vector<16x192xf32>
    %4 = arith.addf %1, %3 : vector<16x192xf32>
    %c2 = arith.constant 2 : index
    %c0_4 = arith.constant 0 : index
    %c0_5 = arith.constant 0 : index
    %5 = vector.load %arg1[%c2, %c0_4, %c0_5] : memref<9x16x192xf32, #tpu.memory_space<vmem>>, vector<1x16x192xf32>
    %6 = vector.shape_cast %5 : vector<1x16x192xf32> to vector<16x192xf32>
    %7 = arith.addf %4, %6 : vector<16x192xf32>
    %c3 = arith.constant 3 : index
    %c0_6 = arith.constant 0 : index
    %c0_7 = arith.constant 0 : index
    %8 = vector.load %arg1[%c3, %c0_6, %c0_7] : memref<9x16x192xf32, #tpu.memory_space<vmem>>, vector<1x16x192xf32>
    %9 = vector.shape_cast %8 : vector<1x16x192xf32> to vector<16x192xf32>
    %10 = arith.addf %7, %9 : vector<16x192xf32>
    %c4 = arith.constant 4 : index
    %c0_8 = arith.constant 0 : index
    %c0_9 = arith.constant 0 : index
    %11 = vector.load %arg1[%c4, %c0_8, %c0_9] : memref<9x16x192xf32, #tpu.memory_space<vmem>>, vector<1x16x192xf32>
    %12 = vector.shape_cast %11 : vector<1x16x192xf32> to vector<16x192xf32>
    %13 = arith.addf %10, %12 : vector<16x192xf32>
    %c5 = arith.constant 5 : index
    %c0_10 = arith.constant 0 : index
    %c0_11 = arith.constant 0 : index
    %14 = vector.load %arg1[%c5, %c0_10, %c0_11] : memref<9x16x192xf32, #tpu.memory_space<vmem>>, vector<1x16x192xf32>
    %15 = vector.shape_cast %14 : vector<1x16x192xf32> to vector<16x192xf32>
    %16 = arith.addf %13, %15 : vector<16x192xf32>
    %c6 = arith.constant 6 : index
    %c0_12 = arith.constant 0 : index
    %c0_13 = arith.constant 0 : index
    %17 = vector.load %arg1[%c6, %c0_12, %c0_13] : memref<9x16x192xf32, #tpu.memory_space<vmem>>, vector<1x16x192xf32>
    %18 = vector.shape_cast %17 : vector<1x16x192xf32> to vector<16x192xf32>
    %19 = arith.addf %16, %18 : vector<16x192xf32>
    %c7 = arith.constant 7 : index
    %c0_14 = arith.constant 0 : index
    %c0_15 = arith.constant 0 : index
    %20 = vector.load %arg1[%c7, %c0_14, %c0_15] : memref<9x16x192xf32, #tpu.memory_space<vmem>>, vector<1x16x192xf32>
    %21 = vector.shape_cast %20 : vector<1x16x192xf32> to vector<16x192xf32>
    %22 = arith.addf %19, %21 : vector<16x192xf32>
    %c8 = arith.constant 8 : index
    %c0_16 = arith.constant 0 : index
    %c0_17 = arith.constant 0 : index
    %23 = vector.load %arg1[%c8, %c0_16, %c0_17] : memref<9x16x192xf32, #tpu.memory_space<vmem>>, vector<1x16x192xf32>
    %24 = vector.shape_cast %23 : vector<1x16x192xf32> to vector<16x192xf32>
    %25 = arith.addf %22, %24 : vector<16x192xf32>
    %cst = arith.constant 0.111111112 : f32
    %26 = vector.broadcast %cst : f32 to vector<16x192xf32>
    %27 = arith.mulf %25, %26 : vector<16x192xf32>
    %28 = arith.truncf %27 : vector<16x192xf32> to vector<16x192xbf16>
    %c0_18 = arith.constant 0 : index
    %c0_19 = arith.constant 0 : index
    %29 = vector.load %arg2[%c0_18, %c0_19] : memref<192x128xbf16, #tpu.memory_space<vmem>>, vector<192x128xbf16>
    %cst_20 = arith.constant dense<0.000000e+00> : vector<16x128xf32>
    %30 = tpu.matmul %28, %29, %cst_20 {dimension_numbers = #tpu.dot_dimension_numbers<[1], [0], [0], [1], [0, 0, 1, 1], [], []>} : vector<16x192xbf16>, vector<192x128xbf16>, vector<16x128xf32> -> vector<16x128xf32>
    %c0_21 = arith.constant 0 : index
    %c0_22 = arith.constant 0 : index
    %31 = vector.load %arg3[%c0_21, %c0_22] : memref<1x128xf32, #tpu.memory_space<vmem>>, vector<1x128xf32>
    %32 = vector.broadcast %31 : vector<1x128xf32> to vector<16x128xf32>
    %33 = arith.mulf %30, %32 : vector<16x128xf32>
    %c0_23 = arith.constant 0 : index
    %c0_24 = arith.constant 0 : index
    %34 = vector.load %arg4[%c0_23, %c0_24] : memref<1x128xf32, #tpu.memory_space<vmem>>, vector<1x128xf32>
    %35 = vector.broadcast %34 : vector<1x128xf32> to vector<16x128xf32>
    %36 = arith.addf %33, %35 : vector<16x128xf32>
    %cst_25 = arith.constant 0.000000e+00 : f32
    %37 = vector.broadcast %cst_25 : f32 to vector<16x128xf32>
    %38 = arith.maximumf %36, %37 : vector<16x128xf32>
    %c0_26 = arith.constant 0 : index
    %c0_27 = arith.constant 0 : index
    %39 = vector.load %arg5[%c0_26, %c0_27] : memref<16x128xf32, #tpu.memory_space<vmem>>, vector<16x128xf32>
    tpu.vector_store %arg5[%c0_26, %c0_27], %38 {strides = array<i32>} : memref<16x128xf32, #tpu.memory_space<vmem>>, vector<16x128xf32>,
    return
  }
  func.func @transform_0(%arg0: i32) -> (i32, i32, i32) {
    %c0_i32 = arith.constant 0 : i32
    %c0_i32_0 = arith.constant 0 : i32
    %c0_i32_1 = arith.constant 0 : i32
    return %c0_i32, %arg0, %c0_i32_0 : i32, i32, i32
  }
  func.func @transform_1(%arg0: i32) -> (i32, i32) {
    %c0_i32 = arith.constant 0 : i32
    %c0_i32_0 = arith.constant 0 : i32
    %c0_i32_1 = arith.constant 0 : i32
    return %c0_i32, %c0_i32_0 : i32, i32
  }
  func.func @transform_2(%arg0: i32) -> (i32, i32) {
    %c0_i32 = arith.constant 0 : i32
    %c0_i32_0 = arith.constant 0 : i32
    %c0_i32_1 = arith.constant 0 : i32
    return %c0_i32, %c0_i32_0 : i32, i32
  }
  func.func @transform_3(%arg0: i32) -> (i32, i32) {
    %c0_i32 = arith.constant 0 : i32
    %c0_i32_0 = arith.constant 0 : i32
    %c0_i32_1 = arith.constant 0 : i32
    return %c0_i32, %c0_i32_0 : i32, i32
  }
  func.func @transform_4(%arg0: i32) -> (i32, i32) {
    %c0_i32 = arith.constant 0 : i32
    %c0_i32_0 = arith.constant 0 : i32
    return %arg0, %c0_i32 : i32, i32
  }
}

module attributes {stable_mosaic.version = 11 : i64} {
  func.func @_conv_bn_relu_kernel(%arg0: i32, %arg1: memref<16x256xbf16, #tpu.memory_space<vmem>>, %arg2: memref<256x256xbf16, #tpu.memory_space<vmem>>, %arg3: memref<1x256xf32, #tpu.memory_space<vmem>>, %arg4: memref<1x256xf32, #tpu.memory_space<vmem>>, %arg5: memref<16x256xf32, #tpu.memory_space<vmem>>) attributes {dimension_semantics = [#tpu.dimension_semantics<parallel>], iteration_bounds = array<i64: 1>, scalar_prefetch = 0 : i64, scratch_operands = 0 : i64, tpu.core_type = #tpu.core_type<tc>, window_params = [{transform_indices = @transform_0, window_bounds = array<i64: 16, 256>}, {pipeline_mode = #tpu.pipeline_mode<synchronous>, transform_indices = @transform_1, window_bounds = array<i64: 256, 256>}, {pipeline_mode = #tpu.pipeline_mode<synchronous>, transform_indices = @transform_2, window_bounds = array<i64: 1, 256>}, {pipeline_mode = #tpu.pipeline_mode<synchronous>, transform_indices = @transform_3, window_bounds = array<i64: 1, 256>}, {transform_indices = @transform_4, window_bounds = array<i64: 16, 256>}]} {
    %c0 = arith.constant 0 : index
    %c0_0 = arith.constant 0 : index
    %0 = vector.load %arg1[%c0, %c0_0] : memref<16x256xbf16, #tpu.memory_space<vmem>>, vector<16x256xbf16>
    %c0_1 = arith.constant 0 : index
    %c0_2 = arith.constant 0 : index
    %1 = vector.load %arg2[%c0_1, %c0_2] : memref<256x256xbf16, #tpu.memory_space<vmem>>, vector<256x256xbf16>
    %cst = arith.constant dense<0.000000e+00> : vector<16x256xf32>
    %2 = tpu.matmul %0, %1, %cst {dimension_numbers = #tpu.dot_dimension_numbers<[1], [0], [0], [1], [0, 0, 1, 1], [], []>} : vector<16x256xbf16>, vector<256x256xbf16>, vector<16x256xf32> -> vector<16x256xf32>
    %c0_3 = arith.constant 0 : index
    %c0_4 = arith.constant 0 : index
    %3 = vector.load %arg3[%c0_3, %c0_4] : memref<1x256xf32, #tpu.memory_space<vmem>>, vector<1x256xf32>
    %4 = vector.broadcast %3 : vector<1x256xf32> to vector<16x256xf32>
    %5 = arith.mulf %2, %4 : vector<16x256xf32>
    %c0_5 = arith.constant 0 : index
    %c0_6 = arith.constant 0 : index
    %6 = vector.load %arg4[%c0_5, %c0_6] : memref<1x256xf32, #tpu.memory_space<vmem>>, vector<1x256xf32>
    %7 = vector.broadcast %6 : vector<1x256xf32> to vector<16x256xf32>
    %8 = arith.addf %5, %7 : vector<16x256xf32>
    %cst_7 = arith.constant 0.000000e+00 : f32
    %9 = vector.broadcast %cst_7 : f32 to vector<16x256xf32>
    %10 = arith.maximumf %8, %9 : vector<16x256xf32>
    %c0_8 = arith.constant 0 : index
    %c0_9 = arith.constant 0 : index
    %11 = vector.load %arg5[%c0_8, %c0_9] : memref<16x256xf32, #tpu.memory_space<vmem>>, vector<16x256xf32>
    tpu.vector_store %arg5[%c0_8, %c0_9], %10 {strides = array<i32>} : memref<16x256xf32, #tpu.memory_space<vmem>>, vector<16x256xf32>,
    return
  }
  func.func @transform_0(%arg0: i32) -> (i32, i32) {
    %c0_i32 = arith.constant 0 : i32
    %c0_i32_0 = arith.constant 0 : i32
    return %arg0, %c0_i32 : i32, i32
  }
  func.func @transform_1(%arg0: i32) -> (i32, i32) {
    %c0_i32 = arith.constant 0 : i32
    %c0_i32_0 = arith.constant 0 : i32
    %c0_i32_1 = arith.constant 0 : i32
    return %c0_i32, %c0_i32_0 : i32, i32
  }
  func.func @transform_2(%arg0: i32) -> (i32, i32) {
    %c0_i32 = arith.constant 0 : i32
    %c0_i32_0 = arith.constant 0 : i32
    %c0_i32_1 = arith.constant 0 : i32
    return %c0_i32, %c0_i32_0 : i32, i32
  }
  func.func @transform_3(%arg0: i32) -> (i32, i32) {
    %c0_i32 = arith.constant 0 : i32
    %c0_i32_0 = arith.constant 0 : i32
    %c0_i32_1 = arith.constant 0 : i32
    return %c0_i32, %c0_i32_0 : i32, i32
  }
  func.func @transform_4(%arg0: i32) -> (i32, i32) {
    %c0_i32 = arith.constant 0 : i32
    %c0_i32_0 = arith.constant 0 : i32
    return %arg0, %c0_i32 : i32, i32
  }
}

module attributes {stable_mosaic.version = 11 : i64} {
  func.func @_avgpool_conv_bn_relu_kernel(%arg0: i32, %arg1: memref<9x16x256xf32, #tpu.memory_space<vmem>>, %arg2: memref<256x128xbf16, #tpu.memory_space<vmem>>, %arg3: memref<1x128xf32, #tpu.memory_space<vmem>>, %arg4: memref<1x128xf32, #tpu.memory_space<vmem>>, %arg5: memref<16x128xf32, #tpu.memory_space<vmem>>) attributes {dimension_semantics = [#tpu.dimension_semantics<parallel>], iteration_bounds = array<i64: 1>, scalar_prefetch = 0 : i64, scratch_operands = 0 : i64, tpu.core_type = #tpu.core_type<tc>, window_params = [{transform_indices = @transform_0, window_bounds = array<i64: 9, 16, 256>}, {pipeline_mode = #tpu.pipeline_mode<synchronous>, transform_indices = @transform_1, window_bounds = array<i64: 256, 128>}, {pipeline_mode = #tpu.pipeline_mode<synchronous>, transform_indices = @transform_2, window_bounds = array<i64: 1, 128>}, {pipeline_mode = #tpu.pipeline_mode<synchronous>, transform_indices = @transform_3, window_bounds = array<i64: 1, 128>}, {transform_indices = @transform_4, window_bounds = array<i64: 16, 128>}]} {
    %c0 = arith.constant 0 : index
    %c0_0 = arith.constant 0 : index
    %c0_1 = arith.constant 0 : index
    %0 = vector.load %arg1[%c0, %c0_0, %c0_1] : memref<9x16x256xf32, #tpu.memory_space<vmem>>, vector<1x16x256xf32>
    %1 = vector.shape_cast %0 : vector<1x16x256xf32> to vector<16x256xf32>
    %c1 = arith.constant 1 : index
    %c0_2 = arith.constant 0 : index
    %c0_3 = arith.constant 0 : index
    %2 = vector.load %arg1[%c1, %c0_2, %c0_3] : memref<9x16x256xf32, #tpu.memory_space<vmem>>, vector<1x16x256xf32>
    %3 = vector.shape_cast %2 : vector<1x16x256xf32> to vector<16x256xf32>
    %4 = arith.addf %1, %3 : vector<16x256xf32>
    %c2 = arith.constant 2 : index
    %c0_4 = arith.constant 0 : index
    %c0_5 = arith.constant 0 : index
    %5 = vector.load %arg1[%c2, %c0_4, %c0_5] : memref<9x16x256xf32, #tpu.memory_space<vmem>>, vector<1x16x256xf32>
    %6 = vector.shape_cast %5 : vector<1x16x256xf32> to vector<16x256xf32>
    %7 = arith.addf %4, %6 : vector<16x256xf32>
    %c3 = arith.constant 3 : index
    %c0_6 = arith.constant 0 : index
    %c0_7 = arith.constant 0 : index
    %8 = vector.load %arg1[%c3, %c0_6, %c0_7] : memref<9x16x256xf32, #tpu.memory_space<vmem>>, vector<1x16x256xf32>
    %9 = vector.shape_cast %8 : vector<1x16x256xf32> to vector<16x256xf32>
    %10 = arith.addf %7, %9 : vector<16x256xf32>
    %c4 = arith.constant 4 : index
    %c0_8 = arith.constant 0 : index
    %c0_9 = arith.constant 0 : index
    %11 = vector.load %arg1[%c4, %c0_8, %c0_9] : memref<9x16x256xf32, #tpu.memory_space<vmem>>, vector<1x16x256xf32>
    %12 = vector.shape_cast %11 : vector<1x16x256xf32> to vector<16x256xf32>
    %13 = arith.addf %10, %12 : vector<16x256xf32>
    %c5 = arith.constant 5 : index
    %c0_10 = arith.constant 0 : index
    %c0_11 = arith.constant 0 : index
    %14 = vector.load %arg1[%c5, %c0_10, %c0_11] : memref<9x16x256xf32, #tpu.memory_space<vmem>>, vector<1x16x256xf32>
    %15 = vector.shape_cast %14 : vector<1x16x256xf32> to vector<16x256xf32>
    %16 = arith.addf %13, %15 : vector<16x256xf32>
    %c6 = arith.constant 6 : index
    %c0_12 = arith.constant 0 : index
    %c0_13 = arith.constant 0 : index
    %17 = vector.load %arg1[%c6, %c0_12, %c0_13] : memref<9x16x256xf32, #tpu.memory_space<vmem>>, vector<1x16x256xf32>
    %18 = vector.shape_cast %17 : vector<1x16x256xf32> to vector<16x256xf32>
    %19 = arith.addf %16, %18 : vector<16x256xf32>
    %c7 = arith.constant 7 : index
    %c0_14 = arith.constant 0 : index
    %c0_15 = arith.constant 0 : index
    %20 = vector.load %arg1[%c7, %c0_14, %c0_15] : memref<9x16x256xf32, #tpu.memory_space<vmem>>, vector<1x16x256xf32>
    %21 = vector.shape_cast %20 : vector<1x16x256xf32> to vector<16x256xf32>
    %22 = arith.addf %19, %21 : vector<16x256xf32>
    %c8 = arith.constant 8 : index
    %c0_16 = arith.constant 0 : index
    %c0_17 = arith.constant 0 : index
    %23 = vector.load %arg1[%c8, %c0_16, %c0_17] : memref<9x16x256xf32, #tpu.memory_space<vmem>>, vector<1x16x256xf32>
    %24 = vector.shape_cast %23 : vector<1x16x256xf32> to vector<16x256xf32>
    %25 = arith.addf %22, %24 : vector<16x256xf32>
    %cst = arith.constant 0.111111112 : f32
    %26 = vector.broadcast %cst : f32 to vector<16x256xf32>
    %27 = arith.mulf %25, %26 : vector<16x256xf32>
    %28 = arith.truncf %27 : vector<16x256xf32> to vector<16x256xbf16>
    %c0_18 = arith.constant 0 : index
    %c0_19 = arith.constant 0 : index
    %29 = vector.load %arg2[%c0_18, %c0_19] : memref<256x128xbf16, #tpu.memory_space<vmem>>, vector<256x128xbf16>
    %cst_20 = arith.constant dense<0.000000e+00> : vector<16x128xf32>
    %30 = tpu.matmul %28, %29, %cst_20 {dimension_numbers = #tpu.dot_dimension_numbers<[1], [0], [0], [1], [0, 0, 1, 1], [], []>} : vector<16x256xbf16>, vector<256x128xbf16>, vector<16x128xf32> -> vector<16x128xf32>
    %c0_21 = arith.constant 0 : index
    %c0_22 = arith.constant 0 : index
    %31 = vector.load %arg3[%c0_21, %c0_22] : memref<1x128xf32, #tpu.memory_space<vmem>>, vector<1x128xf32>
    %32 = vector.broadcast %31 : vector<1x128xf32> to vector<16x128xf32>
    %33 = arith.mulf %30, %32 : vector<16x128xf32>
    %c0_23 = arith.constant 0 : index
    %c0_24 = arith.constant 0 : index
    %34 = vector.load %arg4[%c0_23, %c0_24] : memref<1x128xf32, #tpu.memory_space<vmem>>, vector<1x128xf32>
    %35 = vector.broadcast %34 : vector<1x128xf32> to vector<16x128xf32>
    %36 = arith.addf %33, %35 : vector<16x128xf32>
    %cst_25 = arith.constant 0.000000e+00 : f32
    %37 = vector.broadcast %cst_25 : f32 to vector<16x128xf32>
    %38 = arith.maximumf %36, %37 : vector<16x128xf32>
    %c0_26 = arith.constant 0 : index
    %c0_27 = arith.constant 0 : index
    %39 = vector.load %arg5[%c0_26, %c0_27] : memref<16x128xf32, #tpu.memory_space<vmem>>, vector<16x128xf32>
    tpu.vector_store %arg5[%c0_26, %c0_27], %38 {strides = array<i32>} : memref<16x128xf32, #tpu.memory_space<vmem>>, vector<16x128xf32>,
    return
  }
  func.func @transform_0(%arg0: i32) -> (i32, i32, i32) {
    %c0_i32 = arith.constant 0 : i32
    %c0_i32_0 = arith.constant 0 : i32
    %c0_i32_1 = arith.constant 0 : i32
    return %c0_i32, %arg0, %c0_i32_0 : i32, i32, i32
  }
  func.func @transform_1(%arg0: i32) -> (i32, i32) {
    %c0_i32 = arith.constant 0 : i32
    %c0_i32_0 = arith.constant 0 : i32
    %c0_i32_1 = arith.constant 0 : i32
    return %c0_i32, %c0_i32_0 : i32, i32
  }
  func.func @transform_2(%arg0: i32) -> (i32, i32) {
    %c0_i32 = arith.constant 0 : i32
    %c0_i32_0 = arith.constant 0 : i32
    %c0_i32_1 = arith.constant 0 : i32
    return %c0_i32, %c0_i32_0 : i32, i32
  }
  func.func @transform_3(%arg0: i32) -> (i32, i32) {
    %c0_i32 = arith.constant 0 : i32
    %c0_i32_0 = arith.constant 0 : i32
    %c0_i32_1 = arith.constant 0 : i32
    return %c0_i32, %c0_i32_0 : i32, i32
  }
  func.func @transform_4(%arg0: i32) -> (i32, i32) {
    %c0_i32 = arith.constant 0 : i32
    %c0_i32_0 = arith.constant 0 : i32
    return %arg0, %c0_i32 : i32, i32
  }
}

module attributes {stable_mosaic.version = 11 : i64} {
  func.func @_conv_bn_relu_kernel(%arg0: i32, %arg1: memref<16x288xbf16, #tpu.memory_space<vmem>>, %arg2: memref<288x256xbf16, #tpu.memory_space<vmem>>, %arg3: memref<1x256xf32, #tpu.memory_space<vmem>>, %arg4: memref<1x256xf32, #tpu.memory_space<vmem>>, %arg5: memref<16x256xf32, #tpu.memory_space<vmem>>) attributes {dimension_semantics = [#tpu.dimension_semantics<parallel>], iteration_bounds = array<i64: 1>, scalar_prefetch = 0 : i64, scratch_operands = 0 : i64, tpu.core_type = #tpu.core_type<tc>, window_params = [{transform_indices = @transform_0, window_bounds = array<i64: 16, 288>}, {pipeline_mode = #tpu.pipeline_mode<synchronous>, transform_indices = @transform_1, window_bounds = array<i64: 288, 256>}, {pipeline_mode = #tpu.pipeline_mode<synchronous>, transform_indices = @transform_2, window_bounds = array<i64: 1, 256>}, {pipeline_mode = #tpu.pipeline_mode<synchronous>, transform_indices = @transform_3, window_bounds = array<i64: 1, 256>}, {transform_indices = @transform_4, window_bounds = array<i64: 16, 256>}]} {
    %c0 = arith.constant 0 : index
    %c0_0 = arith.constant 0 : index
    %0 = vector.load %arg1[%c0, %c0_0] : memref<16x288xbf16, #tpu.memory_space<vmem>>, vector<16x288xbf16>
    %c0_1 = arith.constant 0 : index
    %c0_2 = arith.constant 0 : index
    %1 = vector.load %arg2[%c0_1, %c0_2] : memref<288x256xbf16, #tpu.memory_space<vmem>>, vector<288x256xbf16>
    %cst = arith.constant dense<0.000000e+00> : vector<16x256xf32>
    %2 = tpu.matmul %0, %1, %cst {dimension_numbers = #tpu.dot_dimension_numbers<[1], [0], [0], [1], [0, 0, 1, 1], [], []>} : vector<16x288xbf16>, vector<288x256xbf16>, vector<16x256xf32> -> vector<16x256xf32>
    %c0_3 = arith.constant 0 : index
    %c0_4 = arith.constant 0 : index
    %3 = vector.load %arg3[%c0_3, %c0_4] : memref<1x256xf32, #tpu.memory_space<vmem>>, vector<1x256xf32>
    %4 = vector.broadcast %3 : vector<1x256xf32> to vector<16x256xf32>
    %5 = arith.mulf %2, %4 : vector<16x256xf32>
    %c0_5 = arith.constant 0 : index
    %c0_6 = arith.constant 0 : index
    %6 = vector.load %arg4[%c0_5, %c0_6] : memref<1x256xf32, #tpu.memory_space<vmem>>, vector<1x256xf32>
    %7 = vector.broadcast %6 : vector<1x256xf32> to vector<16x256xf32>
    %8 = arith.addf %5, %7 : vector<16x256xf32>
    %cst_7 = arith.constant 0.000000e+00 : f32
    %9 = vector.broadcast %cst_7 : f32 to vector<16x256xf32>
    %10 = arith.maximumf %8, %9 : vector<16x256xf32>
    %c0_8 = arith.constant 0 : index
    %c0_9 = arith.constant 0 : index
    %11 = vector.load %arg5[%c0_8, %c0_9] : memref<16x256xf32, #tpu.memory_space<vmem>>, vector<16x256xf32>
    tpu.vector_store %arg5[%c0_8, %c0_9], %10 {strides = array<i32>} : memref<16x256xf32, #tpu.memory_space<vmem>>, vector<16x256xf32>,
    return
  }
  func.func @transform_0(%arg0: i32) -> (i32, i32) {
    %c0_i32 = arith.constant 0 : i32
    %c0_i32_0 = arith.constant 0 : i32
    return %arg0, %c0_i32 : i32, i32
  }
  func.func @transform_1(%arg0: i32) -> (i32, i32) {
    %c0_i32 = arith.constant 0 : i32
    %c0_i32_0 = arith.constant 0 : i32
    %c0_i32_1 = arith.constant 0 : i32
    return %c0_i32, %c0_i32_0 : i32, i32
  }
  func.func @transform_2(%arg0: i32) -> (i32, i32) {
    %c0_i32 = arith.constant 0 : i32
    %c0_i32_0 = arith.constant 0 : i32
    %c0_i32_1 = arith.constant 0 : i32
    return %c0_i32, %c0_i32_0 : i32, i32
  }
  func.func @transform_3(%arg0: i32) -> (i32, i32) {
    %c0_i32 = arith.constant 0 : i32
    %c0_i32_0 = arith.constant 0 : i32
    %c0_i32_1 = arith.constant 0 : i32
    return %c0_i32, %c0_i32_0 : i32, i32
  }
  func.func @transform_4(%arg0: i32) -> (i32, i32) {
    %c0_i32 = arith.constant 0 : i32
    %c0_i32_0 = arith.constant 0 : i32
    return %arg0, %c0_i32 : i32, i32
  }
}

module attributes {stable_mosaic.version = 11 : i64} {
  func.func @_avgpool_conv_bn_relu_kernel(%arg0: i32, %arg1: memref<9x16x288xf32, #tpu.memory_space<vmem>>, %arg2: memref<288x128xbf16, #tpu.memory_space<vmem>>, %arg3: memref<1x128xf32, #tpu.memory_space<vmem>>, %arg4: memref<1x128xf32, #tpu.memory_space<vmem>>, %arg5: memref<16x128xf32, #tpu.memory_space<vmem>>) attributes {dimension_semantics = [#tpu.dimension_semantics<parallel>], iteration_bounds = array<i64: 1>, scalar_prefetch = 0 : i64, scratch_operands = 0 : i64, tpu.core_type = #tpu.core_type<tc>, window_params = [{transform_indices = @transform_0, window_bounds = array<i64: 9, 16, 288>}, {pipeline_mode = #tpu.pipeline_mode<synchronous>, transform_indices = @transform_1, window_bounds = array<i64: 288, 128>}, {pipeline_mode = #tpu.pipeline_mode<synchronous>, transform_indices = @transform_2, window_bounds = array<i64: 1, 128>}, {pipeline_mode = #tpu.pipeline_mode<synchronous>, transform_indices = @transform_3, window_bounds = array<i64: 1, 128>}, {transform_indices = @transform_4, window_bounds = array<i64: 16, 128>}]} {
    %c0 = arith.constant 0 : index
    %c0_0 = arith.constant 0 : index
    %c0_1 = arith.constant 0 : index
    %0 = vector.load %arg1[%c0, %c0_0, %c0_1] : memref<9x16x288xf32, #tpu.memory_space<vmem>>, vector<1x16x288xf32>
    %1 = vector.shape_cast %0 : vector<1x16x288xf32> to vector<16x288xf32>
    %c1 = arith.constant 1 : index
    %c0_2 = arith.constant 0 : index
    %c0_3 = arith.constant 0 : index
    %2 = vector.load %arg1[%c1, %c0_2, %c0_3] : memref<9x16x288xf32, #tpu.memory_space<vmem>>, vector<1x16x288xf32>
    %3 = vector.shape_cast %2 : vector<1x16x288xf32> to vector<16x288xf32>
    %4 = arith.addf %1, %3 : vector<16x288xf32>
    %c2 = arith.constant 2 : index
    %c0_4 = arith.constant 0 : index
    %c0_5 = arith.constant 0 : index
    %5 = vector.load %arg1[%c2, %c0_4, %c0_5] : memref<9x16x288xf32, #tpu.memory_space<vmem>>, vector<1x16x288xf32>
    %6 = vector.shape_cast %5 : vector<1x16x288xf32> to vector<16x288xf32>
    %7 = arith.addf %4, %6 : vector<16x288xf32>
    %c3 = arith.constant 3 : index
    %c0_6 = arith.constant 0 : index
    %c0_7 = arith.constant 0 : index
    %8 = vector.load %arg1[%c3, %c0_6, %c0_7] : memref<9x16x288xf32, #tpu.memory_space<vmem>>, vector<1x16x288xf32>
    %9 = vector.shape_cast %8 : vector<1x16x288xf32> to vector<16x288xf32>
    %10 = arith.addf %7, %9 : vector<16x288xf32>
    %c4 = arith.constant 4 : index
    %c0_8 = arith.constant 0 : index
    %c0_9 = arith.constant 0 : index
    %11 = vector.load %arg1[%c4, %c0_8, %c0_9] : memref<9x16x288xf32, #tpu.memory_space<vmem>>, vector<1x16x288xf32>
    %12 = vector.shape_cast %11 : vector<1x16x288xf32> to vector<16x288xf32>
    %13 = arith.addf %10, %12 : vector<16x288xf32>
    %c5 = arith.constant 5 : index
    %c0_10 = arith.constant 0 : index
    %c0_11 = arith.constant 0 : index
    %14 = vector.load %arg1[%c5, %c0_10, %c0_11] : memref<9x16x288xf32, #tpu.memory_space<vmem>>, vector<1x16x288xf32>
    %15 = vector.shape_cast %14 : vector<1x16x288xf32> to vector<16x288xf32>
    %16 = arith.addf %13, %15 : vector<16x288xf32>
    %c6 = arith.constant 6 : index
    %c0_12 = arith.constant 0 : index
    %c0_13 = arith.constant 0 : index
    %17 = vector.load %arg1[%c6, %c0_12, %c0_13] : memref<9x16x288xf32, #tpu.memory_space<vmem>>, vector<1x16x288xf32>
    %18 = vector.shape_cast %17 : vector<1x16x288xf32> to vector<16x288xf32>
    %19 = arith.addf %16, %18 : vector<16x288xf32>
    %c7 = arith.constant 7 : index
    %c0_14 = arith.constant 0 : index
    %c0_15 = arith.constant 0 : index
    %20 = vector.load %arg1[%c7, %c0_14, %c0_15] : memref<9x16x288xf32, #tpu.memory_space<vmem>>, vector<1x16x288xf32>
    %21 = vector.shape_cast %20 : vector<1x16x288xf32> to vector<16x288xf32>
    %22 = arith.addf %19, %21 : vector<16x288xf32>
    %c8 = arith.constant 8 : index
    %c0_16 = arith.constant 0 : index
    %c0_17 = arith.constant 0 : index
    %23 = vector.load %arg1[%c8, %c0_16, %c0_17] : memref<9x16x288xf32, #tpu.memory_space<vmem>>, vector<1x16x288xf32>
    %24 = vector.shape_cast %23 : vector<1x16x288xf32> to vector<16x288xf32>
    %25 = arith.addf %22, %24 : vector<16x288xf32>
    %cst = arith.constant 0.111111112 : f32
    %26 = vector.broadcast %cst : f32 to vector<16x288xf32>
    %27 = arith.mulf %25, %26 : vector<16x288xf32>
    %28 = arith.truncf %27 : vector<16x288xf32> to vector<16x288xbf16>
    %c0_18 = arith.constant 0 : index
    %c0_19 = arith.constant 0 : index
    %29 = vector.load %arg2[%c0_18, %c0_19] : memref<288x128xbf16, #tpu.memory_space<vmem>>, vector<288x128xbf16>
    %cst_20 = arith.constant dense<0.000000e+00> : vector<16x128xf32>
    %30 = tpu.matmul %28, %29, %cst_20 {dimension_numbers = #tpu.dot_dimension_numbers<[1], [0], [0], [1], [0, 0, 1, 1], [], []>} : vector<16x288xbf16>, vector<288x128xbf16>, vector<16x128xf32> -> vector<16x128xf32>
    %c0_21 = arith.constant 0 : index
    %c0_22 = arith.constant 0 : index
    %31 = vector.load %arg3[%c0_21, %c0_22] : memref<1x128xf32, #tpu.memory_space<vmem>>, vector<1x128xf32>
    %32 = vector.broadcast %31 : vector<1x128xf32> to vector<16x128xf32>
    %33 = arith.mulf %30, %32 : vector<16x128xf32>
    %c0_23 = arith.constant 0 : index
    %c0_24 = arith.constant 0 : index
    %34 = vector.load %arg4[%c0_23, %c0_24] : memref<1x128xf32, #tpu.memory_space<vmem>>, vector<1x128xf32>
    %35 = vector.broadcast %34 : vector<1x128xf32> to vector<16x128xf32>
    %36 = arith.addf %33, %35 : vector<16x128xf32>
    %cst_25 = arith.constant 0.000000e+00 : f32
    %37 = vector.broadcast %cst_25 : f32 to vector<16x128xf32>
    %38 = arith.maximumf %36, %37 : vector<16x128xf32>
    %c0_26 = arith.constant 0 : index
    %c0_27 = arith.constant 0 : index
    %39 = vector.load %arg5[%c0_26, %c0_27] : memref<16x128xf32, #tpu.memory_space<vmem>>, vector<16x128xf32>
    tpu.vector_store %arg5[%c0_26, %c0_27], %38 {strides = array<i32>} : memref<16x128xf32, #tpu.memory_space<vmem>>, vector<16x128xf32>,
    return
  }
  func.func @transform_0(%arg0: i32) -> (i32, i32, i32) {
    %c0_i32 = arith.constant 0 : i32
    %c0_i32_0 = arith.constant 0 : i32
    %c0_i32_1 = arith.constant 0 : i32
    return %c0_i32, %arg0, %c0_i32_0 : i32, i32, i32
  }
  func.func @transform_1(%arg0: i32) -> (i32, i32) {
    %c0_i32 = arith.constant 0 : i32
    %c0_i32_0 = arith.constant 0 : i32
    %c0_i32_1 = arith.constant 0 : i32
    return %c0_i32, %c0_i32_0 : i32, i32
  }
  func.func @transform_2(%arg0: i32) -> (i32, i32) {
    %c0_i32 = arith.constant 0 : i32
    %c0_i32_0 = arith.constant 0 : i32
    %c0_i32_1 = arith.constant 0 : i32
    return %c0_i32, %c0_i32_0 : i32, i32
  }
  func.func @transform_3(%arg0: i32) -> (i32, i32) {
    %c0_i32 = arith.constant 0 : i32
    %c0_i32_0 = arith.constant 0 : i32
    %c0_i32_1 = arith.constant 0 : i32
    return %c0_i32, %c0_i32_0 : i32, i32
  }
  func.func @transform_4(%arg0: i32) -> (i32, i32) {
    %c0_i32 = arith.constant 0 : i32
    %c0_i32_0 = arith.constant 0 : i32
    return %arg0, %c0_i32 : i32, i32
  }
}

</mosaic_0001>

<bundles_post_ra>
// kernel: my_inception3_forward.22
= control target key start
LH: loop header
LB: loop body
LE: loop exit
PB: predicated region body
PF: predicated region fallthrough
CT: control target
= control target key end

     0   :  { %s654_s15 = smov 0   ;;  %s749_s0 = inlined_call_operand.vmem [shape: bf16[640,27], index: 0, kind: input, shape index: {}]   ;;  %s750_s1 = inlined_call_operand.vmem [shape: bf16[27,128], index: 1, kind: input, shape index: {}]   ;;  %s751_s2 = inlined_call_operand.vmem [shape: f32[1,128], index: 2, kind: input, shape index: {}]   ;;  %s752_s3 = inlined_call_operand.vmem [shape: f32[1,128], index: 3, kind: input, shape index: {}]   ;;  %s753_s4 = inlined_call_operand.vmem [shape: f32[640,128], index: 4, kind: output, shape index: {}]  }
   0x1 LB: > { %s536_s16 = sadd.s32 4294967295, %s626_s15   ;;  %p540_p0 = scmp.ge.s32.totalorder %s626_s15, 1  ;;  %s626_s15 = sphi %s654_s15, %s14_s15  }
   0x2   : > { %p163_p1 = scmp.lt.s32.totalorder %s626_s15, 6 }
   0x4   : > { %p164_p2 = pnand %p540_p0, %p163_p1 }
   0x5   : > { %v610_v0 = vld [vmem:[%s750_s1] sm:$0xff] (!%p164_p2)   ;;  %vm298_vm0 = vcmask (!%p164_p2), 1044480   ;;  %v611_v1 = vld [vmem:[%s750_s1 + $0x8] sm:$0x3f] (!%p164_p2)   ;;  %vm299_vm1 = vcmask (!%p164_p2), 1045504   ;;  %s541_s21 = sshll.u32 (!%p164_p2), %s536_s16, 4 }
   0x6   : > { %167 = sbr.rel (%p164_p2) target bundleno = 249 (0xf9), region = 36  ;;  %577 = vmatprep.subr.bf16.mxu0 (!%p164_p2), %v610_v0  ;;  %597 = vmatprep.subr.bf16.mxu1 (!%p164_p2), %v610_v0  ;;  %v628_v2 = vmov (!%p164_p2), 65535   ;;  %p190_p3 = scmp.lt.s32.totalorder (!%p164_p2), %s541_s21, 79  ;;  %vm273_vm2 = vcmask (!%p164_p2), 220160   ;;  %v685_v14 = vld [vmem:[%s751_s2] ss:$0 sm:$0xff] (!%p164_p2) }
   0x7   : > { %578 = vmatpush3.bf16.msra.mxu0 (!%p164_p2), %v610_v0  ;;  %599 = vmatpush3.bf16.msra.mxu1 (!%p164_p2), %v610_v0  ;;  %v300_v3 = vsel (!%p164_p2), %vm298_vm0, 4294967295, %v628_v2  ;;  %v690_v16 = vld [vmem:[%s752_s3] ss:$0 sm:$0xff] (!%p164_p2) }
   0x8   : > { %v301_v4 = vsel (!%p164_p2), %vm299_vm1, %v300_v3, 0 }
   0x9   : > { %v303_v5 = vand.u32 (!%p164_p2), %v611_v1, %v301_v4 }
   0xb   : > { %579 = vmatprep.subr.bf16.mxu0 (!%p164_p2), %v303_v5  ;;  %598 = vmatprep.subr.bf16.mxu1 (!%p164_p2), %v303_v5 }
   0xc   : > { %580 = vmatpush3.bf16.msra.mxu0 (!%p164_p2), %v303_v5  ;;  %600 = vmatpush3.bf16.msra.mxu1 (!%p164_p2), %v303_v5 }
   0xd   : > { %s755_s21 = smov (!%p190_p3, %s541_s21), 79 }
   0xe   : > { %s542_s22 = sshll.u32 %s755_s21, 2  ;;  %s544_s30 = sshll.u32 %s755_s21, 3 }
   0xf   : > { %s193_s25 = scalar_lea.vmem %s749_s0, %s542_s22  ;;  %s702_s7 = scalar_lea.vmem %s753_s4, %s544_s30 }
  0x10   : > { %v612_v6 = vld [vmem:[%s193_s25] sm:$0xff]   ;;  %v614_v8 = vld [vmem:[%s193_s25 + $0x8] sm:$0xff]   ;;  %v616_v10 = vld [vmem:[%s193_s25 + $0x10] sm:$0xff]  }
  0x11   : > { %v613_v7 = vld [vmem:[%s193_s25 + $0x20] sm:$0xff]   ;;  %581 = vmatprep.mubr.msk.bf16.mxu0 %vm273_vm2, %v612_v6  ;;  %v615_v9 = vld [vmem:[%s193_s25 + $0x28] sm:$0xff]   ;;  %v617_v11 = vld [vmem:[%s193_s25 + $0x30] sm:$0xff]  }
  0x12   : > { %589 = vmatprep.mubr.msk.bf16.mxu1 %vm273_vm2, %v613_v7  ;;  %582 = vmatmul.mubr.msk.bf16.vlgmr.msra.gmra.mrb[0].mxu0 %vm273_vm2, %v614_v8  ;;  %v618_v12 = vld [vmem:[%s193_s25 + $0x18] sm:$0xff]  }
  0x13   : > { %590 = vmatmul.mubr.msk.bf16.vlgmr.msra.gmra.mrb[0].mxu1 %vm273_vm2, %v615_v9  ;;  %585 = vmatprep.mubr.msk.bf16.mxu0 %vm273_vm2, %v616_v10  ;;  %v619_v13 = vld [vmem:[%s193_s25 + $0x38] sm:$0xff]  }
  0x14   : > { %593 = vmatprep.mubr.msk.bf16.mxu1 %vm273_vm2, %v617_v11 }
  0x1a   : > { %586 = vmatmul.mubr.msk.bf16.gmra.mrb[4].mxu0 %vm273_vm2, %v618_v12 }
  0x1b   : > { %594 = vmatmul.mubr.msk.bf16.gmra.mrb[4].mxu1 %vm273_vm2, %v619_v13 }
  0xe5   : > { %v583_v15 = vpop.f32.mrb[0].mxu0 }
  0xe6   : > { %v411_v17 = vmul.f32 %v583_v15, %v685_v14  ;;  %v591_v18 = vpop.f32.mrb[0].mxu1  ;;  %v339_v19 = vpop.f32.mrb[1].mxu0 }
  0xe7   : > { %v419_v20 = vmul.f32 %v591_v18, %v685_v14  ;;  %v409_v21 = vmul.f32 %v685_v14, %v339_v19  ;;  %v371_v22 = vpop.f32.mrb[1].mxu1  ;;  %v584_v23 = vpop.f32.mrb[2].mxu0 }
  0xe8   : > { %v434_v24 = vadd.f32 %v690_v16, %v411_v17  ;;  %v417_v25 = vmul.f32 %v685_v14, %v371_v22  ;;  %v412_v26 = vmul.f32 %v584_v23, %v685_v14  ;;  %v592_v27 = vpop.f32.mrb[2].mxu1  ;;  %v342_v28 = vpop.f32.mrb[3].mxu0 }
  0xe9   : > { %v442_v29 = vadd.f32 %v690_v16, %v419_v20  ;;  %v432_v30 = vadd.f32 %v690_v16, %v409_v21  ;;  %v420_v31 = vmul.f32 %v592_v27, %v685_v14  ;;  %v410_v32 = vmul.f32 %v685_v14, %v342_v28  ;;  %v374_v33 = vpop.f32.mrb[3].mxu1 }
  0xea   : > { %v450_v34 = vmax.f32 %v434_v24, 0.0  ;;  %v440_v35 = vadd.f32 %v690_v16, %v417_v25  ;;  %v435_v36 = vadd.f32 %v690_v16, %v412_v26  ;;  %v418_v37 = vmul.f32 %v685_v14, %v374_v33 }
  0xeb   : > { %v458_v38 = vmax.f32 %v442_v29, 0.0  ;;  %v448_v39 = vmax.f32 %v432_v30, 0.0  ;;  %v443_v40 = vadd.f32 %v690_v16, %v420_v31  ;;  %v433_v41 = vadd.f32 %v690_v16, %v410_v32 }
  0xec   : > { %466 = vst [vmem:[%s702_s7 + $0x10] sm:$0xff] %v450_v34  ;;  %v456_v42 = vmax.f32 %v440_v35, 0.0  ;;  %v451_v43 = vmax.f32 %v435_v36, 0.0  ;;  %v441_v44 = vadd.f32 %v690_v16, %v418_v37 }
  0xed   : > { %474 = vst [vmem:[%s702_s7 + $0x50] sm:$0xff] %v458_v38  ;;  %464 = vst [vmem:[%s702_s7] sm:$0xff] %v448_v39  ;;  %v459_v45 = vmax.f32 %v443_v40, 0.0  ;;  %v449_v46 = vmax.f32 %v433_v41, 0.0  ;;  %v587_v47 = vpop.f32.mrb[4].mxu0 }
  0xee   : > { %472 = vst [vmem:[%s702_s7 + $0x40] sm:$0xff] %v456_v42  ;;  %467 = vst [vmem:[%s702_s7 + $0x18] sm:$0xff] %v451_v43  ;;  %v457_v48 = vmax.f32 %v441_v44, 0.0  ;;  %v415_v49 = vmul.f32 %v587_v47, %v685_v14  ;;  %v595_v50 = vpop.f32.mrb[4].mxu1  ;;  %v355_v51 = vpop.f32.mrb[5].mxu0 }
  0xef   : > { %475 = vst [vmem:[%s702_s7 + $0x58] sm:$0xff] %v459_v45  ;;  %465 = vst [vmem:[%s702_s7 + $0x8] sm:$0xff] %v449_v46  ;;  %v423_v52 = vmul.f32 %v595_v50, %v685_v14  ;;  %v413_v53 = vmul.f32 %v685_v14, %v355_v51  ;;  %v387_v54 = vpop.f32.mrb[5].mxu1  ;;  %v588_v55 = vpop.f32.mrb[6].mxu0 }
  0xf0   : > { %473 = vst [vmem:[%s702_s7 + $0x48] sm:$0xff] %v457_v48  ;;  %v438_v56 = vadd.f32 %v690_v16, %v415_v49  ;;  %v421_v57 = vmul.f32 %v685_v14, %v387_v54  ;;  %v416_v58 = vmul.f32 %v588_v55, %v685_v14  ;;  %v596_v59 = vpop.f32.mrb[6].mxu1  ;;  %v358_v60 = vpop.f32.mrb[7].mxu0 }
  0xf1   : > { %v446_v61 = vadd.f32 %v690_v16, %v423_v52  ;;  %v436_v62 = vadd.f32 %v690_v16, %v413_v53  ;;  %v424_v63 = vmul.f32 %v596_v59, %v685_v14  ;;  %v414_v0 = vmul.f32 %v685_v14, %v358_v60  ;;  %v390_v1 = vpop.f32.mrb[7].mxu1 }
  0xf2   : > { %v454_v2 = vmax.f32 %v438_v56, 0.0  ;;  %v444_v3 = vadd.f32 %v690_v16, %v421_v57  ;;  %v439_v4 = vadd.f32 %v690_v16, %v416_v58  ;;  %v422_v5 = vmul.f32 %v685_v14, %v390_v1 }
  0xf3   : > { %v462_v6 = vmax.f32 %v446_v61, 0.0  ;;  %v452_v7 = vmax.f32 %v436_v62, 0.0  ;;  %v447_v8 = vadd.f32 %v690_v16, %v424_v63  ;;  %v437_v9 = vadd.f32 %v690_v16, %v414_v0 }
  0xf4   : > { %470 = vst [vmem:[%s702_s7 + $0x30] sm:$0xff] %v454_v2  ;;  %v460_v10 = vmax.f32 %v444_v3, 0.0  ;;  %v455_v11 = vmax.f32 %v439_v4, 0.0  ;;  %v445_v12 = vadd.f32 %v690_v16, %v422_v5 }
  0xf5   : > { %478 = vst [vmem:[%s702_s7 + $0x70] sm:$0xff] %v462_v6  ;;  %468 = vst [vmem:[%s702_s7 + $0x20] sm:$0xff] %v452_v7  ;;  %v463_v13 = vmax.f32 %v447_v8, 0.0  ;;  %v453_v15 = vmax.f32 %v437_v9, 0.0 }
  0xf6   : > { %476 = vst [vmem:[%s702_s7 + $0x60] sm:$0xff] %v460_v10  ;;  %471 = vst [vmem:[%s702_s7 + $0x38] sm:$0xff] %v455_v11  ;;  %v461_v14 = vmax.f32 %v445_v12, 0.0 }
  0xf7   : > { %479 = vst [vmem:[%s702_s7 + $0x78] sm:$0xff] %v463_v13  ;;  %469 = vst [vmem:[%s702_s7 + $0x28] sm:$0xff] %v453_v15 }
  0xf8   : > { %477 = vst [vmem:[%s702_s7 + $0x68] sm:$0xff] %v461_v14 }
  0xf9 PF: > { %s14_s15 = sadd.s32 1, %s626_s15  }
  0xfa   : > { %p11_p4 = scmp.ge.s32.totalorder %s14_s15, 7  }
  0xfc   :  { %13 = sbr.rel (!%p11_p4) target bundleno = 1 (0x1), region = 66 }

// kernel: my_inception3_forward.23
= control target key start
LH: loop header
LB: loop body
LE: loop exit
PB: predicated region body
PF: predicated region fallthrough
CT: control target
= control target key end

     0   :  { %s1623_s15 = smov 0   ;;  %s1905_s0 = inlined_call_operand.vmem [shape: bf16[512,288], index: 0, kind: input, shape index: {}]   ;;  %s1906_s1 = inlined_call_operand.vmem [shape: bf16[288,128], index: 1, kind: input, shape index: {}]   ;;  %s1907_s2 = inlined_call_operand.vmem [shape: f32[1,128], index: 2, kind: input, shape index: {}]   ;;  %s1908_s3 = inlined_call_operand.vmem [shape: f32[1,128], index: 3, kind: input, shape index: {}]   ;;  %s1909_s4 = inlined_call_operand.vmem [shape: f32[512,128], index: 4, kind: output, shape index: {}]  }
   0x1 LB: > { %s1222_s16 = sadd.s32 4294967295, %s1596_s15   ;;  %p1226_p0 = scmp.ge.s32.totalorder %s1596_s15, 1  ;;  %s1596_s15 = sphi %s1623_s15, %s14_s15  }
   0x2   : > { %p164_p1 = scmp.lt.s32.totalorder %s1596_s15, 3 }
   0x4   : > { %p165_p2 = pnand %p1226_p0, %p164_p1 }
   0x5   : > { %v1508_v0 = vld [vmem:[%s1906_s1 + $0x40] sm:$0xff] (!%p165_p2)   ;;  %s1227_s19 = sshll.u32 (!%p165_p2), %s1222_s16, 5  ;;  %v1510_v2 = vld [vmem:[%s1906_s1 + $0x48] sm:$0xff] (!%p165_p2)   ;;  %v1512_v4 = vld [vmem:[%s1906_s1 + $0x50] sm:$0xff] (!%p165_p2)   ;;  %vm653_vm0 = vcmask (!%p165_p2), 261120  }
   0x6   : > { %168 = sbr.rel (%p165_p2) target bundleno = 352 (0x160), region = 36  ;;  %v1509_v1 = vld [vmem:[%s1906_s1] sm:$0xff] (!%p165_p2)   ;;  %1317 = vmatprep.subr.bf16.mxu0 (!%p165_p2), %v1508_v0  ;;  %1483 = vmatprep.subr.bf16.mxu1 (!%p165_p2), %v1508_v0  ;;  %p192_p3 = scmp.lt.s32.totalorder (!%p165_p2), %s1227_s19, 63  ;;  %v1511_v3 = vld [vmem:[%s1906_s1 + $0x8] sm:$0xff] (!%p165_p2)   ;;  %v1513_v5 = vld [vmem:[%s1906_s1 + $0x10] sm:$0xff] (!%p165_p2)  }
   0x7   : > { %1318 = vmatpush3.bf16.msra.mxu0 (!%p165_p2), %v1509_v1  ;;  %1491 = vmatpush3.bf16.msra.mxu1 (!%p165_p2), %v1509_v1  ;;  %v1514_v6 = vld [vmem:[%s1906_s1 + $0x58] sm:$0xff] (!%p165_p2)   ;;  %v1516_v8 = vld [vmem:[%s1906_s1 + $0x60] sm:$0xff] (!%p165_p2)   ;;  %v1518_v10 = vld [vmem:[%s1906_s1 + $0x68] sm:$0xff] (!%p165_p2)  }
   0x8   : > { %1319 = vmatprep.subr.bf16.mxu0 (!%p165_p2), %v1510_v2  ;;  %1484 = vmatprep.subr.bf16.mxu1 (!%p165_p2), %v1510_v2  ;;  %v1515_v7 = vld [vmem:[%s1906_s1 + $0x18] sm:$0xff] (!%p165_p2)   ;;  %v1517_v9 = vld [vmem:[%s1906_s1 + $0x20] sm:$0xff] (!%p165_p2)   ;;  %v1519_v13 = vld [vmem:[%s1906_s1 + $0x28] sm:$0xff] (!%p165_p2)  }
   0x9   : > { %v1520_v14 = vld [vmem:[%s1906_s1 + $0x70] sm:$0xff] (!%p165_p2)   ;;  %v1522_v16 = vld [vmem:[%s1906_s1 + $0x78] sm:$0xff] (!%p165_p2)   ;;  %v1530_v18 = vld [vmem:[%s1906_s1 + $0x80] sm:$0xff] (!%p165_p2)  }
   0xa   : > { %v1521_v15 = vld [vmem:[%s1906_s1 + $0x30] sm:$0xff] (!%p165_p2)   ;;  %v1523_v17 = vld [vmem:[%s1906_s1 + $0x38] sm:$0xff] (!%p165_p2)   ;;  %v1543_v23 = vld [vmem:[%s1906_s1 + $0x88] sm:$0xff] (!%p165_p2)  }
   0xb   : > { %1320 = vmatpush3.bf16.msra.mxu0 (!%p165_p2), %v1511_v3  ;;  %1492 = vmatpush3.bf16.msra.mxu1 (!%p165_p2), %v1511_v3 }
   0xc   : > { %1321 = vmatprep.subr.bf16.mxu0 (!%p165_p2), %v1512_v4  ;;  %1485 = vmatprep.subr.bf16.mxu1 (!%p165_p2), %v1512_v4 }
   0xd   : > { %s1911_s19 = smov (!%p192_p3, %s1227_s19), 63 }
   0xe   : > { %s1499_s6 = smul.u32 12, %s1911_s19  ;;  %s1230_s12 = sshll.u32 %s1911_s19, 3 }
   0xf   : > { %1322 = vmatpush3.bf16.msra.mxu0 %v1513_v5  ;;  %1493 = vmatpush3.bf16.msra.mxu1 %v1513_v5  ;;  %s1793_s16 = scalar_lea.vmem %s1909_s4, %s1230_s12 }
  0x10   : > { %1323 = vmatprep.subr.bf16.mxu0 %v1514_v6  ;;  %1486 = vmatprep.subr.bf16.mxu1 %v1514_v6  ;;  %s1664_s13 = scalar_lea.vmem %s1905_s0, %s1499_s6 }
  0x11   : > { %v1526_v11 = vld [vmem:[%s1664_s13 + $0x4] ss:$12 sps:$4 sm:$0xff]   ;;  %v1524_v19 = vld [vmem:[%s1664_s13] ss:$12 sps:$4 sm:$0xff]   ;;  %v1531_v21 = vld [vmem:[%s1664_s13 + $0x1c] ss:$12 sps:$4 sm:$0xff]  }
  0x12   : > { %v1529_v12 = vld [vmem:[%s1664_s13 + $0x124] ss:$12 sps:$4 sm:$0xff]   ;;  %734 = vmatprep.mubr.bf16.mxu0 %v1526_v11  ;;  %v1527_v20 = vld [vmem:[%s1664_s13 + $0x120] ss:$12 sps:$4 sm:$0xff]   ;;  %v1533_v22 = vld [vmem:[%s1664_s13 + $0x13c] ss:$12 sps:$4 sm:$0xff]  }
  0x13   : > { %1324 = vmatpush3.bf16.msra.mxu0 %v1515_v7  ;;  %1494 = vmatpush3.bf16.msra.mxu1 %v1515_v7  ;;  %v1535_v24 = vld [vmem:[%s1664_s13 + $0x18] ss:$12 sps:$4 sm:$0xff]   ;;  %v1537_v26 = vld [vmem:[%s1664_s13 + $0x34] ss:$12 sps:$4 sm:$0xff]   ;;  %v1541_v28 = vld [vmem:[%s1664_s13 + $0x30] ss:$12 sps:$4 sm:$0xff]  }
  0x14   : > { %1325 = vmatprep.subr.bf16.mxu0 %v1516_v8  ;;  %1487 = vmatprep.subr.bf16.mxu1 %v1516_v8  ;;  %v1536_v25 = vld [vmem:[%s1664_s13 + $0x138] ss:$12 sps:$4 sm:$0xff]   ;;  %v1539_v27 = vld [vmem:[%s1664_s13 + $0x154] ss:$12 sps:$4 sm:$0xff]   ;;  %v1542_v29 = vld [vmem:[%s1664_s13 + $0x150] ss:$12 sps:$4 sm:$0xff]  }
  0x15   : > { %830 = vmatprep.mubr.bf16.mxu1 %v1529_v12  ;;  %v1544_v30 = vld [vmem:[%s1664_s13 + $0x4c] ss:$12 sps:$4 sm:$0xff]   ;;  %v1548_v32 = vld [vmem:[%s1664_s13 + $0x48] ss:$12 sps:$4 sm:$0xff]   ;;  %v1550_v34 = vld [vmem:[%s1664_s13 + $0x64] ss:$12 sps:$4 sm:$0xff]  }
  0x16   : > { %v1546_v31 = vld [vmem:[%s1664_s13 + $0x16c] ss:$12 sps:$4 sm:$0xff]   ;;  %v1549_v33 = vld [vmem:[%s1664_s13 + $0x168] ss:$12 sps:$4 sm:$0xff]   ;;  %v1559_v41 = vld [vmem:[%s1664_s13 + $0x50] ss:$12 sps:$4 sm:$0xff]  }
  0x17   : > { %1326 = vmatpush3.bf16.msra.mxu0 %v1517_v9  ;;  %1495 = vmatpush3.bf16.msra.mxu1 %v1517_v9  ;;  %v1552_v35 = vld [vmem:[%s1664_s13 + $0x8] ss:$12 sps:$4 sm:$0xff]   ;;  %v1553_v36 = vld [vmem:[%s1664_s13 + $0x60] ss:$12 sps:$4 sm:$0xff]   ;;  %v1557_v39 = vld [vmem:[%s1664_s13 + $0x38] ss:$12 sps:$4 sm:$0xff]  }
  0x18   : > { %1327 = vmatprep.subr.bf16.mxu0 %v1518_v10  ;;  %1488 = vmatprep.subr.bf16.mxu1 %v1518_v10  ;;  %v1554_v37 = vld [vmem:[%s1664_s13 + $0x20] ss:$12 sps:$4 sm:$0xff]   ;;  %v1555_v38 = vld [vmem:[%s1664_s13 + $0x7c] ss:$12 sps:$4 sm:$0xff]   ;;  %v1558_v40 = vld [vmem:[%s1664_s13 + $0x78] ss:$12 sps:$4 sm:$0xff]  }
  0x19   : > { %v1560_v42 = vld [vmem:[%s1664_s13 + $0x94] ss:$12 sps:$4 sm:$0xff]   ;;  %v1563_v44 = vld [vmem:[%s1664_s13 + $0x90] ss:$12 sps:$4 sm:$0xff]   ;;  %v1565_v46 = vld [vmem:[%s1664_s13 + $0xac] ss:$12 sps:$4 sm:$0xff]  }
  0x1a   : > { %v1562_v43 = vld [vmem:[%s1664_s13 + $0x68] ss:$12 sps:$4 sm:$0xff]   ;;  %v1564_v45 = vld [vmem:[%s1664_s13 + $0x80] ss:$12 sps:$4 sm:$0xff]   ;;  %v1567_v47 = vld [vmem:[%s1664_s13 + $0x98] ss:$12 sps:$4 sm:$0xff]  }
  0x1b   : > { %1328 = vmatpush3.bf16.msra.mxu0 %v1519_v13  ;;  %1496 = vmatpush3.bf16.msra.mxu1 %v1519_v13  ;;  %v1568_v48 = vld [vmem:[%s1664_s13 + $0xa8] ss:$12 sps:$4 sm:$0xff]   ;;  %v1569_v49 = vld [vmem:[%s1664_s13 + $0xb0] ss:$12 sps:$4 sm:$0xff]   ;;  %v1573_v52 = vld [vmem:[%s1664_s13 + $0xc0] ss:$12 sps:$4 sm:$0xff]  }
  0x1c   : > { %1329 = vmatprep.subr.bf16.mxu0 %v1520_v14  ;;  %1489 = vmatprep.subr.bf16.mxu1 %v1520_v14  ;;  %v1570_v50 = vld [vmem:[%s1664_s13 + $0xc4] ss:$12 sps:$4 sm:$0xff]   ;;  %v1572_v51 = vld [vmem:[%s1664_s13 + $0xc8] ss:$12 sps:$4 sm:$0xff]   ;;  %v1574_v53 = vld [vmem:[%s1664_s13 + $0xe0] ss:$12 sps:$4 sm:$0xff]  }
  0x1d   : > { %v1575_v54 = vld [vmem:[%s1664_s13 + $0xdc] ss:$12 sps:$4 sm:$0xff]   ;;  %v1577_v55 = vld [vmem:[%s1664_s13 + $0xf8] ss:$12 sps:$4 sm:$0xff]   ;;  %v1580_v58 = vld [vmem:[%s1664_s13 + $0xf4] ss:$12 sps:$4 sm:$0xff]  }
  0x1e   : > { %v1578_v56 = vld [vmem:[%s1664_s13 + $0xd8] ss:$12 sps:$4 sm:$0xff]   ;;  %v1579_v57 = vld [vmem:[%s1664_s13 + $0x110] ss:$12 sps:$4 sm:$0xff]   ;;  %v1582_v59 = vld [vmem:[%s1664_s13 + $0x128] ss:$12 sps:$4 sm:$0xff]  }
  0x1f   : > { %1330 = vmatpush3.bf16.msra.mxu0 %v1521_v15  ;;  %1497 = vmatpush3.bf16.msra.mxu1 %v1521_v15  ;;  %v1583_v60 = vld [vmem:[%s1664_s13 + $0xf0] ss:$12 sps:$4 sm:$0xff]   ;;  %v1584_v61 = vld [vmem:[%s1664_s13 + $0x140] ss:$12 sps:$4 sm:$0xff]   ;;  %v1587_v63 = vld [vmem:[%s1664_s13 + $0x158] ss:$12 sps:$4 sm:$0xff]  }
  0x20   : > { %1331 = vmatprep.subr.bf16.mxu0 %v1522_v16  ;;  %1490 = vmatprep.subr.bf16.mxu1 %v1522_v16  ;;  %v1585_v62 = vld [vmem:[%s1664_s13 + $0x10c] ss:$12 sps:$4 sm:$0xff]   ;;  %v1588_v0 = vld [vmem:[%s1664_s13 + $0x108] ss:$12 sps:$4 sm:$0xff]   ;;  %v1589_v1 = vld [vmem:[%s1664_s13 + $0x170] ss:$12 sps:$4 sm:$0xff]  }
  0x23   : > { %1332 = vmatpush3.bf16.msra.mxu0 %v1523_v17  ;;  %1498 = vmatpush3.bf16.msra.mxu1 %v1523_v17 }
  0x24   : > { %1447 = vmatprep.subr.bf16.mxu1 %v1530_v18 }
  0x26   : > { %735 = vmatmul.mubr.bf16.vlgmr.msra.gmra.mrb[0].mxu0 %v1524_v19  ;;  %831 = vmatmul.mubr.bf16.vlgmr.msra.gmra.mrb[0].mxu1 %v1527_v20 }
  0x27   : > { %1448 = vmatpush3.bf16.msra.mxu1 %v1530_v18  ;;  %742 = vmatprep.mubr.bf16.mxu0 %v1531_v21 }
  0x28   : > { %838 = vmatprep.mubr.bf16.mxu1 %v1533_v22  ;;  %1449 = vmatprep.subr.bf16.mxu1 %v1543_v23 }
  0x2b   : > { %1450 = vmatpush3.bf16.msra.mxu1 %v1543_v23 }
  0x2e   : > { %743 = vmatmul.mubr.bf16.gmra.mrb[4].mxu0 %v1535_v24  ;;  %839 = vmatmul.mubr.bf16.gmra.mrb[4].mxu1 %v1536_v25 }
  0x2f   : > { %750 = vmatprep.mubr.bf16.mxu0 %v1537_v26  ;;  %846 = vmatprep.mubr.bf16.mxu1 %v1539_v27 }
  0x36   : > { %751 = vmatmul.mubr.bf16.gmra.mrb[8].mxu0 %v1541_v28  ;;  %847 = vmatmul.mubr.bf16.gmra.mrb[8].mxu1 %v1542_v29 }
  0x37   : > { %758 = vmatprep.mubr.bf16.mxu0 %v1544_v30  ;;  %854 = vmatprep.mubr.bf16.mxu1 %v1546_v31 }
  0x3e   : > { %759 = vmatmul.mubr.bf16.gmra.mrb[12].mxu0 %v1548_v32  ;;  %855 = vmatmul.mubr.bf16.gmra.mrb[12].mxu1 %v1549_v33 }
  0x3f   : > { %766 = vmatprep.mubr.bf16.mxu0 %v1550_v34  ;;  %1451 = vmatprep.mubr.msk.bf16.mxu1 %vm653_vm0, %v1552_v35 }
  0x46   : > { %767 = vmatmul.mubr.bf16.gmra.mrb[16].mxu0 %v1553_v36  ;;  %1452 = vmatmul.mubr.msk.bf16.vlgmr.msra.gmra.mrb[16].mxu1 %vm653_vm0, %v1554_v37 }
  0x47   : > { %774 = vmatprep.mubr.bf16.mxu0 %v1555_v38  ;;  %1455 = vmatprep.mubr.msk.bf16.mxu1 %vm653_vm0, %v1557_v39 }
  0x4e   : > { %775 = vmatmul.mubr.bf16.gmra.mrb[20].mxu0 %v1558_v40  ;;  %1456 = vmatmul.mubr.msk.bf16.gmra.mrb[20].mxu1 %vm653_vm0, %v1559_v41 }
  0x4f   : > { %782 = vmatprep.mubr.bf16.mxu0 %v1560_v42  ;;  %1459 = vmatprep.mubr.msk.bf16.mxu1 %vm653_vm0, %v1562_v43 }
  0x56   : > { %783 = vmatmul.mubr.bf16.gmra.mrb[24].mxu0 %v1563_v44  ;;  %1460 = vmatmul.mubr.msk.bf16.gmra.mrb[24].mxu1 %vm653_vm0, %v1564_v45 }
  0x57   : > { %790 = vmatprep.mubr.bf16.mxu0 %v1565_v46  ;;  %1463 = vmatprep.mubr.msk.bf16.mxu1 %vm653_vm0, %v1567_v47 }
  0x5e   : > { %791 = vmatmul.mubr.bf16.gmra.mrb[28].mxu0 %v1568_v48  ;;  %1464 = vmatmul.mubr.msk.bf16.gmra.mrb[28].mxu1 %vm653_vm0, %v1569_v49 }
  0x5f   : > { %798 = vmatprep.mubr.bf16.mxu0 %v1570_v50  ;;  %1467 = vmatprep.mubr.msk.bf16.mxu1 %vm653_vm0, %v1572_v51 }
  0x66   : > { %799 = vmatmul.mubr.bf16.gmra.mrb[32].mxu0 %v1573_v52  ;;  %1468 = vmatmul.mubr.msk.bf16.gmra.mrb[32].mxu1 %vm653_vm0, %v1574_v53  ;;  %v1778_v52 = vld [vmem:[%s1907_s2] ss:$0 sm:$0xff] }
  0x67   : > { %806 = vmatprep.mubr.bf16.mxu0 %v1575_v54  ;;  %1471 = vmatprep.mubr.msk.bf16.mxu1 %vm653_vm0, %v1577_v55 }
  0x6e   : > { %807 = vmatmul.mubr.bf16.gmra.mrb[36].mxu0 %v1578_v56  ;;  %1472 = vmatmul.mubr.msk.bf16.gmra.mrb[36].mxu1 %vm653_vm0, %v1579_v57  ;;  %v1783_v56 = vld [vmem:[%s1908_s3] ss:$0 sm:$0xff] }
  0x6f   : > { %814 = vmatprep.mubr.bf16.mxu0 %v1580_v58  ;;  %1475 = vmatprep.mubr.msk.bf16.mxu1 %vm653_vm0, %v1582_v59 }
  0x76   : > { %815 = vmatmul.mubr.bf16.gmra.mrb[40].mxu0 %v1583_v60  ;;  %1476 = vmatmul.mubr.msk.bf16.gmra.mrb[40].mxu1 %vm653_vm0, %v1584_v61 }
  0x77   : > { %822 = vmatprep.mubr.bf16.mxu0 %v1585_v62  ;;  %1479 = vmatprep.mubr.msk.bf16.mxu1 %vm653_vm0, %v1587_v63 }
  0x7e   : > { %823 = vmatmul.mubr.bf16.gmra.mrb[44].mxu0 %v1588_v0  ;;  %1480 = vmatmul.mubr.msk.bf16.gmra.mrb[44].mxu1 %vm653_vm0, %v1589_v1 }
  0xf9   : > { %v1333_v2 = vpop.f32.mrb[0].mxu0  ;;  %v1405_v3 = vpop.f32.mrb[0].mxu1 }
  0xfa   : > { %v1334_v4 = vpop.f32.mrb[1].mxu0  ;;  %v1406_v5 = vpop.f32.mrb[1].mxu1 }
  0xfb   : > { %v1335_v6 = vadd.f32 %v1334_v4, %v1333_v2  ;;  %v1757_v7 = vadd.f32 %v1406_v5, %v1405_v3  ;;  %v1336_v8 = vpop.f32.mrb[2].mxu0  ;;  %v1408_v9 = vpop.f32.mrb[2].mxu1 }
  0xfc   : > { %v1337_v10 = vpop.f32.mrb[3].mxu0  ;;  %v1409_v11 = vpop.f32.mrb[3].mxu1 }
  0xfd   : > { %v1338_v12 = vadd.f32 %v1337_v10, %v1336_v8  ;;  %v1759_v13 = vadd.f32 %v1409_v11, %v1408_v9 }
 0x101   : > { %v1339_v14 = vpop.f32.mrb[4].mxu0  ;;  %v1411_v15 = vpop.f32.mrb[4].mxu1 }
 0x102   : > { %v1340_v16 = vpop.f32.mrb[5].mxu0  ;;  %v1412_v17 = vpop.f32.mrb[5].mxu1 }
 0x103   : > { %v1341_v18 = vadd.f32 %v1340_v16, %v1339_v14  ;;  %v1761_v19 = vadd.f32 %v1412_v17, %v1411_v15  ;;  %v1342_v20 = vpop.f32.mrb[6].mxu0  ;;  %v1414_v21 = vpop.f32.mrb[6].mxu1 }
 0x104   : > { %v1343_v22 = vpop.f32.mrb[7].mxu0  ;;  %v1415_v23 = vpop.f32.mrb[7].mxu1 }
 0x105   : > { %v1344_v24 = vadd.f32 %v1343_v22, %v1342_v20  ;;  %v1763_v25 = vadd.f32 %v1415_v23, %v1414_v21 }
 0x109   : > { %v1345_v26 = vpop.f32.mrb[8].mxu0  ;;  %v1417_v27 = vpop.f32.mrb[8].mxu1 }
 0x10a   : > { %v1346_v28 = vpop.f32.mrb[9].mxu0  ;;  %v1418_v29 = vpop.f32.mrb[9].mxu1 }
 0x10b   : > { %v1347_v30 = vadd.f32 %v1346_v28, %v1345_v26  ;;  %v1765_v31 = vadd.f32 %v1418_v29, %v1417_v27  ;;  %v1348_v32 = vpop.f32.mrb[10].mxu0  ;;  %v1420_v33 = vpop.f32.mrb[10].mxu1 }
 0x10c   : > { %v1349_v34 = vpop.f32.mrb[11].mxu0  ;;  %v1421_v35 = vpop.f32.mrb[11].mxu1 }
 0x10d   : > { %v1767_v36 = vadd.f32 %v1349_v34, %v1348_v32  ;;  %v1769_v37 = vadd.f32 %v1421_v35, %v1420_v33 }
 0x111   : > { %v1351_v38 = vpop.f32.mrb[12].mxu0  ;;  %v1423_v39 = vpop.f32.mrb[12].mxu1 }
 0x112   : > { %v1352_v40 = vpop.f32.mrb[13].mxu0  ;;  %v1424_v41 = vpop.f32.mrb[13].mxu1 }
 0x113   : > { %v1353_v42 = vadd.f32 %v1352_v40, %v1351_v38  ;;  %v1771_v43 = vadd.f32 %v1424_v41, %v1423_v39  ;;  %v1354_v44 = vpop.f32.mrb[14].mxu0  ;;  %v1426_v45 = vpop.f32.mrb[14].mxu1 }
 0x114   : > { %v1355_v46 = vpop.f32.mrb[15].mxu0  ;;  %v1427_v47 = vpop.f32.mrb[15].mxu1 }
 0x115   : > { %v1356_v48 = vadd.f32 %v1355_v46, %v1354_v44  ;;  %v1773_v49 = vadd.f32 %v1427_v47, %v1426_v45 }
 0x119   : > { %v1357_v50 = vpop.f32.mrb[16].mxu0  ;;  %v1453_v51 = vpop.f32.mrb[16].mxu1 }
 0x11a   : > { %v906_v53 = vadd.f32 %v1453_v51, %v1341_v18  ;;  %v1358_v54 = vpop.f32.mrb[17].mxu0  ;;  %v897_v55 = vpop.f32.mrb[17].mxu1 }
 0x11b   : > { %v1359_v57 = vadd.f32 %v1358_v54, %v1357_v50  ;;  %v898_v58 = vadd.f32 %v1335_v6, %v897_v55  ;;  %v1360_v59 = vpop.f32.mrb[18].mxu0  ;;  %v1454_v60 = vpop.f32.mrb[18].mxu1 }
 0x11c   : > { %v1033_v61 = vmul.f32 %v1778_v52, %v906_v53  ;;  %v909_v62 = vadd.f32 %v1454_v60, %v1344_v24  ;;  %v1361_v63 = vpop.f32.mrb[19].mxu0  ;;  %v900_v0 = vpop.f32.mrb[19].mxu1 }
 0x11d   : > { %v1031_v1 = vmul.f32 %v1778_v52, %v898_v58  ;;  %v1362_v2 = vadd.f32 %v1361_v63, %v1360_v59  ;;  %v901_v3 = vadd.f32 %v1338_v12, %v900_v0 }
 0x11e   : > { %v1072_v4 = vadd.f32 %v1783_v56, %v1033_v61  ;;  %v1034_v5 = vmul.f32 %v1778_v52, %v909_v62 }
 0x11f   : > { %v1070_v6 = vadd.f32 %v1783_v56, %v1031_v1  ;;  %v1032_v8 = vmul.f32 %v1778_v52, %v901_v3 }
 0x120   : > { %v1104_v9 = vmax.f32 %v1072_v4, 0.0  ;;  %v1073_v10 = vadd.f32 %v1783_v56, %v1034_v5 }
 0x121   : > { %v1102_v11 = vmax.f32 %v1070_v6, 0.0  ;;  %v1071_v12 = vadd.f32 %v1783_v56, %v1032_v8  ;;  %v1363_v14 = vpop.f32.mrb[20].mxu0  ;;  %v1457_v15 = vpop.f32.mrb[20].mxu1 }
 0x122   : > { %1136 = vst [vmem:[%s1793_s16 + $0x10] sm:$0xff] %v1104_v9  ;;  %v1105_v16 = vmax.f32 %v1073_v10, 0.0  ;;  %v922_v17 = vadd.f32 %v1457_v15, %v1353_v42  ;;  %v1364_v18 = vpop.f32.mrb[21].mxu0  ;;  %v913_v20 = vpop.f32.mrb[21].mxu1 }
 0x123   : > { %1134 = vst [vmem:[%s1793_s16] sm:$0xff] %v1102_v11  ;;  %v1103_v21 = vmax.f32 %v1071_v12, 0.0  ;;  %v1365_v22 = vadd.f32 %v1364_v18, %v1363_v14  ;;  %v914_v23 = vadd.f32 %v1347_v30, %v913_v20  ;;  %v1366_v24 = vpop.f32.mrb[22].mxu0  ;;  %v1458_v26 = vpop.f32.mrb[22].mxu1 }
 0x124   : > { %1137 = vst [vmem:[%s1793_s16 + $0x18] sm:$0xff] %v1105_v16  ;;  %v1037_v27 = vmul.f32 %v1778_v52, %v922_v17  ;;  %v925_v28 = vadd.f32 %v1458_v26, %v1356_v48  ;;  %v1367_v29 = vpop.f32.mrb[23].mxu0  ;;  %v916_v32 = vpop.f32.mrb[23].mxu1 }
 0x125   : > { %1135 = vst [vmem:[%s1793_s16 + $0x8] sm:$0xff] %v1103_v21  ;;  %v1035_v33 = vmul.f32 %v1778_v52, %v914_v23  ;;  %v1368_v34 = vadd.f32 %v1367_v29, %v1366_v24  ;;  %v917_v35 = vadd.f32 %v1767_v36, %v916_v32 }
 0x126   : > { %v1076_v38 = vadd.f32 %v1783_v56, %v1037_v27  ;;  %v1038_v30 = vmul.f32 %v1778_v52, %v925_v28 }
 0x127   : > { %v1074_v39 = vadd.f32 %v1783_v56, %v1035_v33  ;;  %v1036_v40 = vmul.f32 %v1778_v52, %v917_v35 }
 0x128   : > { %v1108_v41 = vmax.f32 %v1076_v38, 0.0  ;;  %v1077_v42 = vadd.f32 %v1783_v56, %v1038_v30 }
 0x129   : > { %v1106_v44 = vmax.f32 %v1074_v39, 0.0  ;;  %v1075_v45 = vadd.f32 %v1783_v56, %v1036_v40  ;;  %v1369_v46 = vpop.f32.mrb[24].mxu0  ;;  %v1461_v47 = vpop.f32.mrb[24].mxu1 }
 0x12a   : > { %1140 = vst [vmem:[%s1793_s16 + $0x30] sm:$0xff] %v1108_v41  ;;  %v1109_v36 = vmax.f32 %v1077_v42, 0.0  ;;  %v938_v48 = vadd.f32 %v1461_v47, %v1365_v22  ;;  %v1370_v50 = vpop.f32.mrb[25].mxu0  ;;  %v929_v51 = vpop.f32.mrb[25].mxu1 }
 0x12b   : > { %1138 = vst [vmem:[%s1793_s16 + $0x20] sm:$0xff] %v1106_v44  ;;  %v1107_v53 = vmax.f32 %v1075_v45, 0.0  ;;  %v1371_v54 = vadd.f32 %v1370_v50, %v1369_v46  ;;  %v930_v55 = vadd.f32 %v1359_v57, %v929_v51  ;;  %v1372_v58 = vpop.f32.mrb[26].mxu0  ;;  %v1462_v59 = vpop.f32.mrb[26].mxu1 }
 0x12c   : > { %1141 = vst [vmem:[%s1793_s16 + $0x38] sm:$0xff] %v1109_v36  ;;  %v1041_v60 = vmul.f32 %v1778_v52, %v938_v48  ;;  %v941_v61 = vadd.f32 %v1462_v59, %v1368_v34  ;;  %v1373_v62 = vpop.f32.mrb[27].mxu0  ;;  %v932_v63 = vpop.f32.mrb[27].mxu1 }
 0x12d   : > { %1139 = vst [vmem:[%s1793_s16 + $0x28] sm:$0xff] %v1107_v53  ;;  %v1039_v0 = vmul.f32 %v1778_v52, %v930_v55  ;;  %v1374_v1 = vadd.f32 %v1373_v62, %v1372_v58  ;;  %v933_v3 = vadd.f32 %v1362_v2, %v932_v63 }
 0x12e   : > { %v1080_v4 = vadd.f32 %v1783_v56, %v1041_v60  ;;  %v1042_v5 = vmul.f32 %v1778_v52, %v941_v61 }
 0x12f   : > { %v1078_v57 = vadd.f32 %v1783_v56, %v1039_v0  ;;  %v1040_v6 = vmul.f32 %v1778_v52, %v933_v3 }
 0x130   : > { %v1112_v8 = vmax.f32 %v1080_v4, 0.0  ;;  %v1081_v9 = vadd.f32 %v1783_v56, %v1042_v5 }
 0x131   : > { %v1110_v10 = vmax.f32 %v1078_v57, 0.0  ;;  %v1079_v11 = vadd.f32 %v1783_v56, %v1040_v6  ;;  %v1375_v12 = vpop.f32.mrb[28].mxu0  ;;  %v1465_v14 = vpop.f32.mrb[28].mxu1 }
 0x132   : > { %1144 = vst [vmem:[%s1793_s16 + $0x50] sm:$0xff] %v1112_v8  ;;  %v1113_v2 = vmax.f32 %v1081_v9, 0.0  ;;  %v1376_v15 = vpop.f32.mrb[29].mxu0  ;;  %v945_v16 = vpop.f32.mrb[29].mxu1 }
 0x133   : > { %1142 = vst [vmem:[%s1793_s16 + $0x40] sm:$0xff] %v1110_v10  ;;  %v1111_v17 = vmax.f32 %v1079_v11, 0.0  ;;  %v1377_v18 = vadd.f32 %v1376_v15, %v1375_v12  ;;  %v946_v20 = vadd.f32 %v1371_v54, %v945_v16  ;;  %v1378_v21 = vpop.f32.mrb[30].mxu0  ;;  %v1466_v22 = vpop.f32.mrb[30].mxu1 }
 0x134   : > { %1145 = vst [vmem:[%s1793_s16 + $0x58] sm:$0xff] %v1113_v2  ;;  %v1379_v23 = vpop.f32.mrb[31].mxu0  ;;  %v948_v24 = vpop.f32.mrb[31].mxu1 }
 0x135   : > { %1143 = vst [vmem:[%s1793_s16 + $0x48] sm:$0xff] %v1111_v17  ;;  %v954_v26 = vadd.f32 %v1465_v14, %v1377_v18  ;;  %v1043_v27 = vmul.f32 %v1778_v52, %v946_v20  ;;  %v1380_v28 = vadd.f32 %v1379_v23, %v1378_v21  ;;  %v949_v29 = vadd.f32 %v1374_v1, %v948_v24 }
 0x137   : > { %v1045_v32 = vmul.f32 %v1778_v52, %v954_v26  ;;  %v1082_v33 = vadd.f32 %v1783_v56, %v1043_v27  ;;  %v957_v34 = vadd.f32 %v1466_v22, %v1380_v28  ;;  %v1044_v35 = vmul.f32 %v1778_v52, %v949_v29 }
 0x139   : > { %v1084_v38 = vadd.f32 %v1783_v56, %v1045_v32  ;;  %v1114_v30 = vmax.f32 %v1082_v33, 0.0  ;;  %v1046_v39 = vmul.f32 %v1778_v52, %v957_v34  ;;  %v1083_v40 = vadd.f32 %v1783_v56, %v1044_v35  ;;  %v1381_v41 = vpop.f32.mrb[32].mxu0  ;;  %v1469_v42 = vpop.f32.mrb[32].mxu1 }
 0x13a   : > { %v1382_v44 = vpop.f32.mrb[33].mxu0  ;;  %v961_v45 = vpop.f32.mrb[33].mxu1 }
 0x13b   : > { %v1116_v46 = vmax.f32 %v1084_v38, 0.0  ;;  %1146 = vst [vmem:[%s1793_s16 + $0x60] sm:$0xff] %v1114_v30  ;;  %v1085_v47 = vadd.f32 %v1783_v56, %v1046_v39  ;;  %v1115_v36 = vmax.f32 %v1083_v40, 0.0  ;;  %v1383_v48 = vadd.f32 %v1382_v44, %v1381_v41  ;;  %v1384_v50 = vpop.f32.mrb[34].mxu0  ;;  %v1470_v51 = vpop.f32.mrb[34].mxu1 }
 0x13c   : > { %v1385_v53 = vpop.f32.mrb[35].mxu0  ;;  %v964_v54 = vpop.f32.mrb[35].mxu1 }
 0x13d   : > { %1148 = vst [vmem:[%s1793_s16 + $0x70] sm:$0xff] %v1116_v46  ;;  %v1117_v55 = vmax.f32 %v1085_v47, 0.0  ;;  %1147 = vst [vmem:[%s1793_s16 + $0x68] sm:$0xff] %v1115_v36  ;;  %v962_v58 = vadd.f32 %v1383_v48, %v961_v45  ;;  %v1386_v59 = vadd.f32 %v1385_v53, %v1384_v50 }
 0x13f   : > { %1149 = vst [vmem:[%s1793_s16 + $0x78] sm:$0xff] %v1117_v55  ;;  %v1047_v60 = vmul.f32 %v1778_v52, %v962_v58  ;;  %v965_v61 = vadd.f32 %v1386_v59, %v964_v54 }
 0x141   : > { %v1086_v62 = vadd.f32 %v1783_v56, %v1047_v60  ;;  %v1048_v63 = vmul.f32 %v1778_v52, %v965_v61  ;;  %v1387_v0 = vpop.f32.mrb[36].mxu0  ;;  %v1843_v1 = vpop.f32.mrb[36].mxu1 }
 0x142   : > { %v1388_v3 = vpop.f32.mrb[37].mxu0  ;;  %v977_v4 = vpop.f32.mrb[37].mxu1 }
 0x143   : > { %v1118_v5 = vmax.f32 %v1086_v62, 0.0  ;;  %v1087_v57 = vadd.f32 %v1783_v56, %v1048_v63  ;;  %v1389_v6 = vadd.f32 %v1388_v3, %v1387_v0  ;;  %v1390_v8 = vpop.f32.mrb[38].mxu0  ;;  %v1846_v9 = vpop.f32.mrb[38].mxu1 }
 0x144   : > { %v1391_v10 = vpop.f32.mrb[39].mxu0  ;;  %v980_v11 = vpop.f32.mrb[39].mxu1 }
 0x145   : > { %1150 = vst [vmem:[%s1793_s16 + $0x80] sm:$0xff] %v1118_v5  ;;  %v1119_v12 = vmax.f32 %v1087_v57, 0.0  ;;  %v970_v14 = vadd.f32 %v1469_v42, %v1389_v6  ;;  %v1392_v2 = vadd.f32 %v1391_v10, %v1390_v8 }
 0x147   : > { %1151 = vst [vmem:[%s1793_s16 + $0x88] sm:$0xff] %v1119_v12  ;;  %v1049_v15 = vmul.f32 %v1778_v52, %v970_v14  ;;  %v973_v16 = vadd.f32 %v1470_v51, %v1392_v2 }
 0x149   : > { %v1088_v17 = vadd.f32 %v1783_v56, %v1049_v15  ;;  %v1050_v18 = vmul.f32 %v1778_v52, %v973_v16  ;;  %v1393_v20 = vpop.f32.mrb[40].mxu0  ;;  %v1477_v21 = vpop.f32.mrb[40].mxu1 }
 0x14a   : > { %v1002_v22 = vadd.f32 %v1477_v21, %v1761_v19  ;;  %v1394_v23 = vpop.f32.mrb[41].mxu0  ;;  %v993_v24 = vpop.f32.mrb[41].mxu1 }
 0x14b   : > { %v1120_v26 = vmax.f32 %v1088_v17, 0.0  ;;  %v1089_v27 = vadd.f32 %v1783_v56, %v1050_v18  ;;  %v1395_v28 = vadd.f32 %v1394_v23, %v1393_v20  ;;  %v994_v29 = vadd.f32 %v1757_v7, %v993_v24  ;;  %v1396_v32 = vpop.f32.mrb[42].mxu0  ;;  %v1478_v33 = vpop.f32.mrb[42].mxu1 }
 0x14c   : > { %v1057_v34 = vmul.f32 %v1778_v52, %v1002_v22  ;;  %v1005_v35 = vadd.f32 %v1478_v33, %v1763_v25  ;;  %v1397_v38 = vpop.f32.mrb[43].mxu0  ;;  %v996_v30 = vpop.f32.mrb[43].mxu1 }
 0x14d   : > { %1152 = vst [vmem:[%s1793_s16 + $0x90] sm:$0xff] %v1120_v26  ;;  %v1121_v39 = vmax.f32 %v1089_v27, 0.0  ;;  %v978_v19 = vadd.f32 %v1395_v28, %v977_v4  ;;  %v1055_v40 = vmul.f32 %v1778_v52, %v994_v29  ;;  %v1398_v41 = vadd.f32 %v1397_v38, %v1396_v32 }
 0x14e   : > { %v1096_v42 = vadd.f32 %v1783_v56, %v1057_v34  ;;  %v1058_v44 = vmul.f32 %v1778_v52, %v1005_v35  ;;  %v997_v7 = vadd.f32 %v1759_v13, %v996_v30 }
 0x14f   : > { %1153 = vst [vmem:[%s1793_s16 + $0x98] sm:$0xff] %v1121_v39  ;;  %v1051_v45 = vmul.f32 %v1778_v52, %v978_v19  ;;  %v1094_v25 = vadd.f32 %v1783_v56, %v1055_v40  ;;  %v981_v46 = vadd.f32 %v1398_v41, %v980_v11 }
 0x150   : > { %v1128_v47 = vmax.f32 %v1096_v42, 0.0  ;;  %v1097_v36 = vadd.f32 %v1783_v56, %v1058_v44  ;;  %v1056_v48 = vmul.f32 %v1778_v52, %v997_v7 }
 0x151   : > { %v1090_v50 = vadd.f32 %v1783_v56, %v1051_v45  ;;  %v1126_v51 = vmax.f32 %v1094_v25, 0.0  ;;  %v1052_v53 = vmul.f32 %v1778_v52, %v981_v46  ;;  %v1399_v54 = vpop.f32.mrb[44].mxu0  ;;  %v1481_v13 = vpop.f32.mrb[44].mxu1 }
 0x152   : > { %1160 = vst [vmem:[%s1793_s16 + $0xd0] sm:$0xff] %v1128_v47  ;;  %v1129_v55 = vmax.f32 %v1097_v36, 0.0  ;;  %v1095_v58 = vadd.f32 %v1783_v56, %v1056_v48  ;;  %v1018_v59 = vadd.f32 %v1481_v13, %v1771_v43  ;;  %v1400_v60 = vpop.f32.mrb[45].mxu0  ;;  %v1009_v61 = vpop.f32.mrb[45].mxu1 }
 0x153   : > { %v1122_v62 = vmax.f32 %v1090_v50, 0.0  ;;  %1158 = vst [vmem:[%s1793_s16 + $0xc0] sm:$0xff] %v1126_v51  ;;  %v1091_v63 = vadd.f32 %v1783_v56, %v1052_v53  ;;  %v1401_v0 = vadd.f32 %v1400_v60, %v1399_v54  ;;  %v1010_v3 = vadd.f32 %v1765_v31, %v1009_v61  ;;  %v1402_v4 = vpop.f32.mrb[46].mxu0  ;;  %v1482_v5 = vpop.f32.mrb[46].mxu1 }
 0x154   : > { %1161 = vst [vmem:[%s1793_s16 + $0xd8] sm:$0xff] %v1129_v55  ;;  %v1127_v57 = vmax.f32 %v1095_v58, 0.0  ;;  %v1061_v6 = vmul.f32 %v1778_v52, %v1018_v59  ;;  %v1021_v43 = vadd.f32 %v1482_v5, %v1773_v49  ;;  %v1403_v8 = vpop.f32.mrb[47].mxu0  ;;  %v1012_v10 = vpop.f32.mrb[47].mxu1 }
 0x155   : > { %1154 = vst [vmem:[%s1793_s16 + $0xa0] sm:$0xff] %v1122_v62  ;;  %v1123_v11 = vmax.f32 %v1091_v63, 0.0  ;;  %v986_v12 = vadd.f32 %v1843_v1, %v1401_v0  ;;  %v1059_v14 = vmul.f32 %v1778_v52, %v1010_v3  ;;  %v1404_v2 = vadd.f32 %v1403_v8, %v1402_v4 }
 0x156   : > { %1159 = vst [vmem:[%s1793_s16 + $0xc8] sm:$0xff] %v1127_v57  ;;  %v1100_v31 = vadd.f32 %v1783_v56, %v1061_v6  ;;  %v1062_v15 = vmul.f32 %v1778_v52, %v1021_v43  ;;  %v1013_v16 = vadd.f32 %v1769_v37, %v1012_v10 }
 0x157   : > { %1155 = vst [vmem:[%s1793_s16 + $0xa8] sm:$0xff] %v1123_v11  ;;  %v1053_v49 = vmul.f32 %v1778_v52, %v986_v12  ;;  %v1098_v17 = vadd.f32 %v1783_v56, %v1059_v14  ;;  %v989_v1 = vadd.f32 %v1846_v9, %v1404_v2 }
 0x158   : > { %v1132_v18 = vmax.f32 %v1100_v31, 0.0  ;;  %v1101_v20 = vadd.f32 %v1783_v56, %v1062_v15  ;;  %v1060_v21 = vmul.f32 %v1778_v52, %v1013_v16 }
 0x159   : > { %v1092_v22 = vadd.f32 %v1783_v56, %v1053_v49  ;;  %v1130_v23 = vmax.f32 %v1098_v17, 0.0  ;;  %v1054_v37 = vmul.f32 %v1778_v52, %v989_v1 }
 0x15a   : > { %1164 = vst [vmem:[%s1793_s16 + $0xf0] sm:$0xff] %v1132_v18  ;;  %v1133_v24 = vmax.f32 %v1101_v20, 0.0  ;;  %v1099_v26 = vadd.f32 %v1783_v56, %v1060_v21 }
 0x15b   : > { %v1124_v27 = vmax.f32 %v1092_v22, 0.0  ;;  %1162 = vst [vmem:[%s1793_s16 + $0xe0] sm:$0xff] %v1130_v23  ;;  %v1093_v9 = vadd.f32 %v1783_v56, %v1054_v37 }
 0x15c   : > { %1165 = vst [vmem:[%s1793_s16 + $0xf8] sm:$0xff] %v1133_v24  ;;  %v1131_v28 = vmax.f32 %v1099_v26, 0.0 }
 0x15d   : > { %1156 = vst [vmem:[%s1793_s16 + $0xb0] sm:$0xff] %v1124_v27  ;;  %v1125_v29 = vmax.f32 %v1093_v9, 0.0 }
 0x15e   : > { %1163 = vst [vmem:[%s1793_s16 + $0xe8] sm:$0xff] %v1131_v28 }
 0x15f   : > { %1157 = vst [vmem:[%s1793_s16 + $0xb8] sm:$0xff] %v1125_v29 }
 0x160 PF: > { %s14_s15 = sadd.s32 1, %s1596_s15  }
 0x161   : > { %p11_p4 = scmp.ge.s32.totalorder %s14_s15, 4  }
 0x163   :  { %13 = sbr.rel (!%p11_p4) target bundleno = 1 (0x1), region = 66 }

// kernel: my_inception3_forward.25
= control target key start
LH: loop header
LB: loop body
LE: loop exit
PB: predicated region body
PF: predicated region fallthrough
CT: control target
= control target key end

     0   :  { %vm254_vm0 = vcmask 523264   ;;  %s829_s0 = inlined_call_operand.vmem [shape: f32[9,112,64], index: 0, kind: input, shape index: {}]   ;;  %s830_s1 = inlined_call_operand.vmem [shape: f32[112,64], index: 1, kind: output, shape index: {}]  }
   0x1   :  { %v8_v0 = vld [vmem:[%s829_s0] sm:$0xff]  ;;  %v273_v1 = vld [vmem:[%s829_s0 + $0x70] sm:$0xff]  ;;  %v9_v6 = vld [vmem:[%s829_s0 + $0x8] sm:$0xff] }
   0x2   :  { %v287_v2 = vld [vmem:[%s829_s0 + $0xe0] sm:$0xff]  ;;  %v37_v3 = vmax.f32 %v8_v0, %v273_v1  ;;  %v301_v4 = vld [vmem:[%s829_s0 + $0x150] sm:$0xff]  ;;  %v274_v7 = vld [vmem:[%s829_s0 + $0x78] sm:$0xff] }
   0x3   :  { %v288_v8 = vld [vmem:[%s829_s0 + $0xe8] sm:$0xff]  ;;  %v315_v9 = vld [vmem:[%s829_s0 + $0x1c0] sm:$0xff]  ;;  %v38_v10 = vmax.f32 %v9_v6, %v274_v7  ;;  %v329_v12 = vld [vmem:[%s829_s0 + $0x230] sm:$0xff] }
   0x4   :  { %v66_v5 = vmax.f32 %v37_v3, %v287_v2  ;;  %v302_v13 = vld [vmem:[%s829_s0 + $0x158] sm:$0xff]  ;;  %v10_v15 = vld [vmem:[%s829_s0 + $0x10] sm:$0xff]  ;;  %v275_v16 = vld [vmem:[%s829_s0 + $0x80] sm:$0xff] }
   0x5   :  { %v67_v14 = vmax.f32 %v38_v10, %v288_v8  ;;  %v289_v17 = vld [vmem:[%s829_s0 + $0xf0] sm:$0xff]  ;;  %v316_v19 = vld [vmem:[%s829_s0 + $0x1c8] sm:$0xff]  ;;  %v39_v20 = vmax.f32 %v10_v15, %v275_v16  ;;  %v343_v21 = vld [vmem:[%s829_s0 + $0x2a0] sm:$0xff] }
   0x6   :  { %v95_v11 = vmax.f32 %v66_v5, %v301_v4  ;;  %v330_v23 = vld [vmem:[%s829_s0 + $0x238] sm:$0xff]  ;;  %v303_v24 = vld [vmem:[%s829_s0 + $0x160] sm:$0xff]  ;;  %v276_v28 = vld [vmem:[%s829_s0 + $0x88] sm:$0xff] }
   0x7   :  { %v96_v22 = vmax.f32 %v67_v14, %v302_v13  ;;  %v68_v26 = vmax.f32 %v39_v20, %v289_v17  ;;  %v11_v27 = vld [vmem:[%s829_s0 + $0x18] sm:$0xff]  ;;  %v357_v30 = vld [vmem:[%s829_s0 + $0x310] sm:$0xff]  ;;  %v371_v31 = vld [vmem:[%s829_s0 + $0x380] sm:$0xff] }
   0x8   :  { %v124_v18 = vmax.f32 %v95_v11, %v315_v9  ;;  %v290_v29 = vld [vmem:[%s829_s0 + $0xf8] sm:$0xff]  ;;  %v317_v33 = vld [vmem:[%s829_s0 + $0x1d0] sm:$0xff]  ;;  %v40_v34 = vmax.f32 %v11_v27, %v276_v28  ;;  %v344_v36 = vld [vmem:[%s829_s0 + $0x2a8] sm:$0xff] }
   0x9   :  { %v125_v32 = vmax.f32 %v96_v22, %v316_v19  ;;  %v97_v37 = vmax.f32 %v68_v26, %v303_v24  ;;  %v331_v38 = vld [vmem:[%s829_s0 + $0x240] sm:$0xff]  ;;  %v304_v39 = vld [vmem:[%s829_s0 + $0x168] sm:$0xff]  ;;  %v277_v43 = vld [vmem:[%s829_s0 + $0x90] sm:$0xff] }
   0xa   :  { %v153_v25 = vmax.f32 %v124_v18, %v329_v12  ;;  %v69_v41 = vmax.f32 %v40_v34, %v290_v29  ;;  %v12_v42 = vld [vmem:[%s829_s0 + $0x20] sm:$0xff]  ;;  %v358_v46 = vld [vmem:[%s829_s0 + $0x318] sm:$0xff]  ;;  %v372_v47 = vld [vmem:[%s829_s0 + $0x388] sm:$0xff] }
   0xb   :  { %v154_v40 = vmax.f32 %v125_v32, %v330_v23  ;;  %v291_v44 = vld [vmem:[%s829_s0 + $0x100] sm:$0xff]  ;;  %v126_v48 = vmax.f32 %v97_v37, %v317_v33  ;;  %v318_v49 = vld [vmem:[%s829_s0 + $0x1d8] sm:$0xff]  ;;  %v41_v50 = vmax.f32 %v12_v42, %v277_v43  ;;  %v345_v52 = vld [vmem:[%s829_s0 + $0x2b0] sm:$0xff] }
   0xc   :  { %v182_v35 = vmax.f32 %v153_v25, %v343_v21  ;;  %v98_v53 = vmax.f32 %v69_v41, %v304_v39  ;;  %v332_v54 = vld [vmem:[%s829_s0 + $0x248] sm:$0xff]  ;;  %v305_v55 = vld [vmem:[%s829_s0 + $0x170] sm:$0xff]  ;;  %v278_v60 = vld [vmem:[%s829_s0 + $0x98] sm:$0xff] }
   0xd   :  { %v183_v51 = vmax.f32 %v154_v40, %v344_v36  ;;  %v155_v57 = vmax.f32 %v126_v48, %v331_v38  ;;  %v70_v58 = vmax.f32 %v41_v50, %v291_v44  ;;  %v13_v59 = vld [vmem:[%s829_s0 + $0x28] sm:$0xff]  ;;  %v359_v63 = vld [vmem:[%s829_s0 + $0x320] sm:$0xff]  ;;  %v373_v0 = vld [vmem:[%s829_s0 + $0x390] sm:$0xff] }
   0xe   :  { %v211_v45 = vmax.f32 %v182_v35, %v357_v30  ;;  %v292_v61 = vld [vmem:[%s829_s0 + $0x108] sm:$0xff]  ;;  %v127_v1 = vmax.f32 %v98_v53, %v318_v49  ;;  %v319_v2 = vld [vmem:[%s829_s0 + $0x1e0] sm:$0xff]  ;;  %v42_v3 = vmax.f32 %v13_v59, %v278_v60  ;;  %v346_v5 = vld [vmem:[%s829_s0 + $0x2b8] sm:$0xff] }
   0xf   :  { %v212_v62 = vmax.f32 %v183_v51, %v358_v46  ;;  %v184_v4 = vmax.f32 %v155_v57, %v345_v52  ;;  %v99_v6 = vmax.f32 %v70_v58, %v305_v55  ;;  %v333_v7 = vld [vmem:[%s829_s0 + $0x250] sm:$0xff]  ;;  %v306_v8 = vld [vmem:[%s829_s0 + $0x178] sm:$0xff]  ;;  %v279_v13 = vld [vmem:[%s829_s0 + $0xa0] sm:$0xff] }
  0x10   :  { %v240_v56 = vmax.f32 %v211_v45, %v371_v31  ;;  %v156_v10 = vmax.f32 %v127_v1, %v332_v54  ;;  %v71_v11 = vmax.f32 %v42_v3, %v292_v61  ;;  %v14_v12 = vld [vmem:[%s829_s0 + $0x30] sm:$0xff]  ;;  %v360_v16 = vld [vmem:[%s829_s0 + $0x328] sm:$0xff]  ;;  %v374_v17 = vld [vmem:[%s829_s0 + $0x398] sm:$0xff] }
  0x11   :  { %v241_v9 = vmax.f32 %v212_v62, %v372_v47  ;;  %v293_v14 = vld [vmem:[%s829_s0 + $0x110] sm:$0xff]  ;;  %v213_v15 = vmax.f32 %v184_v4, %v359_v63  ;;  %v128_v18 = vmax.f32 %v99_v6, %v319_v2  ;;  %v320_v19 = vld [vmem:[%s829_s0 + $0x1e8] sm:$0xff]  ;;  %v43_v20 = vmax.f32 %v14_v12, %v279_v13  ;;  %v347_v22 = vld [vmem:[%s829_s0 + $0x2c0] sm:$0xff] }
  0x12   :  { %255 = vst.msk [vmem:[%s830_s1] sm:$0xff] %vm254_vm0, %v240_v56  ;;  %v185_v21 = vmax.f32 %v156_v10, %v346_v5  ;;  %v100_v23 = vmax.f32 %v71_v11, %v306_v8  ;;  %v334_v24 = vld [vmem:[%s829_s0 + $0x258] sm:$0xff]  ;;  %v307_v25 = vld [vmem:[%s829_s0 + $0x180] sm:$0xff]  ;;  %v280_v30 = vld [vmem:[%s829_s0 + $0xa8] sm:$0xff] }
  0x13   :  { %256 = vst.msk [vmem:[%s830_s1 + $0x8] sm:$0xff] %vm254_vm0, %v241_v9  ;;  %v242_v26 = vmax.f32 %v213_v15, %v373_v0  ;;  %v157_v27 = vmax.f32 %v128_v18, %v333_v7  ;;  %v72_v28 = vmax.f32 %v43_v20, %v293_v14  ;;  %v15_v29 = vld [vmem:[%s829_s0 + $0x38] sm:$0xff]  ;;  %v361_v33 = vld [vmem:[%s829_s0 + $0x330] sm:$0xff]  ;;  %v375_v34 = vld [vmem:[%s829_s0 + $0x3a0] sm:$0xff] }
  0x14   :  { %v294_v31 = vld [vmem:[%s829_s0 + $0x118] sm:$0xff]  ;;  %v214_v32 = vmax.f32 %v185_v21, %v360_v16  ;;  %v129_v35 = vmax.f32 %v100_v23, %v320_v19  ;;  %v321_v36 = vld [vmem:[%s829_s0 + $0x1f0] sm:$0xff]  ;;  %v44_v37 = vmax.f32 %v15_v29, %v280_v30  ;;  %v348_v39 = vld [vmem:[%s829_s0 + $0x2c8] sm:$0xff] }
  0x15   :  { %257 = vst.msk [vmem:[%s830_s1 + $0x10] sm:$0xff] %vm254_vm0, %v242_v26  ;;  %v186_v38 = vmax.f32 %v157_v27, %v347_v22  ;;  %v101_v40 = vmax.f32 %v72_v28, %v307_v25  ;;  %v335_v41 = vld [vmem:[%s829_s0 + $0x260] sm:$0xff]  ;;  %v308_v42 = vld [vmem:[%s829_s0 + $0x188] sm:$0xff]  ;;  %v281_v47 = vld [vmem:[%s829_s0 + $0xb0] sm:$0xff] }
  0x16   :  { %v243_v43 = vmax.f32 %v214_v32, %v374_v17  ;;  %v158_v44 = vmax.f32 %v129_v35, %v334_v24  ;;  %v73_v45 = vmax.f32 %v44_v37, %v294_v31  ;;  %v16_v46 = vld [vmem:[%s829_s0 + $0x40] sm:$0xff]  ;;  %v362_v50 = vld [vmem:[%s829_s0 + $0x338] sm:$0xff]  ;;  %v376_v51 = vld [vmem:[%s829_s0 + $0x3a8] sm:$0xff] }
  0x17   :  { %v295_v48 = vld [vmem:[%s829_s0 + $0x120] sm:$0xff]  ;;  %v215_v49 = vmax.f32 %v186_v38, %v361_v33  ;;  %v130_v52 = vmax.f32 %v101_v40, %v321_v36  ;;  %v322_v53 = vld [vmem:[%s829_s0 + $0x1f8] sm:$0xff]  ;;  %v45_v54 = vmax.f32 %v16_v46, %v281_v47  ;;  %v349_v56 = vld [vmem:[%s829_s0 + $0x2d0] sm:$0xff] }
  0x18   :  { %258 = vst.msk [vmem:[%s830_s1 + $0x18] sm:$0xff] %vm254_vm0, %v243_v43  ;;  %v187_v55 = vmax.f32 %v158_v44, %v348_v39  ;;  %v102_v57 = vmax.f32 %v73_v45, %v308_v42  ;;  %v336_v58 = vld [vmem:[%s829_s0 + $0x268] sm:$0xff]  ;;  %v309_v59 = vld [vmem:[%s829_s0 + $0x190] sm:$0xff]  ;;  %v282_v0 = vld [vmem:[%s829_s0 + $0xb8] sm:$0xff] }
  0x19   :  { %v244_v60 = vmax.f32 %v215_v49, %v375_v34  ;;  %v159_v61 = vmax.f32 %v130_v52, %v335_v41  ;;  %v74_v62 = vmax.f32 %v45_v54, %v295_v48  ;;  %v17_v63 = vld [vmem:[%s829_s0 + $0x48] sm:$0xff]  ;;  %v363_v3 = vld [vmem:[%s829_s0 + $0x340] sm:$0xff]  ;;  %v377_v4 = vld [vmem:[%s829_s0 + $0x3b0] sm:$0xff] }
  0x1a   :  { %v296_v1 = vld [vmem:[%s829_s0 + $0x128] sm:$0xff]  ;;  %v216_v2 = vmax.f32 %v187_v55, %v362_v50  ;;  %v131_v5 = vmax.f32 %v102_v57, %v322_v53  ;;  %v323_v6 = vld [vmem:[%s829_s0 + $0x200] sm:$0xff]  ;;  %v46_v7 = vmax.f32 %v17_v63, %v282_v0  ;;  %v350_v9 = vld [vmem:[%s829_s0 + $0x2d8] sm:$0xff] }
  0x1b   :  { %259 = vst.msk [vmem:[%s830_s1 + $0x20] sm:$0xff] %vm254_vm0, %v244_v60  ;;  %v188_v8 = vmax.f32 %v159_v61, %v349_v56  ;;  %v103_v10 = vmax.f32 %v74_v62, %v309_v59  ;;  %v337_v11 = vld [vmem:[%s829_s0 + $0x270] sm:$0xff]  ;;  %v310_v12 = vld [vmem:[%s829_s0 + $0x198] sm:$0xff]  ;;  %v283_v17 = vld [vmem:[%s829_s0 + $0xc0] sm:$0xff] }
  0x1c   :  { %v245_v13 = vmax.f32 %v216_v2, %v376_v51  ;;  %v160_v14 = vmax.f32 %v131_v5, %v336_v58  ;;  %v75_v15 = vmax.f32 %v46_v7, %v296_v1  ;;  %v18_v16 = vld [vmem:[%s829_s0 + $0x50] sm:$0xff]  ;;  %v364_v20 = vld [vmem:[%s829_s0 + $0x348] sm:$0xff]  ;;  %v378_v21 = vld [vmem:[%s829_s0 + $0x3b8] sm:$0xff] }
  0x1d   :  { %v297_v18 = vld [vmem:[%s829_s0 + $0x130] sm:$0xff]  ;;  %v217_v19 = vmax.f32 %v188_v8, %v363_v3  ;;  %v132_v22 = vmax.f32 %v103_v10, %v323_v6  ;;  %v324_v23 = vld [vmem:[%s829_s0 + $0x208] sm:$0xff]  ;;  %v47_v24 = vmax.f32 %v18_v16, %v283_v17  ;;  %v351_v26 = vld [vmem:[%s829_s0 + $0x2e0] sm:$0xff] }
  0x1e   :  { %260 = vst.msk [vmem:[%s830_s1 + $0x28] sm:$0xff] %vm254_vm0, %v245_v13  ;;  %v189_v25 = vmax.f32 %v160_v14, %v350_v9  ;;  %v104_v27 = vmax.f32 %v75_v15, %v310_v12  ;;  %v338_v28 = vld [vmem:[%s829_s0 + $0x278] sm:$0xff]  ;;  %v311_v29 = vld [vmem:[%s829_s0 + $0x1a0] sm:$0xff]  ;;  %v284_v34 = vld [vmem:[%s829_s0 + $0xc8] sm:$0xff] }
  0x1f   :  { %v246_v30 = vmax.f32 %v217_v19, %v377_v4  ;;  %v161_v31 = vmax.f32 %v132_v22, %v337_v11  ;;  %v76_v32 = vmax.f32 %v47_v24, %v297_v18  ;;  %v19_v33 = vld [vmem:[%s829_s0 + $0x58] sm:$0xff]  ;;  %v365_v37 = vld [vmem:[%s829_s0 + $0x350] sm:$0xff]  ;;  %v379_v38 = vld [vmem:[%s829_s0 + $0x3c0] sm:$0xff] }
  0x20   :  { %v298_v35 = vld [vmem:[%s829_s0 + $0x138] sm:$0xff]  ;;  %v218_v36 = vmax.f32 %v189_v25, %v364_v20  ;;  %v133_v39 = vmax.f32 %v104_v27, %v324_v23  ;;  %v325_v40 = vld [vmem:[%s829_s0 + $0x210] sm:$0xff]  ;;  %v48_v41 = vmax.f32 %v19_v33, %v284_v34  ;;  %v352_v43 = vld [vmem:[%s829_s0 + $0x2e8] sm:$0xff] }
  0x21   :  { %261 = vst.msk [vmem:[%s830_s1 + $0x30] sm:$0xff] %vm254_vm0, %v246_v30  ;;  %v190_v42 = vmax.f32 %v161_v31, %v351_v26  ;;  %v105_v44 = vmax.f32 %v76_v32, %v311_v29  ;;  %v339_v45 = vld [vmem:[%s829_s0 + $0x280] sm:$0xff]  ;;  %v312_v46 = vld [vmem:[%s829_s0 + $0x1a8] sm:$0xff]  ;;  %v285_v51 = vld [vmem:[%s829_s0 + $0xd0] sm:$0xff] }
  0x22   :  { %v247_v47 = vmax.f32 %v218_v36, %v378_v21  ;;  %v162_v48 = vmax.f32 %v133_v39, %v338_v28  ;;  %v77_v49 = vmax.f32 %v48_v41, %v298_v35  ;;  %v20_v50 = vld [vmem:[%s829_s0 + $0x60] sm:$0xff]  ;;  %v366_v54 = vld [vmem:[%s829_s0 + $0x358] sm:$0xff]  ;;  %v380_v55 = vld [vmem:[%s829_s0 + $0x3c8] sm:$0xff] }
  0x23   :  { %v299_v52 = vld [vmem:[%s829_s0 + $0x140] sm:$0xff]  ;;  %v219_v53 = vmax.f32 %v190_v42, %v365_v37  ;;  %v134_v56 = vmax.f32 %v105_v44, %v325_v40  ;;  %v326_v57 = vld [vmem:[%s829_s0 + $0x218] sm:$0xff]  ;;  %v49_v58 = vmax.f32 %v20_v50, %v285_v51  ;;  %v353_v60 = vld [vmem:[%s829_s0 + $0x2f0] sm:$0xff] }
  0x24   :  { %262 = vst.msk [vmem:[%s830_s1 + $0x38] sm:$0xff] %vm254_vm0, %v247_v47  ;;  %v191_v59 = vmax.f32 %v162_v48, %v352_v43  ;;  %v106_v61 = vmax.f32 %v77_v49, %v312_v46  ;;  %v340_v62 = vld [vmem:[%s829_s0 + $0x288] sm:$0xff]  ;;  %v313_v63 = vld [vmem:[%s829_s0 + $0x1b0] sm:$0xff]  ;;  %v286_v4 = vld [vmem:[%s829_s0 + $0xd8] sm:$0xff] }
  0x25   :  { %v248_v0 = vmax.f32 %v219_v53, %v379_v38  ;;  %v163_v1 = vmax.f32 %v134_v56, %v339_v45  ;;  %v78_v2 = vmax.f32 %v49_v58, %v299_v52  ;;  %v21_v3 = vld [vmem:[%s829_s0 + $0x68] sm:$0xff]  ;;  %v367_v7 = vld [vmem:[%s829_s0 + $0x360] sm:$0xff]  ;;  %v354_v12 = vld [vmem:[%s829_s0 + $0x2f8] sm:$0xff] }
  0x26   :  { %v300_v5 = vld [vmem:[%s829_s0 + $0x148] sm:$0xff]  ;;  %v220_v6 = vmax.f32 %v191_v59, %v366_v54  ;;  %v135_v8 = vmax.f32 %v106_v61, %v326_v57  ;;  %v327_v9 = vld [vmem:[%s829_s0 + $0x220] sm:$0xff]  ;;  %v50_v10 = vmax.f32 %v21_v3, %v286_v4  ;;  %v314_v14 = vld [vmem:[%s829_s0 + $0x1b8] sm:$0xff] }
  0x27   :  { %263 = vst.msk [vmem:[%s830_s1 + $0x40] sm:$0xff] %vm254_vm0, %v248_v0  ;;  %v192_v11 = vmax.f32 %v163_v1, %v353_v60  ;;  %v107_v13 = vmax.f32 %v78_v2, %v313_v63  ;;  %v381_v16 = vld [vmem:[%s829_s0 + $0x3d0] sm:$0xff]  ;;  %v368_v21 = vld [vmem:[%s829_s0 + $0x368] sm:$0xff]  ;;  %v355_v25 = vld [vmem:[%s829_s0 + $0x300] sm:$0xff] }
  0x28   :  { %v249_v15 = vmax.f32 %v220_v6, %v380_v55  ;;  %v164_v17 = vmax.f32 %v135_v8, %v340_v62  ;;  %v341_v18 = vld [vmem:[%s829_s0 + $0x290] sm:$0xff]  ;;  %v79_v19 = vmax.f32 %v50_v10, %v300_v5  ;;  %v328_v23 = vld [vmem:[%s829_s0 + $0x228] sm:$0xff]  ;;  %v382_v28 = vld [vmem:[%s829_s0 + $0x3d8] sm:$0xff] }
  0x29   :  { %v221_v20 = vmax.f32 %v192_v11, %v367_v7  ;;  %v136_v22 = vmax.f32 %v107_v13, %v327_v9  ;;  %v342_v30 = vld [vmem:[%s829_s0 + $0x298] sm:$0xff]  ;;  %v369_v32 = vld [vmem:[%s829_s0 + $0x370] sm:$0xff]  ;;  %v356_v35 = vld [vmem:[%s829_s0 + $0x308] sm:$0xff] }
  0x2a   :  { %264 = vst.msk [vmem:[%s830_s1 + $0x48] sm:$0xff] %vm254_vm0, %v249_v15  ;;  %v193_v24 = vmax.f32 %v164_v17, %v354_v12  ;;  %v108_v26 = vmax.f32 %v79_v19, %v314_v14  ;;  %v383_v37 = vld [vmem:[%s829_s0 + $0x3e0] sm:$0xff]  ;;  %v370_v40 = vld [vmem:[%s829_s0 + $0x378] sm:$0xff]  ;;  %v384_v43 = vld [vmem:[%s829_s0 + $0x3e8] sm:$0xff] }
  0x2b   :  { %v250_v27 = vmax.f32 %v221_v20, %v381_v16  ;;  %v165_v29 = vmax.f32 %v136_v22, %v341_v18 }
  0x2c   :  { %v222_v31 = vmax.f32 %v193_v24, %v368_v21  ;;  %v137_v33 = vmax.f32 %v108_v26, %v328_v23 }
  0x2d   :  { %265 = vst.msk [vmem:[%s830_s1 + $0x50] sm:$0xff] %vm254_vm0, %v250_v27  ;;  %v194_v34 = vmax.f32 %v165_v29, %v355_v25 }
  0x2e   :  { %v251_v36 = vmax.f32 %v222_v31, %v382_v28  ;;  %v166_v38 = vmax.f32 %v137_v33, %v342_v30 }
  0x2f   :  { %v223_v39 = vmax.f32 %v194_v34, %v369_v32 }
  0x30   :  { %266 = vst.msk [vmem:[%s830_s1 + $0x58] sm:$0xff] %vm254_vm0, %v251_v36  ;;  %v195_v41 = vmax.f32 %v166_v38, %v356_v35 }
  0x31   :  { %v252_v42 = vmax.f32 %v223_v39, %v383_v37 }
  0x32   :  { %v224_v44 = vmax.f32 %v195_v41, %v370_v40 }
  0x33   :  { %267 = vst.msk [vmem:[%s830_s1 + $0x60] sm:$0xff] %vm254_vm0, %v252_v42 }
  0x34   :  { %v253_v45 = vmax.f32 %v224_v44, %v384_v43 }
  0x36   :  { %268 = vst.msk [vmem:[%s830_s1 + $0x68] sm:$0xff] %vm254_vm0, %v253_v45 }

// kernel: my_inception3_forward.26
= control target key start
LH: loop header
LB: loop body
LE: loop exit
PB: predicated region body
PF: predicated region fallthrough
CT: control target
= control target key end

     0   :  { %v372_v0 = vmov 0.0   ;;  %vm373_vm0 = vmmov 0   ;;  %vm99_vm1 = vcmask 523264   ;;  %s526_s1 = inlined_call_operand.vmem [shape: bf16[64,128], index: 1, kind: input, shape index: {}]   ;;  %s527_s0 = inlined_call_operand.vmem [shape: bf16[112,64], index: 0, kind: input, shape index: {}]   ;;  %s528_s2 = inlined_call_operand.vmem [shape: f32[1,128], index: 2, kind: input, shape index: {}]   ;;  %s529_s3 = inlined_call_operand.vmem [shape: f32[1,128], index: 3, kind: input, shape index: {}]   ;;  %s530_s4 = inlined_call_operand.vmem [shape: f32[112,128], index: 4, kind: output, shape index: {}]  }
   0x1   :  { %315 = vmatprep.subr.bf16.mxu0 %v372_v0  ;;  %v361_v1 = vld [vmem:[%s526_s1] sm:$0xff]   ;;  %351 = vmatprep.subr.bf16.mxu1 %v372_v0  ;;  %v362_v2 = vld [vmem:[%s526_s1 + $0x8] sm:$0xff]   ;;  %v363_v3 = vld [vmem:[%s526_s1 + $0x10] sm:$0xff]  }
   0x2   :  { %323 = vmatprep.mubr.msk.bf16.mxu0 %vm373_vm0, %v372_v0  ;;  %339 = vmatprep.mubr.msk.bf16.mxu1 %vm373_vm0, %v372_v0  ;;  %v364_v4 = vld [vmem:[%s526_s1 + $0x18] sm:$0xff]   ;;  %v365_v5 = vld [vmem:[%s527_s0] sm:$0xff]   ;;  %v367_v7 = vld [vmem:[%s527_s0 + $0x8] sm:$0xff]  }
   0x3   :  { %316 = vmatpush3.bf16.msra.mxu0 %v361_v1  ;;  %355 = vmatpush3.bf16.msra.mxu1 %v361_v1  ;;  %v366_v6 = vld [vmem:[%s527_s0 + $0x20] sm:$0xff]   ;;  %v368_v8 = vld [vmem:[%s527_s0 + $0x28] sm:$0xff]   ;;  %v369_v9 = vld [vmem:[%s527_s0 + $0x10] sm:$0xff]  }
   0x4   :  { %317 = vmatprep.subr.bf16.mxu0 %v372_v0  ;;  %352 = vmatprep.subr.bf16.mxu1 %v372_v0  ;;  %v370_v10 = vld [vmem:[%s527_s0 + $0x30] sm:$0xff]   ;;  %v371_v11 = vld [vmem:[%s527_s0 + $0x18] sm:$0xff]   ;;  %v449_v12 = vld [vmem:[%s528_s2] ss:$0 sm:$0xff] }
   0x5   :  { %v454_v14 = vld [vmem:[%s529_s3] ss:$0 sm:$0xff] }
   0x7   :  { %318 = vmatpush3.bf16.msra.mxu0 %v362_v2  ;;  %356 = vmatpush3.bf16.msra.mxu1 %v362_v2 }
   0x8   :  { %319 = vmatprep.subr.bf16.mxu0 %v372_v0  ;;  %353 = vmatprep.subr.bf16.mxu1 %v372_v0 }
   0xb   :  { %320 = vmatpush3.bf16.msra.mxu0 %v363_v3  ;;  %357 = vmatpush3.bf16.msra.mxu1 %v363_v3 }
   0xc   :  { %321 = vmatprep.subr.bf16.mxu0 %v372_v0  ;;  %354 = vmatprep.subr.bf16.mxu1 %v372_v0 }
   0xf   :  { %322 = vmatpush3.bf16.msra.mxu0 %v364_v4  ;;  %358 = vmatpush3.bf16.msra.mxu1 %v364_v4 }
  0x12   :  { %324 = vmatmul.mubr.msk.bf16.vlgmr.msra.gmra.mrb[0].mxu0 %vm99_vm1, %v365_v5  ;;  %340 = vmatmul.mubr.msk.bf16.vlgmr.msra.gmra.mrb[0].mxu1 %vm99_vm1, %v366_v6 }
  0x13   :  { %327 = vmatprep.mubr.msk.bf16.mxu0 %vm373_vm0, %v372_v0  ;;  %343 = vmatprep.mubr.msk.bf16.mxu1 %vm373_vm0, %v372_v0 }
  0x1a   :  { %328 = vmatmul.mubr.msk.bf16.gmra.mrb[4].mxu0 %vm99_vm1, %v367_v7  ;;  %344 = vmatmul.mubr.msk.bf16.gmra.mrb[4].mxu1 %vm99_vm1, %v368_v8 }
  0x1b   :  { %331 = vmatprep.mubr.msk.bf16.mxu0 %vm373_vm0, %v372_v0  ;;  %347 = vmatprep.mubr.msk.bf16.mxu1 %vm373_vm0, %v372_v0 }
  0x22   :  { %332 = vmatmul.mubr.msk.bf16.gmra.mrb[8].mxu0 %vm99_vm1, %v369_v9  ;;  %348 = vmatmul.mubr.msk.bf16.gmra.mrb[8].mxu1 %vm99_vm1, %v370_v10 }
  0x23   :  { %335 = vmatprep.mubr.msk.bf16.mxu0 %vm373_vm0, %v372_v0 }
  0x2a   :  { %336 = vmatmul.mubr.msk.bf16.gmra.mrb[12].mxu0 %vm99_vm1, %v371_v11 }
  0xe5   :  { %v155_v13 = vpop.f32.mrb[0].mxu0  ;;  %v187_v15 = vpop.f32.mrb[0].mxu1 }
  0xe6   :  { %v217_v16 = vmul.f32 %v449_v12, %v155_v13  ;;  %v325_v17 = vpop.f32.mrb[1].mxu0  ;;  %v225_v18 = vmul.f32 %v449_v12, %v187_v15  ;;  %v341_v19 = vpop.f32.mrb[1].mxu1 }
  0xe7   :  { %v158_v20 = vpop.f32.mrb[2].mxu0  ;;  %v190_v21 = vpop.f32.mrb[2].mxu1 }
  0xe8   :  { %v238_v22 = vadd.f32 %v454_v14, %v217_v16  ;;  %v218_v23 = vmul.f32 %v449_v12, %v158_v20  ;;  %v326_v24 = vpop.f32.mrb[3].mxu0  ;;  %v246_v25 = vadd.f32 %v454_v14, %v225_v18  ;;  %v226_v26 = vmul.f32 %v449_v12, %v190_v21  ;;  %v342_v27 = vpop.f32.mrb[3].mxu1 }
  0xea   :  { %v252_v28 = vmax.f32 %v238_v22, 0.0  ;;  %v239_v29 = vadd.f32 %v454_v14, %v218_v23  ;;  %v260_v30 = vmax.f32 %v246_v25, 0.0  ;;  %v247_v31 = vadd.f32 %v454_v14, %v226_v26 }
  0xec   :  { %266 = vst [vmem:[%s530_s4] sm:$0xff] %v252_v28  ;;  %v253_v32 = vmax.f32 %v239_v29, 0.0  ;;  %274 = vst [vmem:[%s530_s4 + $0x40] sm:$0xff] %v260_v30  ;;  %v261_v33 = vmax.f32 %v247_v31, 0.0 }
  0xed   :  { %v163_v34 = vpop.f32.mrb[4].mxu0  ;;  %v195_v35 = vpop.f32.mrb[4].mxu1 }
  0xee   :  { %267 = vst [vmem:[%s530_s4 + $0x8] sm:$0xff] %v253_v32  ;;  %275 = vst [vmem:[%s530_s4 + $0x48] sm:$0xff] %v261_v33  ;;  %v219_v36 = vmul.f32 %v449_v12, %v163_v34  ;;  %v329_v37 = vpop.f32.mrb[5].mxu0  ;;  %v227_v38 = vmul.f32 %v449_v12, %v195_v35  ;;  %v345_v39 = vpop.f32.mrb[5].mxu1 }
  0xef   :  { %v166_v40 = vpop.f32.mrb[6].mxu0  ;;  %v198_v41 = vpop.f32.mrb[6].mxu1 }
  0xf0   :  { %v240_v42 = vadd.f32 %v454_v14, %v219_v36  ;;  %v220_v43 = vmul.f32 %v449_v12, %v166_v40  ;;  %v330_v44 = vpop.f32.mrb[7].mxu0  ;;  %v248_v45 = vadd.f32 %v454_v14, %v227_v38  ;;  %v228_v46 = vmul.f32 %v449_v12, %v198_v41  ;;  %v346_v47 = vpop.f32.mrb[7].mxu1 }
  0xf2   :  { %v254_v48 = vmax.f32 %v240_v42, 0.0  ;;  %v241_v49 = vadd.f32 %v454_v14, %v220_v43  ;;  %v262_v50 = vmax.f32 %v248_v45, 0.0  ;;  %v249_v51 = vadd.f32 %v454_v14, %v228_v46 }
  0xf4   :  { %268 = vst [vmem:[%s530_s4 + $0x10] sm:$0xff] %v254_v48  ;;  %v255_v52 = vmax.f32 %v241_v49, 0.0  ;;  %276 = vst [vmem:[%s530_s4 + $0x50] sm:$0xff] %v262_v50  ;;  %v263_v53 = vmax.f32 %v249_v51, 0.0 }
  0xf5   :  { %v171_v54 = vpop.f32.mrb[8].mxu0  ;;  %v203_v55 = vpop.f32.mrb[8].mxu1 }
  0xf6   :  { %269 = vst [vmem:[%s530_s4 + $0x18] sm:$0xff] %v255_v52  ;;  %277 = vst [vmem:[%s530_s4 + $0x58] sm:$0xff] %v263_v53  ;;  %v221_v56 = vmul.f32 %v449_v12, %v171_v54  ;;  %v333_v57 = vpop.f32.mrb[9].mxu0  ;;  %v229_v58 = vmul.f32 %v449_v12, %v203_v55  ;;  %v349_v59 = vpop.f32.mrb[9].mxu1 }
  0xf7   :  { %v174_v60 = vpop.f32.mrb[10].mxu0  ;;  %v206_v61 = vpop.f32.mrb[10].mxu1 }
  0xf8   :  { %v242_v62 = vadd.f32 %v454_v14, %v221_v56  ;;  %v222_v63 = vmul.f32 %v449_v12, %v174_v60  ;;  %v334_v0 = vpop.f32.mrb[11].mxu0  ;;  %v250_v1 = vadd.f32 %v454_v14, %v229_v58  ;;  %v230_v2 = vmul.f32 %v449_v12, %v206_v61  ;;  %v350_v3 = vpop.f32.mrb[11].mxu1 }
  0xfa   :  { %v256_v4 = vmax.f32 %v242_v62, 0.0  ;;  %v243_v5 = vadd.f32 %v454_v14, %v222_v63  ;;  %v264_v6 = vmax.f32 %v250_v1, 0.0  ;;  %v251_v7 = vadd.f32 %v454_v14, %v230_v2 }
  0xfc   :  { %270 = vst [vmem:[%s530_s4 + $0x20] sm:$0xff] %v256_v4  ;;  %v257_v8 = vmax.f32 %v243_v5, 0.0  ;;  %278 = vst [vmem:[%s530_s4 + $0x60] sm:$0xff] %v264_v6  ;;  %v265_v9 = vmax.f32 %v251_v7, 0.0 }
  0xfd   :  { %v179_v10 = vpop.f32.mrb[12].mxu0 }
  0xfe   :  { %271 = vst [vmem:[%s530_s4 + $0x28] sm:$0xff] %v257_v8  ;;  %279 = vst [vmem:[%s530_s4 + $0x68] sm:$0xff] %v265_v9  ;;  %v223_v11 = vmul.f32 %v449_v12, %v179_v10  ;;  %v337_v13 = vpop.f32.mrb[13].mxu0 }
  0xff   :  { %v182_v15 = vpop.f32.mrb[14].mxu0 }
 0x100   :  { %v244_v16 = vadd.f32 %v454_v14, %v223_v11  ;;  %v224_v17 = vmul.f32 %v449_v12, %v182_v15  ;;  %v338_v18 = vpop.f32.mrb[15].mxu0 }
 0x102   :  { %v258_v19 = vmax.f32 %v244_v16, 0.0  ;;  %v245_v20 = vadd.f32 %v454_v14, %v224_v17 }
 0x104   :  { %272 = vst [vmem:[%s530_s4 + $0x30] sm:$0xff] %v258_v19  ;;  %v259_v21 = vmax.f32 %v245_v20, 0.0 }
 0x106   :  { %273 = vst [vmem:[%s530_s4 + $0x38] sm:$0xff] %v259_v21 }

// kernel: my_inception3_forward.27
= control target key start
LH: loop header
LB: loop body
LE: loop exit
PB: predicated region body
PF: predicated region fallthrough
CT: control target
= control target key end

     0   :  { %vm698_vm0 = vcmask 654336   ;;  %s1858_s1 = inlined_call_operand.vmem [shape: bf16[720,256], index: 1, kind: input, shape index: {}]   ;;  %s1859_s0 = inlined_call_operand.vmem [shape: bf16[64,720], index: 0, kind: input, shape index: {}]   ;;  %s1860_s2 = inlined_call_operand.vmem [shape: f32[1,256], index: 2, kind: input, shape index: {}]   ;;  %s1861_s3 = inlined_call_operand.vmem [shape: f32[1,256], index: 3, kind: input, shape index: {}]   ;;  %s1862_s4 = inlined_call_operand.vmem [shape: f32[64,256], index: 4, kind: output, shape index: {}]  }
   0x1   :  { %v1198_v0 = vld [vmem:[%s1858_s1 + $0x4] ss:$8 sps:$4 sm:$0xff]   ;;  %v1202_v2 = vld [vmem:[%s1858_s1] ss:$8 sps:$4 sm:$0xff]   ;;  %v1204_v4 = vld [vmem:[%s1858_s1 + $0x14] ss:$8 sps:$4 sm:$0xff]  }
   0x2   :  { %v1200_v1 = vld [vmem:[%s1858_s1 + $0x104] ss:$8 sps:$4 sm:$0xff]   ;;  %711 = vmatprep.subr.bf16.mxu1 %v1198_v0  ;;  %v1203_v3 = vld [vmem:[%s1858_s1 + $0x100] ss:$8 sps:$4 sm:$0xff]   ;;  %v1206_v5 = vld [vmem:[%s1858_s1 + $0x114] ss:$8 sps:$4 sm:$0xff]  }
   0x3   :  { %784 = vmatprep.subr.bf16.mxu0 %v1200_v1  ;;  %712 = vmatpush1.bf16.msra.mxu1 %v1202_v2  ;;  %v1208_v6 = vld [vmem:[%s1858_s1 + $0x10] ss:$8 sps:$4 sm:$0xff]   ;;  %v1210_v8 = vld [vmem:[%s1858_s1 + $0x24] ss:$8 sps:$4 sm:$0xff]   ;;  %v1214_v10 = vld [vmem:[%s1858_s1 + $0x20] ss:$8 sps:$4 sm:$0xff]  }
   0x4   :  { %785 = vmatpush1.bf16.msra.mxu0 %v1203_v3  ;;  %713 = vmatprep.subr.bf16.mxu1 %v1204_v4  ;;  %v1209_v7 = vld [vmem:[%s1858_s1 + $0x110] ss:$8 sps:$4 sm:$0xff]   ;;  %v1212_v9 = vld [vmem:[%s1858_s1 + $0x124] ss:$8 sps:$4 sm:$0xff]   ;;  %v1215_v11 = vld [vmem:[%s1858_s1 + $0x120] ss:$8 sps:$4 sm:$0xff]  }
   0x5   :  { %786 = vmatprep.subr.bf16.mxu0 %v1206_v5  ;;  %v1216_v12 = vld [vmem:[%s1858_s1 + $0x34] ss:$8 sps:$4 sm:$0xff]   ;;  %v1220_v14 = vld [vmem:[%s1858_s1 + $0x30] ss:$8 sps:$4 sm:$0xff]   ;;  %v1222_v16 = vld [vmem:[%s1858_s1 + $0x44] ss:$8 sps:$4 sm:$0xff]  }
   0x6   :  { %v1218_v13 = vld [vmem:[%s1858_s1 + $0x134] ss:$8 sps:$4 sm:$0xff]   ;;  %v1221_v15 = vld [vmem:[%s1858_s1 + $0x130] ss:$8 sps:$4 sm:$0xff]   ;;  %v1224_v17 = vld [vmem:[%s1858_s1 + $0x144] ss:$8 sps:$4 sm:$0xff]  }
   0x7   :  { %714 = vmatpush1.bf16.msra.mxu1 %v1208_v6  ;;  %v1226_v18 = vld [vmem:[%s1858_s1 + $0x40] ss:$8 sps:$4 sm:$0xff]   ;;  %v1228_v20 = vld [vmem:[%s1858_s1 + $0x54] ss:$8 sps:$4 sm:$0xff]   ;;  %v1232_v22 = vld [vmem:[%s1858_s1 + $0x50] ss:$8 sps:$4 sm:$0xff]  }
   0x8   :  { %787 = vmatpush1.bf16.msra.mxu0 %v1209_v7  ;;  %715 = vmatprep.subr.bf16.mxu1 %v1210_v8  ;;  %v1227_v19 = vld [vmem:[%s1858_s1 + $0x140] ss:$8 sps:$4 sm:$0xff]   ;;  %v1230_v21 = vld [vmem:[%s1858_s1 + $0x154] ss:$8 sps:$4 sm:$0xff]   ;;  %v1233_v23 = vld [vmem:[%s1858_s1 + $0x150] ss:$8 sps:$4 sm:$0xff]  }
   0x9   :  { %788 = vmatprep.subr.bf16.mxu0 %v1212_v9  ;;  %v1234_v24 = vld [vmem:[%s1858_s1 + $0x64] ss:$8 sps:$4 sm:$0xff]   ;;  %v1238_v26 = vld [vmem:[%s1858_s1 + $0x60] ss:$8 sps:$4 sm:$0xff]   ;;  %v1240_v28 = vld [vmem:[%s1858_s1 + $0x74] ss:$8 sps:$4 sm:$0xff]  }
   0xa   :  { %v1236_v25 = vld [vmem:[%s1858_s1 + $0x164] ss:$8 sps:$4 sm:$0xff]   ;;  %v1239_v27 = vld [vmem:[%s1858_s1 + $0x160] ss:$8 sps:$4 sm:$0xff]   ;;  %v1242_v29 = vld [vmem:[%s1858_s1 + $0x174] ss:$8 sps:$4 sm:$0xff]  }
   0xb   :  { %716 = vmatpush1.bf16.msra.mxu1 %v1214_v10  ;;  %v1244_v30 = vld [vmem:[%s1858_s1 + $0x70] ss:$8 sps:$4 sm:$0xff]   ;;  %v1246_v32 = vld [vmem:[%s1858_s1 + $0x84] ss:$8 sps:$4 sm:$0xff]   ;;  %v1250_v34 = vld [vmem:[%s1858_s1 + $0x80] ss:$8 sps:$4 sm:$0xff]  }
   0xc   :  { %789 = vmatpush1.bf16.msra.mxu0 %v1215_v11  ;;  %717 = vmatprep.subr.bf16.mxu1 %v1216_v12  ;;  %v1245_v31 = vld [vmem:[%s1858_s1 + $0x170] ss:$8 sps:$4 sm:$0xff]   ;;  %v1248_v33 = vld [vmem:[%s1858_s1 + $0x184] ss:$8 sps:$4 sm:$0xff]   ;;  %v1251_v35 = vld [vmem:[%s1858_s1 + $0x180] ss:$8 sps:$4 sm:$0xff]  }
   0xd   :  { %790 = vmatprep.subr.bf16.mxu0 %v1218_v13  ;;  %v1252_v36 = vld [vmem:[%s1858_s1 + $0x94] ss:$8 sps:$4 sm:$0xff]   ;;  %v1256_v38 = vld [vmem:[%s1858_s1 + $0x90] ss:$8 sps:$4 sm:$0xff]   ;;  %v1258_v40 = vld [vmem:[%s1858_s1 + $0xa4] ss:$8 sps:$4 sm:$0xff]  }
   0xe   :  { %v1254_v37 = vld [vmem:[%s1858_s1 + $0x194] ss:$8 sps:$4 sm:$0xff]   ;;  %v1257_v39 = vld [vmem:[%s1858_s1 + $0x190] ss:$8 sps:$4 sm:$0xff]   ;;  %v1260_v41 = vld [vmem:[%s1858_s1 + $0x1a4] ss:$8 sps:$4 sm:$0xff]  }
   0xf   :  { %718 = vmatpush1.bf16.msra.mxu1 %v1220_v14  ;;  %v1262_v42 = vld [vmem:[%s1858_s1 + $0xa0] ss:$8 sps:$4 sm:$0xff]   ;;  %v1264_v44 = vld [vmem:[%s1858_s1 + $0xb4] ss:$8 sps:$4 sm:$0xff]   ;;  %v1268_v46 = vld [vmem:[%s1858_s1 + $0xb0] ss:$8 sps:$4 sm:$0xff]  }
  0x10   :  { %791 = vmatpush1.bf16.msra.mxu0 %v1221_v15  ;;  %719 = vmatprep.subr.bf16.mxu1 %v1222_v16  ;;  %v1263_v43 = vld [vmem:[%s1858_s1 + $0x1a0] ss:$8 sps:$4 sm:$0xff]   ;;  %v1266_v45 = vld [vmem:[%s1858_s1 + $0x1b4] ss:$8 sps:$4 sm:$0xff]   ;;  %v1269_v47 = vld [vmem:[%s1858_s1 + $0x1b0] ss:$8 sps:$4 sm:$0xff]  }
  0x11   :  { %792 = vmatprep.subr.bf16.mxu0 %v1224_v17  ;;  %v1270_v48 = vld [vmem:[%s1858_s1 + $0xc4] ss:$8 sps:$4 sm:$0xff]   ;;  %v1274_v52 = vld [vmem:[%s1858_s1 + $0xc0] ss:$8 sps:$4 sm:$0xff]   ;;  %v1276_v54 = vld [vmem:[%s1858_s1 + $0xd4] ss:$8 sps:$4 sm:$0xff]  }
  0x12   :  { %v1296_v49 = vld [vmem:[%s1859_s0 + $0x4] ss:$24 sps:$4 sm:$0xff]   ;;  %v1275_v53 = vld [vmem:[%s1858_s1 + $0x1c0] ss:$8 sps:$4 sm:$0xff]   ;;  %v1280_v56 = vld [vmem:[%s1858_s1 + $0xd0] ss:$8 sps:$4 sm:$0xff]  }
  0x13   :  { %720 = vmatpush1.bf16.msra.mxu1 %v1226_v18  ;;  %v1272_v50 = vld [vmem:[%s1858_s1 + $0x1c4] ss:$8 sps:$4 sm:$0xff]   ;;  %743 = vmatprep.mubr.bf16.mxu1 %v1296_v49  ;;  %v1278_v55 = vld [vmem:[%s1858_s1 + $0x1d4] ss:$8 sps:$4 sm:$0xff]   ;;  %v1281_v57 = vld [vmem:[%s1858_s1 + $0x1d0] ss:$8 sps:$4 sm:$0xff]  }
  0x14   :  { %793 = vmatpush1.bf16.msra.mxu0 %v1227_v19  ;;  %721 = vmatprep.subr.bf16.mxu1 %v1228_v20  ;;  %v1299_v51 = vld [vmem:[%s1859_s0 + $0xc] ss:$24 sps:$4 sm:$0xff]   ;;  %v1286_v60 = vld [vmem:[%s1858_s1 + $0xe0] ss:$8 sps:$4 sm:$0xff]   ;;  %v1288_v62 = vld [vmem:[%s1858_s1 + $0xf4] ss:$8 sps:$4 sm:$0xff]  }
  0x15   :  { %794 = vmatprep.subr.bf16.mxu0 %v1230_v21  ;;  %816 = vmatprep.mubr.bf16.mxu0 %v1299_v51  ;;  %v1282_v58 = vld [vmem:[%s1858_s1 + $0xe4] ss:$8 sps:$4 sm:$0xff]   ;;  %v1287_v61 = vld [vmem:[%s1858_s1 + $0x1e0] ss:$8 sps:$4 sm:$0xff]   ;;  %v1290_v63 = vld [vmem:[%s1858_s1 + $0x1f4] ss:$8 sps:$4 sm:$0xff]  }
  0x16   :  { %v1284_v59 = vld [vmem:[%s1858_s1 + $0x1e4] ss:$8 sps:$4 sm:$0xff]   ;;  %v1292_v0 = vld [vmem:[%s1858_s1 + $0xf0] ss:$8 sps:$4 sm:$0xff]   ;;  %v1297_v4 = vld [vmem:[%s1859_s0 + $0x8] ss:$24 sps:$4 sm:$0xff]  }
  0x17   :  { %722 = vmatpush1.bf16.msra.mxu1 %v1232_v22  ;;  %v1293_v1 = vld [vmem:[%s1858_s1 + $0x1f0] ss:$8 sps:$4 sm:$0xff]   ;;  %v1302_v2 = vld [vmem:[%s1858_s1 + $0x204] ss:$8 sps:$4 sm:$0xff]   ;;  %v1300_v5 = vld [vmem:[%s1858_s1 + $0x200] ss:$8 sps:$4 sm:$0xff]  }
  0x18   :  { %795 = vmatpush1.bf16.msra.mxu0 %v1233_v23  ;;  %723 = vmatprep.subr.bf16.mxu1 %v1234_v24  ;;  %v1294_v3 = vld [vmem:[%s1859_s0] ss:$24 sps:$4 sm:$0xff]   ;;  %v1305_v6 = vld [vmem:[%s1858_s1 + $0x214] ss:$8 sps:$4 sm:$0xff]   ;;  %v1308_v10 = vld [vmem:[%s1858_s1 + $0x224] ss:$8 sps:$4 sm:$0xff]  }
  0x19   :  { %796 = vmatprep.subr.bf16.mxu0 %v1236_v25  ;;  %v1318_v7 = vld [vmem:[%s1859_s0 + $0x34] ss:$24 sps:$4 sm:$0xff]   ;;  %v1303_v9 = vld [vmem:[%s1858_s1 + $0x210] ss:$8 sps:$4 sm:$0xff]   ;;  %v1306_v11 = vld [vmem:[%s1858_s1 + $0x220] ss:$8 sps:$4 sm:$0xff]  }
  0x1a   :  { %v1320_v8 = vld [vmem:[%s1859_s0 + $0x3c] ss:$24 sps:$4 sm:$0xff]   ;;  %v1325_v12 = vld [vmem:[%s1859_s0 + $0x30] ss:$24 sps:$4 sm:$0xff]   ;;  %v1332_v16 = vld [vmem:[%s1859_s0 + $0x6c] ss:$24 sps:$4 sm:$0xff]  }
  0x1b   :  { %724 = vmatpush1.bf16.msra.mxu1 %v1238_v26  ;;  %v1326_v13 = vld [vmem:[%s1859_s0 + $0x38] ss:$24 sps:$4 sm:$0xff]   ;;  %v1311_v14 = vld [vmem:[%s1858_s1 + $0x234] ss:$8 sps:$4 sm:$0xff]   ;;  %v1314_v18 = vld [vmem:[%s1858_s1 + $0x244] ss:$8 sps:$4 sm:$0xff]  }
  0x1c   :  { %797 = vmatpush1.bf16.msra.mxu0 %v1239_v27  ;;  %725 = vmatprep.subr.bf16.mxu1 %v1240_v28  ;;  %v1330_v15 = vld [vmem:[%s1859_s0 + $0x64] ss:$24 sps:$4 sm:$0xff]   ;;  %v1309_v17 = vld [vmem:[%s1858_s1 + $0x230] ss:$8 sps:$4 sm:$0xff]   ;;  %v1338_v20 = vld [vmem:[%s1859_s0 + $0x68] ss:$24 sps:$4 sm:$0xff]  }
  0x1d   :  { %798 = vmatprep.subr.bf16.mxu0 %v1242_v29  ;;  %v1337_v19 = vld [vmem:[%s1859_s0 + $0x60] ss:$24 sps:$4 sm:$0xff]   ;;  %v1317_v22 = vld [vmem:[%s1858_s1 + $0x254] ss:$8 sps:$4 sm:$0xff]   ;;  %v1324_v26 = vld [vmem:[%s1858_s1 + $0x264] ss:$8 sps:$4 sm:$0xff]  }
  0x1e   :  { %v1312_v21 = vld [vmem:[%s1858_s1 + $0x240] ss:$8 sps:$4 sm:$0xff]   ;;  %v1342_v23 = vld [vmem:[%s1859_s0 + $0x94] ss:$24 sps:$4 sm:$0xff]   ;;  %v1315_v25 = vld [vmem:[%s1858_s1 + $0x250] ss:$8 sps:$4 sm:$0xff]  }
  0x1f   :  { %726 = vmatpush1.bf16.msra.mxu1 %v1244_v30  ;;  %v1344_v24 = vld [vmem:[%s1859_s0 + $0x9c] ss:$24 sps:$4 sm:$0xff]   ;;  %v1349_v27 = vld [vmem:[%s1859_s0 + $0x90] ss:$24 sps:$4 sm:$0xff]   ;;  %v1368_v49 = vld [vmem:[%s1859_s0 + $0xa0] ss:$24 sps:$4 sm:$0xff]  }
  0x20   :  { %799 = vmatpush1.bf16.msra.mxu0 %v1245_v31  ;;  %727 = vmatprep.subr.bf16.mxu1 %v1246_v32  ;;  %v1350_v28 = vld [vmem:[%s1859_s0 + $0x98] ss:$24 sps:$4 sm:$0xff]   ;;  %v1322_v29 = vld [vmem:[%s1858_s1 + $0x260] ss:$8 sps:$4 sm:$0xff]   ;;  %v1329_v30 = vld [vmem:[%s1858_s1 + $0x274] ss:$8 sps:$4 sm:$0xff]  }
  0x21   :  { %800 = vmatprep.subr.bf16.mxu0 %v1248_v33  ;;  %v1359_v31 = vld [vmem:[%s1859_s0 + $0x14] ss:$24 sps:$4 sm:$0xff]   ;;  %v1327_v33 = vld [vmem:[%s1858_s1 + $0x270] ss:$8 sps:$4 sm:$0xff]  }
  0x22   :  { %v1362_v32 = vld [vmem:[%s1859_s0 + $0x74] ss:$24 sps:$4 sm:$0xff]  }
  0x23   :  { %728 = vmatpush1.bf16.msra.mxu1 %v1250_v34  ;;  %v1336_v34 = vld [vmem:[%s1858_s1 + $0x284] ss:$8 sps:$4 sm:$0xff]  }
  0x24   :  { %801 = vmatpush1.bf16.msra.mxu0 %v1251_v35  ;;  %729 = vmatprep.subr.bf16.mxu1 %v1252_v36  ;;  %v1334_v35 = vld [vmem:[%s1858_s1 + $0x280] ss:$8 sps:$4 sm:$0xff]   ;;  %v1341_v36 = vld [vmem:[%s1858_s1 + $0x294] ss:$8 sps:$4 sm:$0xff]  }
  0x25   :  { %802 = vmatprep.subr.bf16.mxu0 %v1254_v37  ;;  %v1339_v37 = vld [vmem:[%s1858_s1 + $0x290] ss:$8 sps:$4 sm:$0xff]  }
  0x27   :  { %730 = vmatpush1.bf16.msra.mxu1 %v1256_v38  ;;  %v1348_v38 = vld [vmem:[%s1858_s1 + $0x2a4] ss:$8 sps:$4 sm:$0xff]  }
  0x28   :  { %803 = vmatpush1.bf16.msra.mxu0 %v1257_v39  ;;  %731 = vmatprep.subr.bf16.mxu1 %v1258_v40  ;;  %v1346_v39 = vld [vmem:[%s1858_s1 + $0x2a0] ss:$8 sps:$4 sm:$0xff]   ;;  %v1353_v40 = vld [vmem:[%s1858_s1 + $0x2b4] ss:$8 sps:$4 sm:$0xff]  }
  0x29   :  { %804 = vmatprep.subr.bf16.mxu0 %v1260_v41  ;;  %v1351_v41 = vld [vmem:[%s1858_s1 + $0x2b0] ss:$8 sps:$4 sm:$0xff]  }
  0x2b   :  { %732 = vmatpush1.bf16.msra.mxu1 %v1262_v42  ;;  %v1356_v42 = vld [vmem:[%s1858_s1 + $0x2c4] ss:$8 sps:$4 sm:$0xff]  }
  0x2c   :  { %805 = vmatpush1.bf16.msra.mxu0 %v1263_v43  ;;  %733 = vmatprep.subr.bf16.mxu1 %v1264_v44  ;;  %v1354_v43 = vld [vmem:[%s1858_s1 + $0x2c0] ss:$8 sps:$4 sm:$0xff]  }
  0x2d   :  { %806 = vmatprep.subr.bf16.mxu0 %v1266_v45  ;;  %v1357_v44 = vld [vmem:[%s1859_s0 + $0x10] ss:$24 sps:$4 sm:$0xff]  }
  0x2e   :  { %v1360_v45 = vld [vmem:[%s1859_s0 + $0x70] ss:$24 sps:$4 sm:$0xff]  }
  0x2f   :  { %734 = vmatpush1.bf16.msra.mxu1 %v1268_v46  ;;  %v1363_v46 = vld [vmem:[%s1859_s0 + $0x44] ss:$24 sps:$4 sm:$0xff]  }
  0x30   :  { %807 = vmatpush1.bf16.msra.mxu0 %v1269_v47  ;;  %735 = vmatprep.subr.bf16.mxu1 %v1270_v48  ;;  %v1365_v47 = vld [vmem:[%s1859_s0 + $0xa4] ss:$24 sps:$4 sm:$0xff]   ;;  %v1367_v48 = vld [vmem:[%s1859_s0 + $0x40] ss:$24 sps:$4 sm:$0xff]  }
  0x31   :  { %808 = vmatprep.subr.bf16.mxu0 %v1272_v50 }
  0x33   :  { %736 = vmatpush1.bf16.msra.mxu1 %v1274_v52 }
  0x34   :  { %809 = vmatpush1.bf16.msra.mxu0 %v1275_v53  ;;  %737 = vmatprep.subr.bf16.mxu1 %v1276_v54 }
  0x35   :  { %810 = vmatprep.subr.bf16.mxu0 %v1278_v55 }
  0x37   :  { %738 = vmatpush1.bf16.msra.mxu1 %v1280_v56 }
  0x38   :  { %811 = vmatpush1.bf16.msra.mxu0 %v1281_v57  ;;  %739 = vmatprep.subr.bf16.mxu1 %v1282_v58 }
  0x39   :  { %812 = vmatprep.subr.bf16.mxu0 %v1284_v59 }
  0x3b   :  { %740 = vmatpush1.bf16.msra.mxu1 %v1286_v60 }
  0x3c   :  { %813 = vmatpush1.bf16.msra.mxu0 %v1287_v61  ;;  %741 = vmatprep.subr.bf16.mxu1 %v1288_v62 }
  0x3d   :  { %814 = vmatprep.subr.bf16.mxu0 %v1290_v63 }
  0x3f   :  { %742 = vmatpush1.bf16.msra.mxu1 %v1292_v0 }
  0x40   :  { %815 = vmatpush1.bf16.msra.mxu0 %v1293_v1  ;;  %1140 = vmatprep.subr.bf16.mxu1 %v1302_v2 }
  0x41   :  { %857 = vmatprep.subr.bf16.mxu0 %v1302_v2 }
  0x42   :  { %744 = vmatmul.mubr.bf16.vlgmr.msra.gmra.mrb[0].mxu1 %v1294_v3 }
  0x43   :  { %817 = vmatmul.mubr.bf16.vlgmr.msra.gmra.mrb[0].mxu0 %v1297_v4  ;;  %1153 = vmatpush1.bf16.msra.mxu1 %v1300_v5 }
  0x44   :  { %858 = vmatpush1.bf16.msra.mxu0 %v1300_v5  ;;  %1141 = vmatprep.subr.bf16.mxu1 %v1305_v6 }
  0x45   :  { %859 = vmatprep.subr.bf16.mxu0 %v1305_v6  ;;  %753 = vmatprep.mubr.bf16.mxu1 %v1318_v7 }
  0x46   :  { %826 = vmatprep.mubr.bf16.mxu0 %v1320_v8 }
  0x47   :  { %1154 = vmatpush1.bf16.msra.mxu1 %v1303_v9 }
  0x48   :  { %860 = vmatpush1.bf16.msra.mxu0 %v1303_v9  ;;  %1142 = vmatprep.subr.bf16.mxu1 %v1308_v10 }
  0x49   :  { %861 = vmatprep.subr.bf16.mxu0 %v1308_v10 }
  0x4a   :  { %754 = vmatmul.mubr.bf16.gmra.mrb[4].mxu1 %v1325_v12 }
  0x4b   :  { %827 = vmatmul.mubr.bf16.gmra.mrb[4].mxu0 %v1326_v13  ;;  %1155 = vmatpush1.bf16.msra.mxu1 %v1306_v11 }
  0x4c   :  { %862 = vmatpush1.bf16.msra.mxu0 %v1306_v11  ;;  %1143 = vmatprep.subr.bf16.mxu1 %v1311_v14 }
  0x4d   :  { %863 = vmatprep.subr.bf16.mxu0 %v1311_v14  ;;  %763 = vmatprep.mubr.bf16.mxu1 %v1330_v15 }
  0x4e   :  { %836 = vmatprep.mubr.bf16.mxu0 %v1332_v16 }
  0x4f   :  { %1156 = vmatpush1.bf16.msra.mxu1 %v1309_v17 }
  0x50   :  { %864 = vmatpush1.bf16.msra.mxu0 %v1309_v17  ;;  %1144 = vmatprep.subr.bf16.mxu1 %v1314_v18 }
  0x51   :  { %865 = vmatprep.subr.bf16.mxu0 %v1314_v18  ;;  %v932_v18 = vlaneseq }
  0x52   :  { %764 = vmatmul.mubr.bf16.gmra.mrb[8].mxu1 %v1337_v19 }
  0x53   :  { %837 = vmatmul.mubr.bf16.gmra.mrb[8].mxu0 %v1338_v20  ;;  %1157 = vmatpush1.bf16.msra.mxu1 %v1312_v21  ;;  %v933_v19 = vshrl.u32 %v932_v18, 7 }
  0x54   :  { %866 = vmatpush1.bf16.msra.mxu0 %v1312_v21  ;;  %1145 = vmatprep.subr.bf16.mxu1 %v1317_v22  ;;  %v930_v21 = vld [vmem:[%s1860_s2] sm:$0x3] }
  0x55   :  { %867 = vmatprep.subr.bf16.mxu0 %v1317_v22  ;;  %773 = vmatprep.mubr.bf16.mxu1 %v1342_v23  ;;  %v934_v20 = vsub.s32 0, %v933_v19  ;;  %v938_v22 = vsub.s32 1, %v933_v19  ;;  %v958_v23 = vld [vmem:[%s1861_s3] sm:$0x3] }
  0x56   :  { %846 = vmatprep.mubr.bf16.mxu0 %v1344_v24 }
  0x57   :  { %1158 = vmatpush1.bf16.msra.mxu1 %v1315_v25  ;;  %v1762_v24 = vrot.slane %v930_v21, %v934_v20 }
  0x58   :  { %868 = vmatpush1.bf16.msra.mxu0 %v1315_v25  ;;  %1146 = vmatprep.subr.bf16.mxu1 %v1324_v26 }
  0x59   :  { %869 = vmatprep.subr.bf16.mxu0 %v1324_v26 }
  0x5a   :  { %774 = vmatmul.mubr.bf16.gmra.mrb[12].mxu1 %v1349_v27  ;;  %v1764_v27 = vrot.slane %v930_v21, %v938_v22 }
  0x5b   :  { %847 = vmatmul.mubr.bf16.gmra.mrb[12].mxu0 %v1350_v28  ;;  %1159 = vmatpush1.bf16.msra.mxu1 %v1322_v29 }
  0x5c   :  { %870 = vmatpush1.bf16.msra.mxu0 %v1322_v29  ;;  %1147 = vmatprep.subr.bf16.mxu1 %v1329_v30  ;;  %v1766_v29 = vrot.slane %v958_v23, %v934_v20 }
  0x5d   :  { %871 = vmatprep.subr.bf16.mxu0 %v1329_v30  ;;  %1136 = vmatprep.mubr.msk.bf16.mxu0 %vm698_vm0, %v1359_v31 }
  0x5e   :  { %1138 = vmatprep.mubr.msk.bf16.mxu1 %vm698_vm0, %v1362_v32 }
  0x5f   :  { %1160 = vmatpush1.bf16.msra.mxu1 %v1327_v33 }
  0x60   :  { %872 = vmatpush1.bf16.msra.mxu0 %v1327_v33  ;;  %1148 = vmatprep.subr.bf16.mxu1 %v1336_v34 }
  0x61   :  { %873 = vmatprep.subr.bf16.mxu0 %v1336_v34  ;;  %v1768_v34 = vrot.slane %v958_v23, %v938_v22 }
  0x63   :  { %1161 = vmatpush1.bf16.msra.mxu1 %v1334_v35 }
  0x64   :  { %874 = vmatpush1.bf16.msra.mxu0 %v1334_v35  ;;  %1149 = vmatprep.subr.bf16.mxu1 %v1341_v36 }
  0x65   :  { %875 = vmatprep.subr.bf16.mxu0 %v1341_v36 }
  0x67   :  { %1162 = vmatpush1.bf16.msra.mxu1 %v1339_v37 }
  0x68   :  { %876 = vmatpush1.bf16.msra.mxu0 %v1339_v37  ;;  %1150 = vmatprep.subr.bf16.mxu1 %v1348_v38 }
  0x69   :  { %877 = vmatprep.subr.bf16.mxu0 %v1348_v38 }
  0x6b   :  { %1163 = vmatpush1.bf16.msra.mxu1 %v1346_v39 }
  0x6c   :  { %878 = vmatpush1.bf16.msra.mxu0 %v1346_v39  ;;  %1151 = vmatprep.subr.bf16.mxu1 %v1353_v40 }
  0x6d   :  { %879 = vmatprep.subr.bf16.mxu0 %v1353_v40 }
  0x6f   :  { %1164 = vmatpush1.bf16.msra.mxu1 %v1351_v41 }
  0x70   :  { %880 = vmatpush1.bf16.msra.mxu0 %v1351_v41  ;;  %1152 = vmatprep.subr.bf16.mxu1 %v1356_v42 }
  0x71   :  { %881 = vmatprep.subr.bf16.mxu0 %v1356_v42 }
  0x73   :  { %1165 = vmatpush1.bf16.msra.mxu1 %v1354_v43 }
  0x74   :  { %882 = vmatpush1.bf16.msra.mxu0 %v1354_v43 }
  0x76   :  { %910 = vmatmul.mubr.bf16.vlgmr.msra.gmra.mrb[16].mxu1 %v1360_v45 }
  0x77   :  { %890 = vmatmul.mubr.bf16.vlgmr.msra.gmra.mrb[0].mxu0 %v1357_v44  ;;  %1139 = vmatprep.mubr.msk.bf16.mxu1 %vm698_vm0, %v1365_v47 }
  0x78   :  { %1137 = vmatprep.mubr.msk.bf16.mxu0 %vm698_vm0, %v1363_v46 }
  0x7e   :  { %920 = vmatmul.mubr.bf16.gmra.mrb[20].mxu1 %v1368_v49 }
  0x7f   :  { %900 = vmatmul.mubr.bf16.gmra.mrb[4].mxu0 %v1367_v48 }
 0x115   :  { %v745_v50 = vpop.f32.mrb[0].mxu1 }
 0x116   :  { %v747_v51 = vpop.f32.mrb[1].mxu1 }
 0x117   :  { %v749_v52 = vpop.f32.mrb[2].mxu1 }
 0x118   :  { %v751_v53 = vpop.f32.mrb[3].mxu1 }
 0x11d   :  { %v1740_v54 = vpop.f32.mrb[4].mxu1 }
 0x11e   :  { %v1742_v55 = vpop.f32.mrb[5].mxu1 }
 0x11f   :  { %v1744_v56 = vpop.f32.mrb[6].mxu1 }
 0x120   :  { %v1746_v57 = vpop.f32.mrb[7].mxu1 }
 0x125   :  { %v765_v58 = vpop.f32.mrb[8].mxu1 }
 0x126   :  { %v838_v59 = vpop.f32.mrb[8].mxu0  ;;  %v767_v61 = vpop.f32.mrb[9].mxu1 }
 0x127   :  { %v839_v60 = vadd.f32 %v838_v59, %v765_v58  ;;  %v840_v62 = vpop.f32.mrb[9].mxu0  ;;  %v769_v0 = vpop.f32.mrb[10].mxu1 }
 0x128   :  { %v841_v63 = vadd.f32 %v840_v62, %v767_v61  ;;  %v842_v1 = vpop.f32.mrb[10].mxu0  ;;  %v771_v3 = vpop.f32.mrb[11].mxu1 }
 0x129   :  { %v843_v2 = vadd.f32 %v842_v1, %v769_v0  ;;  %v844_v4 = vpop.f32.mrb[11].mxu0 }
 0x12a   :  { %v845_v5 = vadd.f32 %v844_v4, %v771_v3 }
 0x12d   :  { %v775_v6 = vpop.f32.mrb[12].mxu1 }
 0x12e   :  { %v848_v7 = vpop.f32.mrb[12].mxu0  ;;  %v777_v9 = vpop.f32.mrb[13].mxu1 }
 0x12f   :  { %v1748_v8 = vadd.f32 %v848_v7, %v775_v6  ;;  %v850_v10 = vpop.f32.mrb[13].mxu0  ;;  %v779_v12 = vpop.f32.mrb[14].mxu1 }
 0x130   :  { %v1750_v11 = vadd.f32 %v850_v10, %v777_v9  ;;  %v852_v13 = vpop.f32.mrb[14].mxu0  ;;  %v781_v15 = vpop.f32.mrb[15].mxu1 }
 0x131   :  { %v1752_v14 = vadd.f32 %v852_v13, %v779_v12  ;;  %v854_v16 = vpop.f32.mrb[15].mxu0 }
 0x132   :  { %v1754_v17 = vadd.f32 %v854_v16, %v781_v15 }
 0x149   :  { %v911_v26 = vpop.f32.mrb[16].mxu1 }
 0x14a   :  { %v891_v25 = vpop.f32.mrb[0].mxu0  ;;  %v912_v30 = vadd.f32 %v911_v26, %v839_v60  ;;  %v913_v32 = vpop.f32.mrb[17].mxu1 }
 0x14b   :  { %v1166_v28 = vadd.f32 %v891_v25, %v745_v50  ;;  %v893_v31 = vpop.f32.mrb[1].mxu0  ;;  %v914_v35 = vadd.f32 %v913_v32, %v841_v63  ;;  %v915_v37 = vpop.f32.mrb[18].mxu1 }
 0x14c   :  { %v1167_v33 = vadd.f32 %v893_v31, %v747_v51  ;;  %v895_v36 = vpop.f32.mrb[2].mxu0  ;;  %v950_v39 = vmul.f32 %v1762_v24, %v912_v30  ;;  %v916_v41 = vadd.f32 %v915_v37, %v843_v2  ;;  %v917_v43 = vpop.f32.mrb[19].mxu1 }
 0x14d   :  { %v942_v38 = vmul.f32 %v1166_v28, %v1762_v24  ;;  %v1168_v40 = vadd.f32 %v895_v36, %v749_v52  ;;  %v897_v42 = vpop.f32.mrb[3].mxu0  ;;  %v951_v45 = vmul.f32 %v1764_v27, %v914_v35  ;;  %v918_v47 = vadd.f32 %v917_v43, %v845_v5 }
 0x14e   :  { %v943_v44 = vmul.f32 %v1167_v33, %v1764_v27  ;;  %v1169_v46 = vadd.f32 %v897_v42, %v751_v53  ;;  %v978_v49 = vadd.f32 %v1766_v29, %v950_v39  ;;  %v952_v51 = vmul.f32 %v1762_v24, %v916_v41 }
 0x14f   :  { %v970_v48 = vadd.f32 %v1766_v29, %v942_v38  ;;  %v944_v50 = vmul.f32 %v1168_v40, %v1762_v24  ;;  %v979_v52 = vadd.f32 %v1768_v34, %v951_v45  ;;  %v953_v60 = vmul.f32 %v1764_v27, %v918_v47 }
 0x150   :  { %v971_v58 = vadd.f32 %v1768_v34, %v943_v44  ;;  %v945_v59 = vmul.f32 %v1169_v46, %v1764_v27  ;;  %v994_v62 = vmax.f32 %v978_v49, 0.0  ;;  %v980_v63 = vadd.f32 %v1766_v29, %v952_v51 }
 0x151   :  { %v986_v61 = vmax.f32 %v970_v48, 0.0  ;;  %v972_v53 = vadd.f32 %v1766_v29, %v944_v50  ;;  %v995_v1 = vmax.f32 %v979_v52, 0.0  ;;  %v981_v3 = vadd.f32 %v1768_v34, %v953_v60  ;;  %v921_v5 = vpop.f32.mrb[20].mxu1 }
 0x152   :  { %v987_v0 = vmax.f32 %v971_v58, 0.0  ;;  %v973_v2 = vadd.f32 %v1768_v34, %v945_v59  ;;  %v901_v4 = vpop.f32.mrb[4].mxu0  ;;  %1010 = vst [vmem:[%s1862_s4 + $0x40] sm:$0xff] %v994_v62  ;;  %v996_v7 = vmax.f32 %v980_v63, 0.0  ;;  %v922_v10 = vadd.f32 %v921_v5, %v1748_v8  ;;  %v923_v13 = vpop.f32.mrb[21].mxu1 }
 0x153   :  { %1002 = vst [vmem:[%s1862_s4] sm:$0xff] %v986_v61  ;;  %v988_v6 = vmax.f32 %v972_v53, 0.0  ;;  %v1170_v9 = vadd.f32 %v901_v4, %v1740_v54  ;;  %v903_v12 = vpop.f32.mrb[5].mxu0  ;;  %1011 = vst [vmem:[%s1862_s4 + $0x48] sm:$0xff] %v995_v1  ;;  %v997_v16 = vmax.f32 %v981_v3, 0.0  ;;  %v924_v19 = vadd.f32 %v923_v13, %v1750_v11  ;;  %v925_v54 = vpop.f32.mrb[22].mxu1 }
 0x154   :  { %1003 = vst [vmem:[%s1862_s4 + $0x8] sm:$0xff] %v987_v0  ;;  %v989_v15 = vmax.f32 %v973_v2, 0.0  ;;  %v1171_v18 = vadd.f32 %v903_v12, %v1742_v55  ;;  %v905_v20 = vpop.f32.mrb[6].mxu0  ;;  %1012 = vst [vmem:[%s1862_s4 + $0x50] sm:$0xff] %v996_v7  ;;  %v954_v21 = vmul.f32 %v1762_v24, %v922_v10  ;;  %v926_v55 = vadd.f32 %v925_v54, %v1752_v14  ;;  %v927_v11 = vpop.f32.mrb[23].mxu1 }
 0x155   :  { %1004 = vst [vmem:[%s1862_s4 + $0x10] sm:$0xff] %v988_v6  ;;  %v946_v8 = vmul.f32 %v1170_v9, %v1762_v24  ;;  %v1172_v22 = vadd.f32 %v905_v20, %v1744_v56  ;;  %v907_v23 = vpop.f32.mrb[7].mxu0  ;;  %1013 = vst [vmem:[%s1862_s4 + $0x58] sm:$0xff] %v997_v16  ;;  %v955_v26 = vmul.f32 %v1764_v27, %v924_v19 }
 0x156   :  { %1005 = vst [vmem:[%s1862_s4 + $0x18] sm:$0xff] %v989_v15  ;;  %v947_v25 = vmul.f32 %v1171_v18, %v1764_v27  ;;  %v1173_v28 = vadd.f32 %v907_v23, %v1746_v57  ;;  %v928_v56 = vadd.f32 %v927_v11, %v1754_v17  ;;  %v982_v30 = vadd.f32 %v1766_v29, %v954_v21 }
 0x157   :  { %v974_v14 = vadd.f32 %v1766_v29, %v946_v8  ;;  %v948_v31 = vmul.f32 %v1172_v22, %v1762_v24  ;;  %v956_v32 = vmul.f32 %v1762_v24, %v926_v55  ;;  %v983_v35 = vadd.f32 %v1768_v34, %v955_v26 }
 0x158   :  { %v975_v33 = vadd.f32 %v1768_v34, %v947_v25  ;;  %v949_v36 = vmul.f32 %v1173_v28, %v1764_v27  ;;  %v957_v37 = vmul.f32 %v1764_v27, %v928_v56  ;;  %v998_v57 = vmax.f32 %v982_v30, 0.0 }
 0x159   :  { %v990_v38 = vmax.f32 %v974_v14, 0.0  ;;  %v976_v17 = vadd.f32 %v1766_v29, %v948_v31  ;;  %v984_v39 = vadd.f32 %v1766_v29, %v956_v32  ;;  %v999_v41 = vmax.f32 %v983_v35, 0.0 }
 0x15a   :  { %v991_v40 = vmax.f32 %v975_v33, 0.0  ;;  %v977_v42 = vadd.f32 %v1768_v34, %v949_v36  ;;  %v985_v24 = vadd.f32 %v1768_v34, %v957_v37  ;;  %1014 = vst [vmem:[%s1862_s4 + $0x60] sm:$0xff] %v998_v57 }
 0x15b   :  { %1006 = vst [vmem:[%s1862_s4 + $0x20] sm:$0xff] %v990_v38  ;;  %v992_v27 = vmax.f32 %v976_v17, 0.0  ;;  %v1000_v43 = vmax.f32 %v984_v39, 0.0  ;;  %1015 = vst [vmem:[%s1862_s4 + $0x68] sm:$0xff] %v999_v41 }
 0x15c   :  { %1007 = vst [vmem:[%s1862_s4 + $0x28] sm:$0xff] %v991_v40  ;;  %v993_v29 = vmax.f32 %v977_v42, 0.0  ;;  %v1001_v34 = vmax.f32 %v985_v24, 0.0 }
 0x15d   :  { %1008 = vst [vmem:[%s1862_s4 + $0x30] sm:$0xff] %v992_v27  ;;  %1016 = vst [vmem:[%s1862_s4 + $0x70] sm:$0xff] %v1000_v43 }
 0x15e   :  { %1009 = vst [vmem:[%s1862_s4 + $0x38] sm:$0xff] %v993_v29  ;;  %1017 = vst [vmem:[%s1862_s4 + $0x78] sm:$0xff] %v1001_v34 }

// kernel: my_inception3_forward.28
= control target key start
LH: loop header
LB: loop body
LE: loop exit
PB: predicated region body
PF: predicated region fallthrough
CT: control target
= control target key end

     0   :  { %vm85_vm0 = vcmask 523264   ;;  %s255_s0 = inlined_call_operand.vmem [shape: f32[9,16,192], index: 0, kind: input, shape index: {}]   ;;  %s256_s1 = inlined_call_operand.vmem [shape: f32[16,192], index: 1, kind: output, shape index: {}]  }
   0x1   :  { %v8_v0 = vld [vmem:[%s255_s0] sm:$0xff]  ;;  %v9_v6 = vld [vmem:[%s255_s0 + $0x8] sm:$0xff]  ;;  %v10_v15 = vld [vmem:[%s255_s0 + $0x10] sm:$0xff] }
   0x2   :  { %v93_v1 = vld [vmem:[%s255_s0 + $0x20] sm:$0xff]  ;;  %v94_v7 = vld [vmem:[%s255_s0 + $0x28] sm:$0xff]  ;;  %v95_v16 = vld [vmem:[%s255_s0 + $0x30] sm:$0xff] }
   0x3   :  { %v97_v2 = vld [vmem:[%s255_s0 + $0x40] sm:$0xff]  ;;  %v17_v3 = vmax.f32 %v8_v0, %v93_v1  ;;  %v98_v8 = vld [vmem:[%s255_s0 + $0x48] sm:$0xff]  ;;  %v18_v10 = vmax.f32 %v9_v6, %v94_v7  ;;  %v99_v17 = vld [vmem:[%s255_s0 + $0x50] sm:$0xff]  ;;  %v19_v20 = vmax.f32 %v10_v15, %v95_v16 }
   0x4   :  { %v101_v4 = vld [vmem:[%s255_s0 + $0x60] sm:$0xff]  ;;  %v102_v13 = vld [vmem:[%s255_s0 + $0x68] sm:$0xff]  ;;  %v103_v24 = vld [vmem:[%s255_s0 + $0x70] sm:$0xff] }
   0x5   :  { %v26_v5 = vmax.f32 %v17_v3, %v97_v2  ;;  %v105_v9 = vld [vmem:[%s255_s0 + $0x80] sm:$0xff]  ;;  %v27_v14 = vmax.f32 %v18_v10, %v98_v8  ;;  %v106_v19 = vld [vmem:[%s255_s0 + $0x88] sm:$0xff]  ;;  %v28_v26 = vmax.f32 %v19_v20, %v99_v17  ;;  %v11_v27 = vld [vmem:[%s255_s0 + $0x18] sm:$0xff] }
   0x6   :  { %v109_v12 = vld [vmem:[%s255_s0 + $0xa0] sm:$0xff]  ;;  %v110_v23 = vld [vmem:[%s255_s0 + $0xa8] sm:$0xff]  ;;  %v96_v28 = vld [vmem:[%s255_s0 + $0x38] sm:$0xff] }
   0x7   :  { %v35_v11 = vmax.f32 %v26_v5, %v101_v4  ;;  %v113_v21 = vld [vmem:[%s255_s0 + $0xc0] sm:$0xff]  ;;  %v36_v22 = vmax.f32 %v27_v14, %v102_v13  ;;  %v100_v29 = vld [vmem:[%s255_s0 + $0x58] sm:$0xff]  ;;  %v107_v32 = vld [vmem:[%s255_s0 + $0x90] sm:$0xff]  ;;  %v20_v33 = vmax.f32 %v11_v27, %v96_v28  ;;  %v37_v36 = vmax.f32 %v28_v26, %v103_v24 }
   0x8   :  { %v117_v30 = vld [vmem:[%s255_s0 + $0xe0] sm:$0xff]  ;;  %v114_v35 = vld [vmem:[%s255_s0 + $0xc8] sm:$0xff]  ;;  %v104_v37 = vld [vmem:[%s255_s0 + $0x78] sm:$0xff] }
   0x9   :  { %v44_v18 = vmax.f32 %v35_v11, %v105_v9  ;;  %v45_v31 = vmax.f32 %v36_v22, %v106_v19  ;;  %v121_v38 = vld [vmem:[%s255_s0 + $0x100] sm:$0xff]  ;;  %v111_v40 = vld [vmem:[%s255_s0 + $0xb0] sm:$0xff]  ;;  %v29_v41 = vmax.f32 %v20_v33, %v100_v29  ;;  %v118_v43 = vld [vmem:[%s255_s0 + $0xe8] sm:$0xff]  ;;  %v46_v44 = vmax.f32 %v37_v36, %v107_v32 }
   0xa   :  { %v108_v45 = vld [vmem:[%s255_s0 + $0x98] sm:$0xff]  ;;  %v115_v47 = vld [vmem:[%s255_s0 + $0xd0] sm:$0xff]  ;;  %v122_v50 = vld [vmem:[%s255_s0 + $0x108] sm:$0xff] }
   0xb   :  { %v53_v25 = vmax.f32 %v44_v18, %v109_v12  ;;  %v54_v39 = vmax.f32 %v45_v31, %v110_v23  ;;  %v38_v48 = vmax.f32 %v29_v41, %v104_v37  ;;  %v55_v51 = vmax.f32 %v46_v44, %v111_v40  ;;  %v112_v52 = vld [vmem:[%s255_s0 + $0xb8] sm:$0xff]  ;;  %v119_v54 = vld [vmem:[%s255_s0 + $0xf0] sm:$0xff] }
   0xc   :  { %v116_v57 = vld [vmem:[%s255_s0 + $0xd8] sm:$0xff]  ;;  %v123_v59 = vld [vmem:[%s255_s0 + $0x110] sm:$0xff] }
   0xd   :  { %v62_v34 = vmax.f32 %v53_v25, %v113_v21  ;;  %v63_v46 = vmax.f32 %v54_v39, %v114_v35  ;;  %v47_v55 = vmax.f32 %v38_v48, %v108_v45  ;;  %v64_v56 = vmax.f32 %v55_v51, %v115_v47  ;;  %v120_v62 = vld [vmem:[%s255_s0 + $0xf8] sm:$0xff] }
   0xe   :  { %v124_v1 = vld [vmem:[%s255_s0 + $0x118] sm:$0xff] }
   0xf   :  { %v71_v42 = vmax.f32 %v62_v34, %v117_v30  ;;  %v72_v53 = vmax.f32 %v63_v46, %v118_v43  ;;  %v56_v60 = vmax.f32 %v47_v55, %v112_v52  ;;  %v73_v61 = vmax.f32 %v64_v56, %v119_v54 }
  0x11   :  { %v80_v49 = vmax.f32 %v71_v42, %v121_v38  ;;  %v81_v58 = vmax.f32 %v72_v53, %v122_v50  ;;  %v65_v63 = vmax.f32 %v56_v60, %v116_v57  ;;  %v82_v0 = vmax.f32 %v73_v61, %v123_v59 }
  0x13   :  { %84 = vst [vmem:[%s256_s1] sm:$0xff] %v80_v49  ;;  %86 = vst.msk [vmem:[%s256_s1 + $0x8] sm:$0xff] %vm85_vm0, %v81_v58  ;;  %v74_v2 = vmax.f32 %v65_v63, %v120_v62 }
  0x14   :  { %87 = vst [vmem:[%s256_s1 + $0x10] sm:$0xff] %v82_v0 }
  0x15   :  { %v83_v3 = vmax.f32 %v74_v2, %v124_v1 }
  0x17   :  { %88 = vst.msk [vmem:[%s256_s1 + $0x18] sm:$0xff] %vm85_vm0, %v83_v3 }

// kernel: my_inception3_forward.29
= control target key start
LH: loop header
LB: loop body
LE: loop exit
PB: predicated region body
PF: predicated region fallthrough
CT: control target
= control target key end

     0   :  { %vm173_vm0 = vcmask 523264   ;;  %v222_v26 = vlaneseq  ;;  %s451_s1 = inlined_call_operand.vmem [shape: bf16[192,256], index: 1, kind: input, shape index: {}]   ;;  %s452_s0 = inlined_call_operand.vmem [shape: bf16[16,192], index: 0, kind: input, shape index: {}]   ;;  %s453_s2 = inlined_call_operand.vmem [shape: f32[1,256], index: 2, kind: input, shape index: {}]   ;;  %s454_s3 = inlined_call_operand.vmem [shape: f32[1,256], index: 3, kind: input, shape index: {}]   ;;  %s455_s4 = inlined_call_operand.vmem [shape: f32[16,256], index: 4, kind: output, shape index: {}]  }
   0x1   :  { %v291_v0 = vld [vmem:[%s451_s1 + $0x4] ss:$8 sps:$4 sm:$0xff]   ;;  %v293_v1 = vld [vmem:[%s451_s1] ss:$8 sps:$4 sm:$0xff]   ;;  %v294_v2 = vld [vmem:[%s451_s1 + $0x14] ss:$8 sps:$4 sm:$0xff]  }
   0x2   :  { %177 = vmatprep.subr.bf16.mxu0 %v291_v0  ;;  %v296_v3 = vld [vmem:[%s451_s1 + $0x10] ss:$8 sps:$4 sm:$0xff]   ;;  %v297_v4 = vld [vmem:[%s451_s1 + $0x24] ss:$8 sps:$4 sm:$0xff]   ;;  %v299_v5 = vld [vmem:[%s451_s1 + $0x20] ss:$8 sps:$4 sm:$0xff]  }
   0x3   :  { %178 = vmatpush1.bf16.msra.mxu0 %v293_v1  ;;  %v300_v6 = vld [vmem:[%s451_s1 + $0x34] ss:$8 sps:$4 sm:$0xff]   ;;  %v302_v7 = vld [vmem:[%s451_s1 + $0x30] ss:$8 sps:$4 sm:$0xff]   ;;  %v303_v8 = vld [vmem:[%s451_s1 + $0x44] ss:$8 sps:$4 sm:$0xff]  }
   0x4   :  { %179 = vmatprep.subr.bf16.mxu0 %v294_v2  ;;  %v305_v9 = vld [vmem:[%s451_s1 + $0x40] ss:$8 sps:$4 sm:$0xff]   ;;  %v306_v10 = vld [vmem:[%s451_s1 + $0x54] ss:$8 sps:$4 sm:$0xff]   ;;  %v329_v11 = vld [vmem:[%s452_s0 + $0x4] ss:$8 sps:$4 sm:$0xff]  }
   0x5   :  { %v308_v12 = vld [vmem:[%s451_s1 + $0x50] ss:$8 sps:$4 sm:$0xff]   ;;  %290 = vmatprep.mubr.msk.bf16.mxu0 %vm173_vm0, %v329_v11  ;;  %v309_v13 = vld [vmem:[%s451_s1 + $0x64] ss:$8 sps:$4 sm:$0xff]   ;;  %v311_v14 = vld [vmem:[%s451_s1 + $0x60] ss:$8 sps:$4 sm:$0xff]  }
   0x6   :  { %v312_v15 = vld [vmem:[%s451_s1 + $0x74] ss:$8 sps:$4 sm:$0xff]   ;;  %v314_v16 = vld [vmem:[%s451_s1 + $0x70] ss:$8 sps:$4 sm:$0xff]   ;;  %v315_v17 = vld [vmem:[%s451_s1 + $0x84] ss:$8 sps:$4 sm:$0xff]  }
   0x7   :  { %180 = vmatpush1.bf16.msra.mxu0 %v296_v3  ;;  %v317_v18 = vld [vmem:[%s451_s1 + $0x80] ss:$8 sps:$4 sm:$0xff]   ;;  %v318_v19 = vld [vmem:[%s451_s1 + $0x94] ss:$8 sps:$4 sm:$0xff]   ;;  %v320_v20 = vld [vmem:[%s451_s1 + $0x90] ss:$8 sps:$4 sm:$0xff]  }
   0x8   :  { %181 = vmatprep.subr.bf16.mxu0 %v297_v4  ;;  %v321_v21 = vld [vmem:[%s451_s1 + $0xa4] ss:$8 sps:$4 sm:$0xff]   ;;  %v323_v22 = vld [vmem:[%s451_s1 + $0xa0] ss:$8 sps:$4 sm:$0xff]   ;;  %v324_v23 = vld [vmem:[%s451_s1 + $0xb4] ss:$8 sps:$4 sm:$0xff]  }
   0x9   :  { %v326_v24 = vld [vmem:[%s451_s1 + $0xb0] ss:$8 sps:$4 sm:$0xff]   ;;  %v327_v25 = vld [vmem:[%s452_s0] ss:$8 sps:$4 sm:$0xff]   ;;  %v223_v27 = vshrl.u32 %v222_v26, 7 }
   0xa   :  { %v220_v29 = vld [vmem:[%s453_s2] sm:$0x3] }
   0xb   :  { %182 = vmatpush1.bf16.msra.mxu0 %v299_v5  ;;  %v224_v28 = vsub.s32 0, %v223_v27  ;;  %v228_v30 = vsub.s32 1, %v223_v27  ;;  %v236_v31 = vld [vmem:[%s454_s3] sm:$0x3] }
   0xc   :  { %183 = vmatprep.subr.bf16.mxu0 %v300_v6 }
   0xd   :  { %v225_v32 = vrot.slane %v220_v29, %v224_v28  ;;  %v229_v33 = vrot.slane %v220_v29, %v228_v30  ;;  %v241_v34 = vrot.slane %v236_v31, %v224_v28  ;;  %v245_v36 = vrot.slane %v236_v31, %v228_v30 }
   0xf   :  { %184 = vmatpush1.bf16.msra.mxu0 %v302_v7 }
  0x10   :  { %185 = vmatprep.subr.bf16.mxu0 %v303_v8 }
  0x13   :  { %186 = vmatpush1.bf16.msra.mxu0 %v305_v9 }
  0x14   :  { %187 = vmatprep.subr.bf16.mxu0 %v306_v10 }
  0x17   :  { %188 = vmatpush1.bf16.msra.mxu0 %v308_v12 }
  0x18   :  { %189 = vmatprep.subr.bf16.mxu0 %v309_v13 }
  0x1b   :  { %190 = vmatpush1.bf16.msra.mxu0 %v311_v14 }
  0x1c   :  { %191 = vmatprep.subr.bf16.mxu0 %v312_v15 }
  0x1f   :  { %192 = vmatpush1.bf16.msra.mxu0 %v314_v16 }
  0x20   :  { %193 = vmatprep.subr.bf16.mxu0 %v315_v17 }
  0x23   :  { %194 = vmatpush1.bf16.msra.mxu0 %v317_v18 }
  0x24   :  { %195 = vmatprep.subr.bf16.mxu0 %v318_v19 }
  0x27   :  { %196 = vmatpush1.bf16.msra.mxu0 %v320_v20 }
  0x28   :  { %197 = vmatprep.subr.bf16.mxu0 %v321_v21 }
  0x2b   :  { %198 = vmatpush1.bf16.msra.mxu0 %v323_v22 }
  0x2c   :  { %199 = vmatprep.subr.bf16.mxu0 %v324_v23 }
  0x2f   :  { %200 = vmatpush1.bf16.msra.mxu0 %v326_v24 }
  0x32   :  { %210 = vmatmul.mubr.bf16.vlgmr.msra.gmra.mrb[0].mxu0 %v327_v25 }
 0x105   :  { %v211_v35 = vpop.f32.mrb[0].mxu0 }
 0x106   :  { %v232_v37 = vmul.f32 %v225_v32, %v211_v35  ;;  %v213_v38 = vpop.f32.mrb[1].mxu0 }
 0x107   :  { %v233_v39 = vmul.f32 %v229_v33, %v213_v38  ;;  %v215_v40 = vpop.f32.mrb[2].mxu0 }
 0x108   :  { %v248_v41 = vadd.f32 %v241_v34, %v232_v37  ;;  %v234_v42 = vmul.f32 %v225_v32, %v215_v40  ;;  %v217_v43 = vpop.f32.mrb[3].mxu0 }
 0x109   :  { %v249_v44 = vadd.f32 %v245_v36, %v233_v39  ;;  %v235_v45 = vmul.f32 %v229_v33, %v217_v43 }
 0x10a   :  { %v252_v46 = vmax.f32 %v248_v41, 0.0  ;;  %v250_v47 = vadd.f32 %v241_v34, %v234_v42 }
 0x10b   :  { %v253_v48 = vmax.f32 %v249_v44, 0.0  ;;  %v251_v49 = vadd.f32 %v245_v36, %v235_v45 }
 0x10c   :  { %256 = vst [vmem:[%s455_s4] sm:$0xff] %v252_v46  ;;  %v254_v50 = vmax.f32 %v250_v47, 0.0 }
 0x10d   :  { %257 = vst [vmem:[%s455_s4 + $0x8] sm:$0xff] %v253_v48  ;;  %v255_v51 = vmax.f32 %v251_v49, 0.0 }
 0x10e   :  { %258 = vst [vmem:[%s455_s4 + $0x10] sm:$0xff] %v254_v50 }
 0x10f   :  { %259 = vst [vmem:[%s455_s4 + $0x18] sm:$0xff] %v255_v51 }

// kernel: my_inception3_forward.30
= control target key start
LH: loop header
LB: loop body
LE: loop exit
PB: predicated region body
PF: predicated region fallthrough
CT: control target
= control target key end

     0   :  { %v1179_v46 = vmov 0   ;;  %vm677_vm0 = vcmask 392192   ;;  %s1483_s1 = inlined_call_operand.vmem [shape: bf16[1200,128], index: 1, kind: input, shape index: {}]   ;;  %s1484_s0 = inlined_call_operand.vmem [shape: bf16[16,1200], index: 0, kind: input, shape index: {}]   ;;  %s1485_s2 = inlined_call_operand.vmem [shape: f32[1,128], index: 2, kind: input, shape index: {}]   ;;  %s1486_s3 = inlined_call_operand.vmem [shape: f32[1,128], index: 3, kind: input, shape index: {}]   ;;  %s1487_s4 = inlined_call_operand.vmem [shape: f32[16,128], index: 4, kind: output, shape index: {}]  }
   0x1   :  { %v1089_v0 = vld [vmem:[%s1483_s1 + $0x40] sm:$0xff]   ;;  %v1091_v2 = vld [vmem:[%s1483_s1 + $0x48] sm:$0xff]   ;;  %v1093_v4 = vld [vmem:[%s1483_s1 + $0x50] sm:$0xff]  }
   0x2   :  { %v1090_v1 = vld [vmem:[%s1483_s1] sm:$0xff]   ;;  %1000 = vmatprep.subr.bf16.mxu1 %v1089_v0  ;;  %v1092_v3 = vld [vmem:[%s1483_s1 + $0x8] sm:$0xff]   ;;  %v1094_v5 = vld [vmem:[%s1483_s1 + $0x10] sm:$0xff]  }
   0x3   :  { %1001 = vmatpush3.bf16.msra.mxu1 %v1090_v1  ;;  %v1095_v6 = vld [vmem:[%s1483_s1 + $0x58] sm:$0xff]   ;;  %v1097_v8 = vld [vmem:[%s1483_s1 + $0x60] sm:$0xff]   ;;  %v1099_v12 = vld [vmem:[%s1483_s1 + $0x68] sm:$0xff]  }
   0x4   :  { %1002 = vmatprep.subr.bf16.mxu1 %v1091_v2  ;;  %v1096_v7 = vld [vmem:[%s1483_s1 + $0x18] sm:$0xff]   ;;  %v1101_v9 = vld [vmem:[%s1483_s1 + $0x140] sm:$0xff]   ;;  %v1105_v13 = vld [vmem:[%s1483_s1 + $0x148] sm:$0xff]  }
   0x5   :  { %v1102_v10 = vld [vmem:[%s1483_s1 + $0x100] sm:$0xff]   ;;  %1044 = vmatprep.subr.bf16.mxu0 %v1101_v9  ;;  %v1106_v14 = vld [vmem:[%s1483_s1 + $0x108] sm:$0xff]   ;;  %v1103_v16 = vld [vmem:[%s1483_s1 + $0x70] sm:$0xff]  }
   0x6   :  { %v1098_v11 = vld [vmem:[%s1483_s1 + $0x20] sm:$0xff]   ;;  %1045 = vmatpush3.bf16.msra.mxu0 %v1102_v10  ;;  %v1100_v15 = vld [vmem:[%s1483_s1 + $0x28] sm:$0xff]   ;;  %v1109_v17 = vld [vmem:[%s1483_s1 + $0x150] sm:$0xff]  }
   0x7   :  { %1003 = vmatpush3.bf16.msra.mxu1 %v1092_v3  ;;  %1046 = vmatprep.subr.bf16.mxu0 %v1105_v13  ;;  %v1104_v18 = vld [vmem:[%s1483_s1 + $0x30] sm:$0xff]   ;;  %v1112_v19 = vld [vmem:[%s1484_s0 + $0x4] ss:$40 sps:$4 sm:$0xff]   ;;  %v1107_v21 = vld [vmem:[%s1483_s1 + $0x78] sm:$0xff]  }
   0x8   :  { %1004 = vmatprep.subr.bf16.mxu1 %v1093_v4  ;;  %v1113_v20 = vld [vmem:[%s1483_s1 + $0x110] sm:$0xff]   ;;  %713 = vmatprep.mubr.bf16.mxu1 %v1112_v19  ;;  %v1108_v22 = vld [vmem:[%s1483_s1 + $0x38] sm:$0xff]   ;;  %v1110_v25 = vld [vmem:[%s1484_s0] ss:$40 sps:$4 sm:$0xff]  }
   0x9   :  { %v1116_v23 = vld [vmem:[%s1483_s1 + $0x158] sm:$0xff]   ;;  %v1114_v26 = vld [vmem:[%s1483_s1 + $0xc0] sm:$0xff]   ;;  %v1118_v30 = vld [vmem:[%s1483_s1 + $0xc8] sm:$0xff]  }
   0xa   :  { %1047 = vmatpush3.bf16.msra.mxu0 %v1106_v14  ;;  %v1117_v24 = vld [vmem:[%s1483_s1 + $0x118] sm:$0xff]   ;;  %v1115_v27 = vld [vmem:[%s1483_s1 + $0x80] sm:$0xff]   ;;  %v1119_v31 = vld [vmem:[%s1483_s1 + $0x88] sm:$0xff]  }
   0xb   :  { %1005 = vmatpush3.bf16.msra.mxu1 %v1094_v5  ;;  %1048 = vmatprep.subr.bf16.mxu0 %v1109_v17  ;;  %v1120_v28 = vld [vmem:[%s1483_s1 + $0x160] sm:$0xff]   ;;  %v1124_v32 = vld [vmem:[%s1483_s1 + $0x168] sm:$0xff]   ;;  %v1122_v34 = vld [vmem:[%s1483_s1 + $0xd0] sm:$0xff]  }
   0xc   :  { %1006 = vmatprep.subr.bf16.mxu1 %v1095_v6  ;;  %v1121_v29 = vld [vmem:[%s1483_s1 + $0x120] sm:$0xff]   ;;  %v1125_v33 = vld [vmem:[%s1483_s1 + $0x128] sm:$0xff]   ;;  %v1123_v35 = vld [vmem:[%s1483_s1 + $0x90] sm:$0xff]  }
   0xd   :  { %v1128_v36 = vld [vmem:[%s1483_s1 + $0x170] sm:$0xff]   ;;  %v1126_v38 = vld [vmem:[%s1483_s1 + $0xd8] sm:$0xff]   ;;  %v1130_v42 = vld [vmem:[%s1483_s1 + $0xe0] sm:$0xff]  }
   0xe   :  { %1049 = vmatpush3.bf16.msra.mxu0 %v1113_v20  ;;  %v1129_v37 = vld [vmem:[%s1483_s1 + $0x130] sm:$0xff]   ;;  %v1127_v39 = vld [vmem:[%s1483_s1 + $0x98] sm:$0xff]   ;;  %v1131_v43 = vld [vmem:[%s1483_s1 + $0xa0] sm:$0xff]  }
   0xf   :  { %1007 = vmatpush3.bf16.msra.mxu1 %v1096_v7  ;;  %1050 = vmatprep.subr.bf16.mxu0 %v1116_v23  ;;  %v1132_v40 = vld [vmem:[%s1483_s1 + $0x178] sm:$0xff]   ;;  %v1139_v47 = vld [vmem:[%s1483_s1 + $0x200] sm:$0xff]   ;;  %v1134_v48 = vld [vmem:[%s1483_s1 + $0xe8] sm:$0xff]  }
  0x10   :  { %1008 = vmatprep.subr.bf16.mxu1 %v1097_v8  ;;  %v1133_v41 = vld [vmem:[%s1483_s1 + $0x138] sm:$0xff]   ;;  %v1142_v49 = vld [vmem:[%s1483_s1 + $0x208] sm:$0xff]   ;;  %v1140_v51 = vld [vmem:[%s1483_s1 + $0xf0] sm:$0xff]  }
  0x11   :  { %v1136_v44 = vld [vmem:[%s1484_s0 + $0x10] ss:$40 sps:$4 sm:$0xff]   ;;  %v1138_v45 = vld [vmem:[%s1484_s0 + $0x14] ss:$40 sps:$4 sm:$0xff]   ;;  %v1135_v50 = vld [vmem:[%s1483_s1 + $0xa8] sm:$0xff]  }
  0x12   :  { %1051 = vmatpush3.bf16.msra.mxu0 %v1117_v24  ;;  %795 = vmatprep.mubr.bf16.mxu0 %v1138_v45  ;;  %v1147_v52 = vld [vmem:[%s1484_s0 + $0xc] ss:$40 sps:$4 sm:$0xff]   ;;  %v1143_v55 = vld [vmem:[%s1483_s1 + $0xf8] sm:$0xff]   ;;  %v1149_v58 = vld [vmem:[%s1483_s1 + $0x1c0] sm:$0xff]  }
  0x13   :  { %1009 = vmatpush3.bf16.msra.mxu1 %v1098_v11  ;;  %1052 = vmatprep.subr.bf16.mxu0 %v1120_v28  ;;  %v1148_v53 = vld [vmem:[%s1483_s1 + $0x210] sm:$0xff]   ;;  %v1151_v56 = vld [vmem:[%s1483_s1 + $0x218] sm:$0xff]   ;;  %v1154_v60 = vld [vmem:[%s1483_s1 + $0x220] sm:$0xff]  }
  0x14   :  { %1010 = vmatprep.subr.bf16.mxu1 %v1099_v12  ;;  %v1141_v54 = vld [vmem:[%s1483_s1 + $0xb0] sm:$0xff]   ;;  %v1144_v57 = vld [vmem:[%s1483_s1 + $0xb8] sm:$0xff]   ;;  %v1150_v61 = vld [vmem:[%s1483_s1 + $0x180] sm:$0xff]  }
  0x15   :  { %v1145_v59 = vld [vmem:[%s1484_s0 + $0x8] ss:$40 sps:$4 sm:$0xff]   ;;  %v1158_v4 = vld [vmem:[%s1483_s1 + $0x1d8] sm:$0xff]   ;;  %v1161_v7 = vld [vmem:[%s1483_s1 + $0x1e0] sm:$0xff]  }
  0x16   :  { %1053 = vmatpush3.bf16.msra.mxu0 %v1121_v29  ;;  %v1152_v62 = vld [vmem:[%s1483_s1 + $0x1c8] sm:$0xff]   ;;  %v1155_v1 = vld [vmem:[%s1483_s1 + $0x1d0] sm:$0xff]   ;;  %v1163_v5 = vld [vmem:[%s1483_s1 + $0x238] sm:$0xff]  }
  0x17   :  { %1011 = vmatpush3.bf16.msra.mxu1 %v1100_v15  ;;  %1054 = vmatprep.subr.bf16.mxu0 %v1124_v32  ;;  %v1157_v63 = vld [vmem:[%s1483_s1 + $0x228] sm:$0xff]   ;;  %v1160_v2 = vld [vmem:[%s1483_s1 + $0x230] sm:$0xff]   ;;  %v1159_v6 = vld [vmem:[%s1483_s1 + $0x198] sm:$0xff]  }
  0x18   :  { %1012 = vmatprep.subr.bf16.mxu1 %v1103_v16  ;;  %v1153_v0 = vld [vmem:[%s1483_s1 + $0x188] sm:$0xff]   ;;  %v1156_v3 = vld [vmem:[%s1483_s1 + $0x190] sm:$0xff]   ;;  %v1162_v8 = vld [vmem:[%s1483_s1 + $0x1a0] sm:$0xff]  }
  0x19   :  { %v1166_v9 = vld [vmem:[%s1483_s1 + $0x240] sm:$0xff]   ;;  %v1164_v11 = vld [vmem:[%s1483_s1 + $0x1e8] sm:$0xff]   ;;  %v1167_v15 = vld [vmem:[%s1483_s1 + $0x1f0] sm:$0xff]  }
  0x1a   :  { %1055 = vmatpush3.bf16.msra.mxu0 %v1125_v33  ;;  %v1174_v10 = vld [vmem:[%s1484_s0 + $0x1c] ss:$40 sps:$4 sm:$0xff]   ;;  %v1169_v13 = vld [vmem:[%s1483_s1 + $0x248] sm:$0xff]   ;;  %v1175_v16 = vld [vmem:[%s1483_s1 + $0x250] sm:$0xff]  }
  0x1b   :  { %1013 = vmatpush3.bf16.msra.mxu1 %v1104_v18  ;;  %1056 = vmatprep.subr.bf16.mxu0 %v1128_v36  ;;  %v1176_v12 = vld [vmem:[%s1484_s0 + $0x24] ss:$40 sps:$4 sm:$0xff]   ;;  %v1168_v17 = vld [vmem:[%s1483_s1 + $0x1b0] sm:$0xff]   ;;  %v1170_v18 = vld [vmem:[%s1483_s1 + $0x1f8] sm:$0xff]  }
  0x1c   :  { %1014 = vmatprep.subr.bf16.mxu1 %v1107_v21  ;;  %v1165_v14 = vld [vmem:[%s1483_s1 + $0x1a8] sm:$0xff]   ;;  %v1171_v20 = vld [vmem:[%s1483_s1 + $0x1b8] sm:$0xff]  }
  0x1d   :  { %v1178_v19 = vld [vmem:[%s1484_s0 + $0x20] ss:$40 sps:$4 sm:$0xff]  }
  0x1e   :  { %1057 = vmatpush3.bf16.msra.mxu0 %v1129_v37  ;;  %v1172_v21 = vld [vmem:[%s1484_s0 + $0x18] ss:$40 sps:$4 sm:$0xff]  }
  0x1f   :  { %1015 = vmatpush3.bf16.msra.mxu1 %v1108_v22  ;;  %1058 = vmatprep.subr.bf16.mxu0 %v1132_v40 }
  0x20   :  { %1022 = vmatprep.subr.bf16.mxu1 %v1114_v26 }
  0x22   :  { %714 = vmatmul.mubr.bf16.vlgmr.msra.gmra.mrb[0].mxu1 %v1110_v25  ;;  %1059 = vmatpush3.bf16.msra.mxu0 %v1133_v41 }
  0x23   :  { %1023 = vmatpush3.bf16.msra.mxu1 %v1115_v27  ;;  %845 = vmatprep.subr.bf16.mxu0 %v1179_v46 }
  0x24   :  { %1024 = vmatprep.subr.bf16.mxu1 %v1118_v30  ;;  %754 = vmatprep.mubr.bf16.mxu1 %v1147_v52 }
  0x25   :  { %796 = vmatmul.mubr.bf16.vlgmr.msra.gmra.mrb[0].mxu0 %v1136_v44 }
  0x26   :  { %846 = vmatpush1.bf16.msra.mxu0 %v1139_v47  ;;  %997 = vmatprep.mubr.msk.bf16.mxu0 %vm677_vm0, %v1176_v12 }
  0x27   :  { %1025 = vmatpush3.bf16.msra.mxu1 %v1119_v31  ;;  %847 = vmatprep.subr.bf16.mxu0 %v1179_v46 }
  0x28   :  { %1026 = vmatprep.subr.bf16.mxu1 %v1122_v34 }
  0x2a   :  { %848 = vmatpush1.bf16.msra.mxu0 %v1142_v49 }
  0x2b   :  { %1027 = vmatpush3.bf16.msra.mxu1 %v1123_v35  ;;  %849 = vmatprep.subr.bf16.mxu0 %v1179_v46 }
  0x2c   :  { %1028 = vmatprep.subr.bf16.mxu1 %v1126_v38 }
  0x2e   :  { %850 = vmatpush1.bf16.msra.mxu0 %v1148_v53 }
  0x2f   :  { %1029 = vmatpush3.bf16.msra.mxu1 %v1127_v39  ;;  %851 = vmatprep.subr.bf16.mxu0 %v1179_v46 }
  0x30   :  { %1030 = vmatprep.subr.bf16.mxu1 %v1130_v42 }
  0x32   :  { %852 = vmatpush1.bf16.msra.mxu0 %v1151_v56 }
  0x33   :  { %1031 = vmatpush3.bf16.msra.mxu1 %v1131_v43  ;;  %853 = vmatprep.subr.bf16.mxu0 %v1179_v46 }
  0x34   :  { %1032 = vmatprep.subr.bf16.mxu1 %v1134_v48 }
  0x36   :  { %854 = vmatpush1.bf16.msra.mxu0 %v1154_v60 }
  0x37   :  { %1033 = vmatpush3.bf16.msra.mxu1 %v1135_v50  ;;  %855 = vmatprep.subr.bf16.mxu0 %v1179_v46 }
  0x38   :  { %1034 = vmatprep.subr.bf16.mxu1 %v1140_v51 }
  0x3a   :  { %856 = vmatpush1.bf16.msra.mxu0 %v1157_v63 }
  0x3b   :  { %1035 = vmatpush3.bf16.msra.mxu1 %v1141_v54  ;;  %857 = vmatprep.subr.bf16.mxu0 %v1179_v46 }
  0x3c   :  { %1036 = vmatprep.subr.bf16.mxu1 %v1143_v55  ;;  %v998_v55 = vld [vmem:[%s1485_s2] ss:$0 sm:$0xff] }
  0x3e   :  { %858 = vmatpush1.bf16.msra.mxu0 %v1160_v2 }
  0x3f   :  { %1037 = vmatpush3.bf16.msra.mxu1 %v1144_v57  ;;  %859 = vmatprep.subr.bf16.mxu0 %v1179_v46 }
  0x40   :  { %1066 = vmatprep.subr.bf16.mxu1 %v1149_v58  ;;  %v999_v58 = vld [vmem:[%s1486_s3] ss:$0 sm:$0xff] }
  0x42   :  { %755 = vmatmul.mubr.bf16.vlgmr.msra.gmra.mrb[4].mxu1 %v1145_v59  ;;  %860 = vmatpush1.bf16.msra.mxu0 %v1163_v5 }
  0x43   :  { %1067 = vmatpush3.bf16.msra.mxu1 %v1150_v61  ;;  %861 = vmatprep.subr.bf16.mxu0 %v1179_v46 }
  0x44   :  { %1068 = vmatprep.subr.bf16.mxu1 %v1152_v62  ;;  %836 = vmatprep.mubr.bf16.mxu1 %v1174_v10 }
  0x46   :  { %862 = vmatpush1.bf16.msra.mxu0 %v1166_v9 }
  0x47   :  { %1069 = vmatpush3.bf16.msra.mxu1 %v1153_v0  ;;  %863 = vmatprep.subr.bf16.mxu0 %v1179_v46 }
  0x48   :  { %1070 = vmatprep.subr.bf16.mxu1 %v1155_v1 }
  0x4a   :  { %864 = vmatpush1.bf16.msra.mxu0 %v1169_v13 }
  0x4b   :  { %1071 = vmatpush3.bf16.msra.mxu1 %v1156_v3  ;;  %865 = vmatprep.subr.bf16.mxu0 %v1179_v46 }
  0x4c   :  { %1072 = vmatprep.subr.bf16.mxu1 %v1158_v4 }
  0x4e   :  { %866 = vmatpush1.bf16.msra.mxu0 %v1175_v16 }
  0x4f   :  { %1073 = vmatpush3.bf16.msra.mxu1 %v1159_v6 }
  0x50   :  { %1074 = vmatprep.subr.bf16.mxu1 %v1161_v7 }
  0x51   :  { %878 = vmatmul.mubr.bf16.vlgmr.msra.gmra.mrb[4].mxu0 %v1178_v19 }
  0x53   :  { %1075 = vmatpush3.bf16.msra.mxu1 %v1162_v8 }
  0x54   :  { %1076 = vmatprep.subr.bf16.mxu1 %v1164_v11 }
  0x57   :  { %1077 = vmatpush3.bf16.msra.mxu1 %v1165_v14 }
  0x58   :  { %1078 = vmatprep.subr.bf16.mxu1 %v1167_v15 }
  0x5b   :  { %1079 = vmatpush3.bf16.msra.mxu1 %v1168_v17 }
  0x5c   :  { %1080 = vmatprep.subr.bf16.mxu1 %v1170_v18 }
  0x5f   :  { %1081 = vmatpush3.bf16.msra.mxu1 %v1171_v20 }
  0x62   :  { %837 = vmatmul.mubr.bf16.vlgmr.msra.gmra.mrb[8].mxu1 %v1172_v21 }
  0xf5   :  { %v1016_v22 = vpop.f32.mrb[0].mxu1 }
  0xf6   :  { %v1017_v23 = vpop.f32.mrb[1].mxu1 }
  0xf7   :  { %v1018_v24 = vadd.f32 %v1017_v23, %v1016_v22  ;;  %v1019_v25 = vpop.f32.mrb[2].mxu1 }
  0xf8   :  { %v1020_v26 = vpop.f32.mrb[3].mxu1  ;;  %v1060_v28 = vpop.f32.mrb[0].mxu0 }
  0xf9   :  { %v1021_v27 = vadd.f32 %v1020_v26, %v1019_v25  ;;  %v1061_v29 = vpop.f32.mrb[1].mxu0 }
  0xfa   :  { %v1062_v30 = vadd.f32 %v1061_v29, %v1060_v28  ;;  %v1063_v31 = vpop.f32.mrb[2].mxu0 }
  0xfb   :  { %v1064_v32 = vpop.f32.mrb[3].mxu0 }
  0xfc   :  { %v1065_v33 = vadd.f32 %v1064_v32, %v1063_v31 }
 0x115   :  { %v1038_v34 = vpop.f32.mrb[4].mxu1 }
 0x116   :  { %v1039_v35 = vpop.f32.mrb[5].mxu1 }
 0x117   :  { %v1040_v36 = vadd.f32 %v1039_v35, %v1038_v34  ;;  %v1041_v37 = vpop.f32.mrb[6].mxu1 }
 0x118   :  { %v1042_v38 = vpop.f32.mrb[7].mxu1 }
 0x119   :  { %v757_v39 = vadd.f32 %v1040_v36, %v1018_v24  ;;  %v1043_v40 = vadd.f32 %v1042_v38, %v1041_v37 }
 0x11b   :  { %v760_v41 = vadd.f32 %v1043_v40, %v1021_v27  ;;  %v798_v42 = vadd.f32 %v1062_v30, %v757_v39 }
 0x11d   :  { %v801_v43 = vadd.f32 %v1065_v33, %v760_v41 }
 0x124   :  { %v879_v44 = vpop.f32.mrb[4].mxu0 }
 0x125   :  { %v881_v45 = vpop.f32.mrb[5].mxu0 }
 0x126   :  { %v882_v46 = vpop.f32.mrb[6].mxu0 }
 0x127   :  { %v884_v47 = vpop.f32.mrb[7].mxu0 }
 0x135   :  { %v1082_v48 = vpop.f32.mrb[8].mxu1 }
 0x136   :  { %v1083_v49 = vpop.f32.mrb[9].mxu1 }
 0x137   :  { %v1084_v50 = vadd.f32 %v1083_v49, %v1082_v48  ;;  %v1085_v51 = vpop.f32.mrb[10].mxu1 }
 0x138   :  { %v1086_v52 = vpop.f32.mrb[11].mxu1 }
 0x139   :  { %v839_v53 = vadd.f32 %v1084_v50, %v798_v42  ;;  %v1087_v54 = vadd.f32 %v1086_v52, %v1085_v51 }
 0x13b   :  { %v880_v56 = vadd.f32 %v879_v44, %v839_v53  ;;  %v842_v57 = vadd.f32 %v1087_v54, %v801_v43 }
 0x13d   :  { %v893_v59 = vmul.f32 %v998_v55, %v880_v56  ;;  %v883_v60 = vadd.f32 %v882_v46, %v842_v57 }
 0x13f   :  { %v902_v61 = vadd.f32 %v999_v58, %v893_v59  ;;  %v894_v62 = vmul.f32 %v998_v55, %v883_v60 }
 0x141   :  { %v904_v63 = vmax.f32 %v902_v61, 0.0  ;;  %v903_v0 = vadd.f32 %v999_v58, %v894_v62 }
 0x143   :  { %906 = vst [vmem:[%s1487_s4] sm:$0xff] %v904_v63  ;;  %v905_v1 = vmax.f32 %v903_v0, 0.0 }
 0x145   :  { %907 = vst [vmem:[%s1487_s4 + $0x8] sm:$0xff] %v905_v1 }

// kernel: my_inception3_forward.31
= control target key start
LH: loop header
LB: loop body
LE: loop exit
PB: predicated region body
PF: predicated region fallthrough
CT: control target
= control target key end

     0   :  { %v640_v34 = vmov 0.0   ;;  %vm641_vm0 = vmmov 0   ;;  %vm337_vm1 = vcmask 523264   ;;  %s802_s1 = inlined_call_operand.vmem [shape: bf16[576,128], index: 1, kind: input, shape index: {}]   ;;  %s803_s0 = inlined_call_operand.vmem [shape: bf16[16,576], index: 0, kind: input, shape index: {}]   ;;  %s804_s2 = inlined_call_operand.vmem [shape: f32[1,128], index: 2, kind: input, shape index: {}]   ;;  %s805_s3 = inlined_call_operand.vmem [shape: f32[1,128], index: 3, kind: input, shape index: {}]   ;;  %s806_s4 = inlined_call_operand.vmem [shape: f32[16,128], index: 4, kind: output, shape index: {}]  }
   0x1   :  { %v597_v0 = vld [vmem:[%s802_s1 + $0x40] sm:$0xff]   ;;  %v601_v4 = vld [vmem:[%s802_s1 + $0x48] sm:$0xff]   ;;  %v605_v8 = vld [vmem:[%s802_s1 + $0x50] sm:$0xff]  }
   0x2   :  { %v598_v1 = vld [vmem:[%s802_s1 + $0xc0] sm:$0xff]   ;;  %534 = vmatprep.subr.bf16.mxu0 %v597_v0  ;;  %v602_v5 = vld [vmem:[%s802_s1 + $0xc8] sm:$0xff]   ;;  %v606_v9 = vld [vmem:[%s802_s1 + $0xd0] sm:$0xff]  }
   0x3   :  { %v599_v2 = vld [vmem:[%s802_s1] sm:$0xff]   ;;  %556 = vmatprep.subr.bf16.mxu1 %v598_v1  ;;  %v603_v6 = vld [vmem:[%s802_s1 + $0x8] sm:$0xff]   ;;  %v607_v10 = vld [vmem:[%s802_s1 + $0x10] sm:$0xff]  }
   0x4   :  { %v600_v3 = vld [vmem:[%s802_s1 + $0x80] sm:$0xff]   ;;  %535 = vmatpush3.bf16.msra.mxu0 %v599_v2  ;;  %v604_v7 = vld [vmem:[%s802_s1 + $0x88] sm:$0xff]   ;;  %v608_v11 = vld [vmem:[%s802_s1 + $0x90] sm:$0xff]  }
   0x5   :  { %557 = vmatpush3.bf16.msra.mxu1 %v600_v3  ;;  %536 = vmatprep.subr.bf16.mxu0 %v601_v4  ;;  %v609_v12 = vld [vmem:[%s802_s1 + $0x58] sm:$0xff]   ;;  %v613_v16 = vld [vmem:[%s802_s1 + $0x60] sm:$0xff]   ;;  %v617_v20 = vld [vmem:[%s802_s1 + $0x68] sm:$0xff]  }
   0x6   :  { %558 = vmatprep.subr.bf16.mxu1 %v602_v5  ;;  %v610_v13 = vld [vmem:[%s802_s1 + $0xd8] sm:$0xff]   ;;  %v614_v17 = vld [vmem:[%s802_s1 + $0xe0] sm:$0xff]   ;;  %v618_v21 = vld [vmem:[%s802_s1 + $0xe8] sm:$0xff]  }
   0x7   :  { %v611_v14 = vld [vmem:[%s802_s1 + $0x18] sm:$0xff]   ;;  %v615_v18 = vld [vmem:[%s802_s1 + $0x20] sm:$0xff]   ;;  %v619_v22 = vld [vmem:[%s802_s1 + $0x28] sm:$0xff]  }
   0x8   :  { %537 = vmatpush3.bf16.msra.mxu0 %v603_v6  ;;  %v612_v15 = vld [vmem:[%s802_s1 + $0x98] sm:$0xff]   ;;  %v616_v19 = vld [vmem:[%s802_s1 + $0xa0] sm:$0xff]   ;;  %v620_v23 = vld [vmem:[%s802_s1 + $0xa8] sm:$0xff]  }
   0x9   :  { %559 = vmatpush3.bf16.msra.mxu1 %v604_v7  ;;  %538 = vmatprep.subr.bf16.mxu0 %v605_v8  ;;  %v621_v24 = vld [vmem:[%s802_s1 + $0x70] sm:$0xff]   ;;  %v625_v28 = vld [vmem:[%s802_s1 + $0x78] sm:$0xff]   ;;  %v634_v36 = vld [vmem:[%s803_s0 + $0xc] ss:$20 sps:$4 sm:$0xff]  }
   0xa   :  { %560 = vmatprep.subr.bf16.mxu1 %v606_v9  ;;  %v622_v25 = vld [vmem:[%s802_s1 + $0xf0] sm:$0xff]   ;;  %v626_v29 = vld [vmem:[%s802_s1 + $0xf8] sm:$0xff]   ;;  %v635_v37 = vld [vmem:[%s802_s1 + $0x100] sm:$0xff]   ;;  %414 = vmatprep.mubr.bf16.mxu1 %v634_v36 }
   0xb   :  { %v623_v26 = vld [vmem:[%s802_s1 + $0x30] sm:$0xff]   ;;  %v627_v30 = vld [vmem:[%s802_s1 + $0x38] sm:$0xff]   ;;  %v636_v38 = vld [vmem:[%s802_s1 + $0x108] sm:$0xff]  }
   0xc   :  { %539 = vmatpush3.bf16.msra.mxu0 %v607_v10  ;;  %v624_v27 = vld [vmem:[%s802_s1 + $0xb0] sm:$0xff]   ;;  %v628_v31 = vld [vmem:[%s802_s1 + $0xb8] sm:$0xff]   ;;  %v532_v57 = vld [vmem:[%s804_s2] ss:$0 sm:$0xff] }
   0xd   :  { %561 = vmatpush3.bf16.msra.mxu1 %v608_v11  ;;  %540 = vmatprep.subr.bf16.mxu0 %v609_v12  ;;  %v629_v32 = vld [vmem:[%s803_s0] ss:$20 sps:$4 sm:$0xff]   ;;  %v631_v33 = vld [vmem:[%s803_s0 + $0x4] ss:$20 sps:$4 sm:$0xff]   ;;  %v632_v35 = vld [vmem:[%s803_s0 + $0x8] ss:$20 sps:$4 sm:$0xff]  }
   0xe   :  { %562 = vmatprep.subr.bf16.mxu1 %v610_v13  ;;  %373 = vmatprep.mubr.bf16.mxu0 %v631_v33  ;;  %v637_v39 = vld [vmem:[%s802_s1 + $0x110] sm:$0xff]   ;;  %v638_v40 = vld [vmem:[%s802_s1 + $0x118] sm:$0xff]   ;;  %v533_v60 = vld [vmem:[%s805_s3] ss:$0 sm:$0xff] }
   0xf   :  { %v639_v41 = vld [vmem:[%s803_s0 + $0x10] ss:$20 sps:$4 sm:$0xff]  }
  0x10   :  { %541 = vmatpush3.bf16.msra.mxu0 %v611_v14 }
  0x11   :  { %563 = vmatpush3.bf16.msra.mxu1 %v612_v15  ;;  %542 = vmatprep.subr.bf16.mxu0 %v613_v16 }
  0x12   :  { %564 = vmatprep.subr.bf16.mxu1 %v614_v17 }
  0x14   :  { %543 = vmatpush3.bf16.msra.mxu0 %v615_v18 }
  0x15   :  { %565 = vmatpush3.bf16.msra.mxu1 %v616_v19  ;;  %544 = vmatprep.subr.bf16.mxu0 %v617_v20 }
  0x16   :  { %566 = vmatprep.subr.bf16.mxu1 %v618_v21 }
  0x18   :  { %545 = vmatpush3.bf16.msra.mxu0 %v619_v22 }
  0x19   :  { %567 = vmatpush3.bf16.msra.mxu1 %v620_v23  ;;  %546 = vmatprep.subr.bf16.mxu0 %v621_v24 }
  0x1a   :  { %568 = vmatprep.subr.bf16.mxu1 %v622_v25 }
  0x1c   :  { %547 = vmatpush3.bf16.msra.mxu0 %v623_v26 }
  0x1d   :  { %569 = vmatpush3.bf16.msra.mxu1 %v624_v27  ;;  %548 = vmatprep.subr.bf16.mxu0 %v625_v28 }
  0x1e   :  { %570 = vmatprep.subr.bf16.mxu1 %v626_v29 }
  0x20   :  { %549 = vmatpush3.bf16.msra.mxu0 %v627_v30 }
  0x21   :  { %571 = vmatpush3.bf16.msra.mxu1 %v628_v31  ;;  %583 = vmatprep.subr.bf16.mxu0 %v640_v34 }
  0x23   :  { %374 = vmatmul.mubr.bf16.vlgmr.msra.gmra.mrb[0].mxu0 %v629_v32 }
  0x24   :  { %415 = vmatmul.mubr.bf16.vlgmr.msra.gmra.mrb[0].mxu1 %v632_v35  ;;  %584 = vmatpush3.bf16.msra.mxu0 %v635_v37 }
  0x25   :  { %585 = vmatprep.subr.bf16.mxu0 %v640_v34  ;;  %591 = vmatprep.mubr.msk.bf16.mxu0 %vm641_vm0, %v640_v34 }
  0x28   :  { %586 = vmatpush3.bf16.msra.mxu0 %v636_v38 }
  0x29   :  { %587 = vmatprep.subr.bf16.mxu0 %v640_v34 }
  0x2c   :  { %588 = vmatpush3.bf16.msra.mxu0 %v637_v39 }
  0x2d   :  { %589 = vmatprep.subr.bf16.mxu0 %v640_v34 }
  0x30   :  { %590 = vmatpush3.bf16.msra.mxu0 %v638_v40 }
  0x33   :  { %592 = vmatmul.mubr.msk.bf16.vlgmr.msra.gmra.mrb[4].mxu0 %vm337_vm1, %v639_v41 }
  0xf6   :  { %v550_v42 = vpop.f32.mrb[0].mxu0 }
  0xf7   :  { %v572_v43 = vpop.f32.mrb[0].mxu1  ;;  %v551_v44 = vpop.f32.mrb[1].mxu0 }
  0xf8   :  { %v552_v45 = vadd.f32 %v551_v44, %v550_v42  ;;  %v573_v46 = vpop.f32.mrb[1].mxu1  ;;  %v553_v47 = vpop.f32.mrb[2].mxu0 }
  0xf9   :  { %v574_v48 = vadd.f32 %v573_v46, %v572_v43  ;;  %v575_v49 = vpop.f32.mrb[2].mxu1  ;;  %v554_v50 = vpop.f32.mrb[3].mxu0 }
  0xfa   :  { %v555_v51 = vadd.f32 %v554_v50, %v553_v47  ;;  %v576_v52 = vpop.f32.mrb[3].mxu1 }
  0xfb   :  { %v577_v53 = vadd.f32 %v576_v52, %v575_v49  ;;  %v417_v54 = vadd.f32 %v574_v48, %v552_v45 }
  0xfd   :  { %v420_v55 = vadd.f32 %v577_v53, %v555_v51 }
 0x106   :  { %v457_v56 = vpop.f32.mrb[4].mxu0 }
 0x107   :  { %v458_v58 = vadd.f32 %v457_v56, %v417_v54  ;;  %v593_v59 = vpop.f32.mrb[5].mxu0 }
 0x108   :  { %v460_v61 = vpop.f32.mrb[6].mxu0 }
 0x109   :  { %v471_v62 = vmul.f32 %v532_v57, %v458_v58  ;;  %v461_v63 = vadd.f32 %v460_v61, %v420_v55  ;;  %v594_v0 = vpop.f32.mrb[7].mxu0 }
 0x10b   :  { %v480_v1 = vadd.f32 %v533_v60, %v471_v62  ;;  %v472_v2 = vmul.f32 %v532_v57, %v461_v63 }
 0x10d   :  { %v482_v3 = vmax.f32 %v480_v1, 0.0  ;;  %v481_v4 = vadd.f32 %v533_v60, %v472_v2 }
 0x10f   :  { %484 = vst [vmem:[%s806_s4] sm:$0xff] %v482_v3  ;;  %v483_v5 = vmax.f32 %v481_v4, 0.0 }
 0x111   :  { %485 = vst [vmem:[%s806_s4 + $0x8] sm:$0xff] %v483_v5 }

// kernel: my_inception3_forward.32
= control target key start
LH: loop header
LB: loop body
LE: loop exit
PB: predicated region body
PF: predicated region fallthrough
CT: control target
= control target key end

     0   :  { %v906_v36 = vmov 0.0   ;;  %vm907_vm0 = vmmov 0   ;;  %vm493_vm1 = vcmask 785408   ;;  %s1128_s1 = inlined_call_operand.vmem [shape: bf16[864,128], index: 1, kind: input, shape index: {}]   ;;  %s1129_s0 = inlined_call_operand.vmem [shape: bf16[16,864], index: 0, kind: input, shape index: {}]   ;;  %s1130_s2 = inlined_call_operand.vmem [shape: f32[1,128], index: 2, kind: input, shape index: {}]   ;;  %s1131_s3 = inlined_call_operand.vmem [shape: f32[1,128], index: 3, kind: input, shape index: {}]   ;;  %s1132_s4 = inlined_call_operand.vmem [shape: f32[16,128], index: 4, kind: output, shape index: {}]  }
   0x1   :  { %v842_v0 = vld [vmem:[%s1128_s1 + $0x40] sm:$0xff]   ;;  %v846_v4 = vld [vmem:[%s1128_s1 + $0x48] sm:$0xff]   ;;  %v850_v8 = vld [vmem:[%s1128_s1 + $0x50] sm:$0xff]  }
   0x2   :  { %v843_v1 = vld [vmem:[%s1128_s1 + $0xc0] sm:$0xff]   ;;  %751 = vmatprep.subr.bf16.mxu0 %v842_v0  ;;  %v847_v5 = vld [vmem:[%s1128_s1 + $0xc8] sm:$0xff]   ;;  %v851_v9 = vld [vmem:[%s1128_s1 + $0xd0] sm:$0xff]  }
   0x3   :  { %v844_v2 = vld [vmem:[%s1128_s1] sm:$0xff]   ;;  %773 = vmatprep.subr.bf16.mxu1 %v843_v1  ;;  %v848_v6 = vld [vmem:[%s1128_s1 + $0x8] sm:$0xff]   ;;  %v852_v10 = vld [vmem:[%s1128_s1 + $0x10] sm:$0xff]  }
   0x4   :  { %v845_v3 = vld [vmem:[%s1128_s1 + $0x80] sm:$0xff]   ;;  %752 = vmatpush3.bf16.msra.mxu0 %v844_v2  ;;  %v849_v7 = vld [vmem:[%s1128_s1 + $0x88] sm:$0xff]   ;;  %v853_v11 = vld [vmem:[%s1128_s1 + $0x90] sm:$0xff]  }
   0x5   :  { %774 = vmatpush3.bf16.msra.mxu1 %v845_v3  ;;  %753 = vmatprep.subr.bf16.mxu0 %v846_v4  ;;  %v854_v12 = vld [vmem:[%s1128_s1 + $0x58] sm:$0xff]   ;;  %v858_v16 = vld [vmem:[%s1128_s1 + $0x60] sm:$0xff]   ;;  %v862_v20 = vld [vmem:[%s1128_s1 + $0x68] sm:$0xff]  }
   0x6   :  { %775 = vmatprep.subr.bf16.mxu1 %v847_v5  ;;  %v855_v13 = vld [vmem:[%s1128_s1 + $0xd8] sm:$0xff]   ;;  %v859_v17 = vld [vmem:[%s1128_s1 + $0xe0] sm:$0xff]   ;;  %v863_v21 = vld [vmem:[%s1128_s1 + $0xe8] sm:$0xff]  }
   0x7   :  { %v856_v14 = vld [vmem:[%s1128_s1 + $0x18] sm:$0xff]   ;;  %v860_v18 = vld [vmem:[%s1128_s1 + $0x20] sm:$0xff]   ;;  %v864_v22 = vld [vmem:[%s1128_s1 + $0x28] sm:$0xff]  }
   0x8   :  { %754 = vmatpush3.bf16.msra.mxu0 %v848_v6  ;;  %v857_v15 = vld [vmem:[%s1128_s1 + $0x98] sm:$0xff]   ;;  %v861_v19 = vld [vmem:[%s1128_s1 + $0xa0] sm:$0xff]   ;;  %v865_v23 = vld [vmem:[%s1128_s1 + $0xa8] sm:$0xff]  }
   0x9   :  { %776 = vmatpush3.bf16.msra.mxu1 %v849_v7  ;;  %755 = vmatprep.subr.bf16.mxu0 %v850_v8  ;;  %v866_v24 = vld [vmem:[%s1128_s1 + $0x70] sm:$0xff]   ;;  %v870_v28 = vld [vmem:[%s1128_s1 + $0x78] sm:$0xff]   ;;  %v876_v33 = vld [vmem:[%s1129_s0 + $0x4] ss:$28 sps:$4 sm:$0xff]  }
   0xa   :  { %777 = vmatprep.subr.bf16.mxu1 %v851_v9  ;;  %v867_v25 = vld [vmem:[%s1128_s1 + $0xf0] sm:$0xff]   ;;  %v871_v29 = vld [vmem:[%s1128_s1 + $0xf8] sm:$0xff]   ;;  %v877_v34 = vld [vmem:[%s1129_s0 + $0x8] ss:$28 sps:$4 sm:$0xff]   ;;  %529 = vmatprep.mubr.bf16.mxu0 %v876_v33 }
   0xb   :  { %v868_v26 = vld [vmem:[%s1128_s1 + $0x30] sm:$0xff]   ;;  %v872_v30 = vld [vmem:[%s1128_s1 + $0x38] sm:$0xff]   ;;  %v879_v35 = vld [vmem:[%s1129_s0 + $0xc] ss:$28 sps:$4 sm:$0xff]  }
   0xc   :  { %756 = vmatpush3.bf16.msra.mxu0 %v852_v10  ;;  %v869_v27 = vld [vmem:[%s1128_s1 + $0xb0] sm:$0xff]   ;;  %v873_v31 = vld [vmem:[%s1128_s1 + $0xb8] sm:$0xff]   ;;  %v880_v37 = vld [vmem:[%s1128_s1 + $0x140] sm:$0xff]   ;;  %570 = vmatprep.mubr.bf16.mxu1 %v879_v35 }
   0xd   :  { %778 = vmatpush3.bf16.msra.mxu1 %v853_v11  ;;  %757 = vmatprep.subr.bf16.mxu0 %v854_v12  ;;  %v874_v32 = vld [vmem:[%s1129_s0] ss:$28 sps:$4 sm:$0xff]   ;;  %v882_v39 = vld [vmem:[%s1128_s1 + $0x148] sm:$0xff]   ;;  %v884_v41 = vld [vmem:[%s1128_s1 + $0x150] sm:$0xff]  }
   0xe   :  { %779 = vmatprep.subr.bf16.mxu1 %v855_v13  ;;  %v881_v38 = vld [vmem:[%s1128_s1 + $0x100] sm:$0xff]   ;;  %v883_v40 = vld [vmem:[%s1128_s1 + $0x108] sm:$0xff]   ;;  %v885_v43 = vld [vmem:[%s1128_s1 + $0x110] sm:$0xff]  }
   0xf   :  { %v886_v42 = vld [vmem:[%s1128_s1 + $0x180] sm:$0xff]   ;;  %v887_v44 = vld [vmem:[%s1128_s1 + $0x158] sm:$0xff]   ;;  %v889_v45 = vld [vmem:[%s1128_s1 + $0x188] sm:$0xff]  }
  0x10   :  { %758 = vmatpush3.bf16.msra.mxu0 %v856_v14  ;;  %v888_v46 = vld [vmem:[%s1128_s1 + $0x118] sm:$0xff]   ;;  %v890_v47 = vld [vmem:[%s1128_s1 + $0x160] sm:$0xff]   ;;  %v892_v48 = vld [vmem:[%s1128_s1 + $0x190] sm:$0xff]  }
  0x11   :  { %780 = vmatpush3.bf16.msra.mxu1 %v857_v15  ;;  %759 = vmatprep.subr.bf16.mxu0 %v858_v16  ;;  %v891_v49 = vld [vmem:[%s1128_s1 + $0x120] sm:$0xff]   ;;  %v893_v50 = vld [vmem:[%s1128_s1 + $0x168] sm:$0xff]   ;;  %v895_v51 = vld [vmem:[%s1128_s1 + $0x198] sm:$0xff]  }
  0x12   :  { %781 = vmatprep.subr.bf16.mxu1 %v859_v17  ;;  %v894_v52 = vld [vmem:[%s1128_s1 + $0x128] sm:$0xff]   ;;  %v896_v53 = vld [vmem:[%s1128_s1 + $0x170] sm:$0xff]   ;;  %v898_v54 = vld [vmem:[%s1128_s1 + $0x1a0] sm:$0xff]  }
  0x13   :  { %v903_v55 = vld [vmem:[%s1129_s0 + $0x14] ss:$28 sps:$4 sm:$0xff]   ;;  %v899_v57 = vld [vmem:[%s1128_s1 + $0x178] sm:$0xff]   ;;  %v904_v58 = vld [vmem:[%s1128_s1 + $0x1a8] sm:$0xff]  }
  0x14   :  { %760 = vmatpush3.bf16.msra.mxu0 %v860_v18  ;;  %v897_v56 = vld [vmem:[%s1128_s1 + $0x130] sm:$0xff]   ;;  %v900_v59 = vld [vmem:[%s1128_s1 + $0x138] sm:$0xff]  }
  0x15   :  { %782 = vmatpush3.bf16.msra.mxu1 %v861_v19  ;;  %761 = vmatprep.subr.bf16.mxu0 %v862_v20  ;;  %v905_v60 = vld [vmem:[%s1129_s0 + $0x18] ss:$28 sps:$4 sm:$0xff]   ;;  %v901_v61 = vld [vmem:[%s1129_s0 + $0x10] ss:$28 sps:$4 sm:$0xff]  }
  0x16   :  { %783 = vmatprep.subr.bf16.mxu1 %v863_v21 }
  0x18   :  { %762 = vmatpush3.bf16.msra.mxu0 %v864_v22 }
  0x19   :  { %784 = vmatpush3.bf16.msra.mxu1 %v865_v23  ;;  %763 = vmatprep.subr.bf16.mxu0 %v866_v24  ;;  %v749_v23 = vld [vmem:[%s1130_s2] ss:$0 sm:$0xff] }
  0x1a   :  { %785 = vmatprep.subr.bf16.mxu1 %v867_v25 }
  0x1c   :  { %764 = vmatpush3.bf16.msra.mxu0 %v868_v26  ;;  %v750_v26 = vld [vmem:[%s1131_s3] ss:$0 sm:$0xff] }
  0x1d   :  { %786 = vmatpush3.bf16.msra.mxu1 %v869_v27  ;;  %765 = vmatprep.subr.bf16.mxu0 %v870_v28 }
  0x1e   :  { %787 = vmatprep.subr.bf16.mxu1 %v871_v29 }
  0x20   :  { %766 = vmatpush3.bf16.msra.mxu0 %v872_v30 }
  0x21   :  { %788 = vmatpush3.bf16.msra.mxu1 %v873_v31  ;;  %795 = vmatprep.subr.bf16.mxu0 %v880_v37 }
  0x22   :  { %824 = vmatprep.subr.bf16.mxu1 %v906_v36 }
  0x23   :  { %530 = vmatmul.mubr.bf16.vlgmr.msra.gmra.mrb[0].mxu0 %v874_v32 }
  0x24   :  { %571 = vmatmul.mubr.bf16.vlgmr.msra.gmra.mrb[0].mxu1 %v877_v34  ;;  %796 = vmatpush3.bf16.msra.mxu0 %v881_v38 }
  0x25   :  { %836 = vmatprep.mubr.msk.bf16.mxu1 %vm907_vm0, %v906_v36  ;;  %797 = vmatprep.subr.bf16.mxu0 %v882_v39 }
  0x26   :  { %825 = vmatpush3.bf16.msra.mxu1 %v886_v42  ;;  %611 = vmatprep.mubr.bf16.mxu0 %v903_v55 }
  0x27   :  { %826 = vmatprep.subr.bf16.mxu1 %v906_v36 }
  0x28   :  { %798 = vmatpush3.bf16.msra.mxu0 %v883_v40 }
  0x29   :  { %799 = vmatprep.subr.bf16.mxu0 %v884_v41 }
  0x2a   :  { %827 = vmatpush3.bf16.msra.mxu1 %v889_v45 }
  0x2b   :  { %828 = vmatprep.subr.bf16.mxu1 %v906_v36 }
  0x2c   :  { %800 = vmatpush3.bf16.msra.mxu0 %v885_v43 }
  0x2d   :  { %801 = vmatprep.subr.bf16.mxu0 %v887_v44 }
  0x2e   :  { %829 = vmatpush3.bf16.msra.mxu1 %v892_v48 }
  0x2f   :  { %830 = vmatprep.subr.bf16.mxu1 %v906_v36 }
  0x30   :  { %802 = vmatpush3.bf16.msra.mxu0 %v888_v46 }
  0x31   :  { %803 = vmatprep.subr.bf16.mxu0 %v890_v47 }
  0x32   :  { %831 = vmatpush3.bf16.msra.mxu1 %v895_v51 }
  0x33   :  { %832 = vmatprep.subr.bf16.mxu1 %v906_v36 }
  0x34   :  { %804 = vmatpush3.bf16.msra.mxu0 %v891_v49 }
  0x35   :  { %805 = vmatprep.subr.bf16.mxu0 %v893_v50 }
  0x36   :  { %833 = vmatpush3.bf16.msra.mxu1 %v898_v54 }
  0x37   :  { %834 = vmatprep.subr.bf16.mxu1 %v906_v36 }
  0x38   :  { %806 = vmatpush3.bf16.msra.mxu0 %v894_v52 }
  0x39   :  { %807 = vmatprep.subr.bf16.mxu0 %v896_v53 }
  0x3a   :  { %835 = vmatpush3.bf16.msra.mxu1 %v904_v58 }
  0x3c   :  { %808 = vmatpush3.bf16.msra.mxu0 %v897_v56 }
  0x3d   :  { %809 = vmatprep.subr.bf16.mxu0 %v899_v57  ;;  %837 = vmatmul.mubr.msk.bf16.vlgmr.msra.gmra.mrb[4].mxu1 %vm493_vm1, %v905_v60 }
  0x40   :  { %810 = vmatpush3.bf16.msra.mxu0 %v900_v59 }
  0x43   :  { %612 = vmatmul.mubr.bf16.vlgmr.msra.gmra.mrb[4].mxu0 %v901_v61 }
  0xf6   :  { %v767_v62 = vpop.f32.mrb[0].mxu0 }
  0xf7   :  { %v789_v63 = vpop.f32.mrb[0].mxu1  ;;  %v768_v0 = vpop.f32.mrb[1].mxu0 }
  0xf8   :  { %v769_v1 = vadd.f32 %v768_v0, %v767_v62  ;;  %v790_v2 = vpop.f32.mrb[1].mxu1  ;;  %v770_v3 = vpop.f32.mrb[2].mxu0 }
  0xf9   :  { %v791_v4 = vadd.f32 %v790_v2, %v789_v63  ;;  %v792_v5 = vpop.f32.mrb[2].mxu1  ;;  %v771_v6 = vpop.f32.mrb[3].mxu0 }
  0xfa   :  { %v772_v7 = vadd.f32 %v771_v6, %v770_v3  ;;  %v793_v8 = vpop.f32.mrb[3].mxu1 }
  0xfb   :  { %v573_v9 = vadd.f32 %v791_v4, %v769_v1  ;;  %v794_v10 = vadd.f32 %v793_v8, %v792_v5 }
  0xfd   :  { %v576_v11 = vadd.f32 %v794_v10, %v772_v7 }
 0x110   :  { %v654_v12 = vpop.f32.mrb[4].mxu1 }
 0x111   :  { %v838_v13 = vpop.f32.mrb[5].mxu1 }
 0x112   :  { %v657_v14 = vpop.f32.mrb[6].mxu1 }
 0x113   :  { %v839_v16 = vpop.f32.mrb[7].mxu1 }
 0x116   :  { %v811_v15 = vpop.f32.mrb[4].mxu0 }
 0x117   :  { %v812_v17 = vpop.f32.mrb[5].mxu0 }
 0x118   :  { %v813_v18 = vadd.f32 %v812_v17, %v811_v15  ;;  %v814_v19 = vpop.f32.mrb[6].mxu0 }
 0x119   :  { %v815_v20 = vpop.f32.mrb[7].mxu0 }
 0x11a   :  { %v614_v21 = vadd.f32 %v813_v18, %v573_v9  ;;  %v816_v22 = vadd.f32 %v815_v20, %v814_v19 }
 0x11c   :  { %v655_v24 = vadd.f32 %v654_v12, %v614_v21  ;;  %v617_v25 = vadd.f32 %v816_v22, %v576_v11 }
 0x11e   :  { %v668_v27 = vmul.f32 %v749_v23, %v655_v24  ;;  %v658_v28 = vadd.f32 %v657_v14, %v617_v25 }
 0x120   :  { %v677_v29 = vadd.f32 %v750_v26, %v668_v27  ;;  %v669_v30 = vmul.f32 %v749_v23, %v658_v28 }
 0x122   :  { %v679_v31 = vmax.f32 %v677_v29, 0.0  ;;  %v678_v32 = vadd.f32 %v750_v26, %v669_v30 }
 0x124   :  { %681 = vst [vmem:[%s1132_s4] sm:$0xff] %v679_v31  ;;  %v680_v33 = vmax.f32 %v678_v32, 0.0 }
 0x126   :  { %682 = vst [vmem:[%s1132_s4 + $0x8] sm:$0xff] %v680_v33 }

// kernel: my_inception3_forward.33
= control target key start
LH: loop header
LB: loop body
LE: loop exit
PB: predicated region body
PF: predicated region fallthrough
CT: control target
= control target key end

     0   :  { %v327_v0 = vmov 0   ;;  %vm196_vm0 = vcmask 523264   ;;  %s521_s1 = inlined_call_operand.vmem [shape: bf16[192,128], index: 1, kind: input, shape index: {}]   ;;  %s522_s0 = inlined_call_operand.vmem [shape: f32[9,16,192], index: 0, kind: input, shape index: {}]   ;;  %s523_s2 = inlined_call_operand.vmem [shape: f32[1,128], index: 2, kind: input, shape index: {}]   ;;  %s524_s3 = inlined_call_operand.vmem [shape: f32[1,128], index: 3, kind: input, shape index: {}]   ;;  %s525_s4 = inlined_call_operand.vmem [shape: f32[16,128], index: 4, kind: output, shape index: {}]  }
   0x1   :  { %200 = vmatprep.subr.bf16.mxu0 %v327_v0  ;;  %v315_v1 = vld [vmem:[%s521_s1] sm:$0xff]   ;;  %v316_v2 = vld [vmem:[%s521_s1 + $0x8] sm:$0xff]   ;;  %v317_v3 = vld [vmem:[%s521_s1 + $0x10] sm:$0xff]  }
   0x2   :  { %201 = vmatpush1.bf16.msra.mxu0 %v315_v1  ;;  %v318_v4 = vld [vmem:[%s521_s1 + $0x18] sm:$0xff]   ;;  %v19_v5 = vld [vmem:[%s522_s0 + $0x8] sm:$0xff]  ;;  %v319_v12 = vld [vmem:[%s521_s1 + $0x20] sm:$0xff]  }
   0x3   :  { %202 = vmatprep.subr.bf16.mxu0 %v327_v0  ;;  %v21_v6 = vld [vmem:[%s522_s0 + $0x18] sm:$0xff]  ;;  %v268_v7 = vld [vmem:[%s522_s0 + $0x28] sm:$0xff]  ;;  %v18_v25 = vld [vmem:[%s522_s0] sm:$0xff] }
   0x4   :  { %v270_v8 = vld [vmem:[%s522_s0 + $0x38] sm:$0xff]  ;;  %v28_v9 = vadd.f32 %v268_v7, %v19_v5  ;;  %v272_v10 = vld [vmem:[%s522_s0 + $0x48] sm:$0xff]  ;;  %v20_v26 = vld [vmem:[%s522_s0 + $0x10] sm:$0xff] }
   0x5   :  { %v274_v11 = vld [vmem:[%s522_s0 + $0x58] sm:$0xff]  ;;  %v30_v13 = vadd.f32 %v270_v8, %v21_v6  ;;  %v276_v14 = vld [vmem:[%s522_s0 + $0x68] sm:$0xff]  ;;  %v267_v27 = vld [vmem:[%s522_s0 + $0x20] sm:$0xff] }
   0x6   :  { %203 = vmatpush1.bf16.msra.mxu0 %v316_v2  ;;  %v37_v15 = vadd.f32 %v272_v10, %v28_v9  ;;  %v278_v16 = vld [vmem:[%s522_s0 + $0x78] sm:$0xff]  ;;  %v320_v17 = vld [vmem:[%s521_s1 + $0x28] sm:$0xff]   ;;  %v269_v29 = vld [vmem:[%s522_s0 + $0x30] sm:$0xff]  ;;  %v27_v30 = vadd.f32 %v267_v27, %v18_v25 }
   0x7   :  { %204 = vmatprep.subr.bf16.mxu0 %v327_v0  ;;  %v39_v18 = vadd.f32 %v274_v11, %v30_v13  ;;  %v280_v19 = vld [vmem:[%s522_s0 + $0x88] sm:$0xff]  ;;  %v282_v21 = vld [vmem:[%s522_s0 + $0x98] sm:$0xff]  ;;  %v271_v31 = vld [vmem:[%s522_s0 + $0x40] sm:$0xff]  ;;  %v29_v35 = vadd.f32 %v269_v29, %v20_v26 }
   0x8   :  { %v46_v20 = vadd.f32 %v276_v14, %v37_v15  ;;  %v284_v22 = vld [vmem:[%s522_s0 + $0xa8] sm:$0xff]  ;;  %v286_v23 = vld [vmem:[%s522_s0 + $0xb8] sm:$0xff]  ;;  %v273_v32 = vld [vmem:[%s522_s0 + $0x50] sm:$0xff]  ;;  %v36_v39 = vadd.f32 %v271_v31, %v27_v30 }
   0x9   :  { %v48_v24 = vadd.f32 %v278_v16, %v39_v18  ;;  %v288_v34 = vld [vmem:[%s522_s0 + $0xc8] sm:$0xff]  ;;  %v275_v36 = vld [vmem:[%s522_s0 + $0x60] sm:$0xff]  ;;  %v290_v38 = vld [vmem:[%s522_s0 + $0xd8] sm:$0xff]  ;;  %v38_v44 = vadd.f32 %v273_v32, %v29_v35 }
   0xa   :  { %205 = vmatpush1.bf16.msra.mxu0 %v317_v3  ;;  %v55_v28 = vadd.f32 %v280_v19, %v46_v20  ;;  %v277_v40 = vld [vmem:[%s522_s0 + $0x70] sm:$0xff]  ;;  %v292_v43 = vld [vmem:[%s522_s0 + $0xe8] sm:$0xff]  ;;  %v279_v45 = vld [vmem:[%s522_s0 + $0x80] sm:$0xff]  ;;  %v45_v48 = vadd.f32 %v275_v36, %v36_v39 }
   0xb   :  { %206 = vmatprep.subr.bf16.mxu0 %v327_v0  ;;  %v57_v33 = vadd.f32 %v282_v21, %v48_v24  ;;  %v321_v41 = vld [vmem:[%s521_s1 + $0x30] sm:$0xff]   ;;  %v294_v47 = vld [vmem:[%s522_s0 + $0xf8] sm:$0xff]  ;;  %v296_v51 = vld [vmem:[%s522_s0 + $0x108] sm:$0xff]  ;;  %v47_v52 = vadd.f32 %v277_v40, %v38_v44 }
   0xc   :  { %v64_v37 = vadd.f32 %v284_v22, %v55_v28  ;;  %v281_v49 = vld [vmem:[%s522_s0 + $0x90] sm:$0xff]  ;;  %v283_v53 = vld [vmem:[%s522_s0 + $0xa0] sm:$0xff]  ;;  %v298_v55 = vld [vmem:[%s522_s0 + $0x118] sm:$0xff]  ;;  %v54_v56 = vadd.f32 %v279_v45, %v45_v48 }
   0xd   :  { %v66_v42 = vadd.f32 %v286_v23, %v57_v33  ;;  %v285_v57 = vld [vmem:[%s522_s0 + $0xb0] sm:$0xff]  ;;  %v322_v58 = vld [vmem:[%s521_s1 + $0x38] sm:$0xff]   ;;  %v56_v60 = vadd.f32 %v281_v49, %v47_v52  ;;  %v287_v61 = vld [vmem:[%s522_s0 + $0xc0] sm:$0xff] }
   0xe   :  { %207 = vmatpush1.bf16.msra.mxu0 %v318_v4  ;;  %v73_v46 = vadd.f32 %v288_v34, %v64_v37  ;;  %v63_v63 = vadd.f32 %v283_v53, %v54_v56  ;;  %v289_v1 = vld [vmem:[%s522_s0 + $0xd0] sm:$0xff]  ;;  %v323_v6 = vld [vmem:[%s521_s1 + $0x40] sm:$0xff]   ;;  %v324_v14 = vld [vmem:[%s521_s1 + $0x48] sm:$0xff]  }
   0xf   :  { %208 = vmatprep.subr.bf16.mxu0 %v327_v0  ;;  %v75_v50 = vadd.f32 %v290_v38, %v66_v42  ;;  %v65_v3 = vadd.f32 %v285_v57, %v56_v60  ;;  %v291_v9 = vld [vmem:[%s522_s0 + $0xe0] sm:$0xff]  ;;  %v293_v10 = vld [vmem:[%s522_s0 + $0xf0] sm:$0xff]  ;;  %v326_v22 = vld [vmem:[%s521_s1 + $0x58] sm:$0xff]  }
  0x10   :  { %v82_v54 = vadd.f32 %v292_v43, %v73_v46  ;;  %v72_v5 = vadd.f32 %v287_v61, %v63_v63  ;;  %v295_v15 = vld [vmem:[%s522_s0 + $0x100] sm:$0xff]  ;;  %v297_v16 = vld [vmem:[%s522_s0 + $0x110] sm:$0xff] }
  0x11   :  { %v84_v59 = vadd.f32 %v294_v47, %v75_v50  ;;  %v74_v8 = vadd.f32 %v289_v1, %v65_v3  ;;  %v325_v19 = vld [vmem:[%s521_s1 + $0x50] sm:$0xff]   ;;  %v312_v24 = vld [vmem:[%s523_s2] ss:$0 sm:$0xff] }
  0x12   :  { %209 = vmatpush1.bf16.msra.mxu0 %v319_v12  ;;  %v91_v62 = vadd.f32 %v296_v51, %v82_v54  ;;  %v81_v12 = vadd.f32 %v291_v9, %v72_v5  ;;  %v313_v26 = vld [vmem:[%s524_s3] ss:$0 sm:$0xff] }
  0x13   :  { %210 = vmatprep.subr.bf16.mxu0 %v327_v0  ;;  %v93_v2 = vadd.f32 %v298_v55, %v84_v59  ;;  %v83_v13 = vadd.f32 %v293_v10, %v74_v8 }
  0x14   :  { %v95_v4 = vmul.f32 0.11111111, %v91_v62 }
  0x15   :  { %v97_v7 = vmul.f32 0.11111111, %v93_v2  ;;  %v92_v18 = vadd.f32 %v297_v16, %v83_v13 }
  0x16   :  { %211 = vmatpush1.bf16.msra.mxu0 %v320_v17  ;;  %v90_v17 = vadd.f32 %v295_v15, %v81_v12 }
  0x17   :  { %212 = vmatprep.subr.bf16.mxu0 %v327_v0  ;;  %v99_v11 = vpack.c.bf16 %v97_v7, %v95_v4  ;;  %v96_v21 = vmul.f32 0.11111111, %v92_v18 }
  0x18   :  { %v94_v20 = vmul.f32 0.11111111, %v90_v17 }
  0x19   :  { %311 = vmatprep.mubr.msk.bf16.mxu0 %vm196_vm0, %v99_v11 }
  0x1a   :  { %213 = vmatpush1.bf16.msra.mxu0 %v321_v41  ;;  %v98_v23 = vpack.c.bf16 %v96_v21, %v94_v20 }
  0x1b   :  { %214 = vmatprep.subr.bf16.mxu0 %v327_v0 }
  0x1e   :  { %215 = vmatpush1.bf16.msra.mxu0 %v322_v58 }
  0x1f   :  { %216 = vmatprep.subr.bf16.mxu0 %v327_v0 }
  0x22   :  { %217 = vmatpush1.bf16.msra.mxu0 %v323_v6 }
  0x23   :  { %218 = vmatprep.subr.bf16.mxu0 %v327_v0 }
  0x26   :  { %219 = vmatpush1.bf16.msra.mxu0 %v324_v14 }
  0x27   :  { %220 = vmatprep.subr.bf16.mxu0 %v327_v0 }
  0x2a   :  { %221 = vmatpush1.bf16.msra.mxu0 %v325_v19 }
  0x2b   :  { %222 = vmatprep.subr.bf16.mxu0 %v327_v0 }
  0x2e   :  { %223 = vmatpush1.bf16.msra.mxu0 %v326_v22 }
  0x31   :  { %233 = vmatmul.mubr.bf16.vlgmr.msra.gmra.mrb[0].mxu0 %v98_v23 }
 0x104   :  { %v234_v25 = vpop.f32.mrb[0].mxu0 }
 0x105   :  { %v248_v27 = vmul.f32 %v312_v24, %v234_v25  ;;  %v236_v28 = vpop.f32.mrb[1].mxu0 }
 0x106   :  { %v237_v29 = vpop.f32.mrb[2].mxu0 }
 0x107   :  { %v257_v30 = vadd.f32 %v313_v26, %v248_v27  ;;  %v249_v31 = vmul.f32 %v312_v24, %v237_v29  ;;  %v239_v32 = vpop.f32.mrb[3].mxu0 }
 0x109   :  { %v259_v33 = vmax.f32 %v257_v30, 0.0  ;;  %v258_v0 = vadd.f32 %v313_v26, %v249_v31 }
 0x10b   :  { %261 = vst [vmem:[%s525_s4] sm:$0xff] %v259_v33  ;;  %v260_v34 = vmax.f32 %v258_v0, 0.0 }
 0x10d   :  { %262 = vst [vmem:[%s525_s4 + $0x8] sm:$0xff] %v260_v34 }

// kernel: my_inception3_forward.34
= control target key start
LH: loop header
LB: loop body
LE: loop exit
PB: predicated region body
PF: predicated region fallthrough
CT: control target
= control target key end

     0   :  { %v266_v34 = vlaneseq  ;;  %s538_s1 = inlined_call_operand.vmem [shape: bf16[256,256], index: 1, kind: input, shape index: {}]   ;;  %s539_s0 = inlined_call_operand.vmem [shape: bf16[16,256], index: 0, kind: input, shape index: {}]   ;;  %s540_s2 = inlined_call_operand.vmem [shape: f32[1,256], index: 2, kind: input, shape index: {}]   ;;  %s541_s3 = inlined_call_operand.vmem [shape: f32[1,256], index: 3, kind: input, shape index: {}]   ;;  %s542_s4 = inlined_call_operand.vmem [shape: f32[16,256], index: 4, kind: output, shape index: {}]  }
   0x1   :  { %v342_v0 = vld [vmem:[%s538_s1 + $0x4] ss:$8 sps:$4 sm:$0xff]   ;;  %v344_v1 = vld [vmem:[%s538_s1] ss:$8 sps:$4 sm:$0xff]   ;;  %v345_v2 = vld [vmem:[%s538_s1 + $0x14] ss:$8 sps:$4 sm:$0xff]  }
   0x2   :  { %221 = vmatprep.subr.bf16.mxu0 %v342_v0  ;;  %v347_v3 = vld [vmem:[%s538_s1 + $0x10] ss:$8 sps:$4 sm:$0xff]   ;;  %v348_v4 = vld [vmem:[%s538_s1 + $0x24] ss:$8 sps:$4 sm:$0xff]   ;;  %v350_v5 = vld [vmem:[%s538_s1 + $0x20] ss:$8 sps:$4 sm:$0xff]  }
   0x3   :  { %222 = vmatpush1.bf16.msra.mxu0 %v344_v1  ;;  %v351_v6 = vld [vmem:[%s538_s1 + $0x34] ss:$8 sps:$4 sm:$0xff]   ;;  %v353_v7 = vld [vmem:[%s538_s1 + $0x30] ss:$8 sps:$4 sm:$0xff]   ;;  %v354_v8 = vld [vmem:[%s538_s1 + $0x44] ss:$8 sps:$4 sm:$0xff]  }
   0x4   :  { %223 = vmatprep.subr.bf16.mxu0 %v345_v2  ;;  %v356_v9 = vld [vmem:[%s538_s1 + $0x40] ss:$8 sps:$4 sm:$0xff]   ;;  %v357_v10 = vld [vmem:[%s538_s1 + $0x54] ss:$8 sps:$4 sm:$0xff]   ;;  %v359_v11 = vld [vmem:[%s538_s1 + $0x50] ss:$8 sps:$4 sm:$0xff]  }
   0x5   :  { %v360_v12 = vld [vmem:[%s538_s1 + $0x64] ss:$8 sps:$4 sm:$0xff]   ;;  %v362_v14 = vld [vmem:[%s538_s1 + $0x60] ss:$8 sps:$4 sm:$0xff]   ;;  %v363_v15 = vld [vmem:[%s538_s1 + $0x74] ss:$8 sps:$4 sm:$0xff]  }
   0x6   :  { %v392_v13 = vld [vmem:[%s539_s0 + $0x4] ss:$8 sps:$4 sm:$0xff]   ;;  %v365_v16 = vld [vmem:[%s538_s1 + $0x70] ss:$8 sps:$4 sm:$0xff]   ;;  %v368_v18 = vld [vmem:[%s538_s1 + $0x80] ss:$8 sps:$4 sm:$0xff]  }
   0x7   :  { %224 = vmatpush1.bf16.msra.mxu0 %v347_v3  ;;  %253 = vmatprep.mubr.bf16.mxu0 %v392_v13  ;;  %v366_v17 = vld [vmem:[%s538_s1 + $0x84] ss:$8 sps:$4 sm:$0xff]   ;;  %v369_v19 = vld [vmem:[%s538_s1 + $0x94] ss:$8 sps:$4 sm:$0xff]   ;;  %v371_v20 = vld [vmem:[%s538_s1 + $0x90] ss:$8 sps:$4 sm:$0xff]  }
   0x8   :  { %225 = vmatprep.subr.bf16.mxu0 %v348_v4  ;;  %v372_v21 = vld [vmem:[%s538_s1 + $0xa4] ss:$8 sps:$4 sm:$0xff]   ;;  %v374_v22 = vld [vmem:[%s538_s1 + $0xa0] ss:$8 sps:$4 sm:$0xff]   ;;  %v375_v23 = vld [vmem:[%s538_s1 + $0xb4] ss:$8 sps:$4 sm:$0xff]  }
   0x9   :  { %v377_v24 = vld [vmem:[%s538_s1 + $0xb0] ss:$8 sps:$4 sm:$0xff]   ;;  %v378_v25 = vld [vmem:[%s538_s1 + $0xc4] ss:$8 sps:$4 sm:$0xff]   ;;  %v380_v26 = vld [vmem:[%s538_s1 + $0xc0] ss:$8 sps:$4 sm:$0xff]  }
   0xa   :  { %v381_v27 = vld [vmem:[%s538_s1 + $0xd4] ss:$8 sps:$4 sm:$0xff]   ;;  %v383_v28 = vld [vmem:[%s538_s1 + $0xd0] ss:$8 sps:$4 sm:$0xff]   ;;  %v384_v29 = vld [vmem:[%s538_s1 + $0xe4] ss:$8 sps:$4 sm:$0xff]  }
   0xb   :  { %226 = vmatpush1.bf16.msra.mxu0 %v350_v5  ;;  %v386_v30 = vld [vmem:[%s538_s1 + $0xe0] ss:$8 sps:$4 sm:$0xff]   ;;  %v387_v31 = vld [vmem:[%s538_s1 + $0xf4] ss:$8 sps:$4 sm:$0xff]   ;;  %v389_v32 = vld [vmem:[%s538_s1 + $0xf0] ss:$8 sps:$4 sm:$0xff]  }
   0xc   :  { %227 = vmatprep.subr.bf16.mxu0 %v351_v6  ;;  %v390_v33 = vld [vmem:[%s539_s0] ss:$8 sps:$4 sm:$0xff]   ;;  %v267_v35 = vshrl.u32 %v266_v34, 7 }
   0xd   :  { %v264_v37 = vld [vmem:[%s540_s2] sm:$0x3] }
   0xe   :  { %v268_v36 = vsub.s32 0, %v267_v35  ;;  %v272_v38 = vsub.s32 1, %v267_v35  ;;  %v280_v39 = vld [vmem:[%s541_s3] sm:$0x3] }
   0xf   :  { %228 = vmatpush1.bf16.msra.mxu0 %v353_v7 }
  0x10   :  { %229 = vmatprep.subr.bf16.mxu0 %v354_v8  ;;  %v269_v40 = vrot.slane %v264_v37, %v268_v36  ;;  %v273_v41 = vrot.slane %v264_v37, %v272_v38  ;;  %v285_v42 = vrot.slane %v280_v39, %v268_v36  ;;  %v289_v44 = vrot.slane %v280_v39, %v272_v38 }
  0x13   :  { %230 = vmatpush1.bf16.msra.mxu0 %v356_v9 }
  0x14   :  { %231 = vmatprep.subr.bf16.mxu0 %v357_v10 }
  0x17   :  { %232 = vmatpush1.bf16.msra.mxu0 %v359_v11 }
  0x18   :  { %233 = vmatprep.subr.bf16.mxu0 %v360_v12 }
  0x1b   :  { %234 = vmatpush1.bf16.msra.mxu0 %v362_v14 }
  0x1c   :  { %235 = vmatprep.subr.bf16.mxu0 %v363_v15 }
  0x1f   :  { %236 = vmatpush1.bf16.msra.mxu0 %v365_v16 }
  0x20   :  { %237 = vmatprep.subr.bf16.mxu0 %v366_v17 }
  0x23   :  { %238 = vmatpush1.bf16.msra.mxu0 %v368_v18 }
  0x24   :  { %239 = vmatprep.subr.bf16.mxu0 %v369_v19 }
  0x27   :  { %240 = vmatpush1.bf16.msra.mxu0 %v371_v20 }
  0x28   :  { %241 = vmatprep.subr.bf16.mxu0 %v372_v21 }
  0x2b   :  { %242 = vmatpush1.bf16.msra.mxu0 %v374_v22 }
  0x2c   :  { %243 = vmatprep.subr.bf16.mxu0 %v375_v23 }
  0x2f   :  { %244 = vmatpush1.bf16.msra.mxu0 %v377_v24 }
  0x30   :  { %245 = vmatprep.subr.bf16.mxu0 %v378_v25 }
  0x33   :  { %246 = vmatpush1.bf16.msra.mxu0 %v380_v26 }
  0x34   :  { %247 = vmatprep.subr.bf16.mxu0 %v381_v27 }
  0x37   :  { %248 = vmatpush1.bf16.msra.mxu0 %v383_v28 }
  0x38   :  { %249 = vmatprep.subr.bf16.mxu0 %v384_v29 }
  0x3b   :  { %250 = vmatpush1.bf16.msra.mxu0 %v386_v30 }
  0x3c   :  { %251 = vmatprep.subr.bf16.mxu0 %v387_v31 }
  0x3f   :  { %252 = vmatpush1.bf16.msra.mxu0 %v389_v32 }
  0x42   :  { %254 = vmatmul.mubr.bf16.vlgmr.msra.gmra.mrb[0].mxu0 %v390_v33 }
 0x115   :  { %v255_v43 = vpop.f32.mrb[0].mxu0 }
 0x116   :  { %v276_v45 = vmul.f32 %v269_v40, %v255_v43  ;;  %v257_v46 = vpop.f32.mrb[1].mxu0 }
 0x117   :  { %v277_v47 = vmul.f32 %v273_v41, %v257_v46  ;;  %v259_v48 = vpop.f32.mrb[2].mxu0 }
 0x118   :  { %v292_v49 = vadd.f32 %v285_v42, %v276_v45  ;;  %v278_v50 = vmul.f32 %v269_v40, %v259_v48  ;;  %v261_v51 = vpop.f32.mrb[3].mxu0 }
 0x119   :  { %v293_v52 = vadd.f32 %v289_v44, %v277_v47  ;;  %v279_v53 = vmul.f32 %v273_v41, %v261_v51 }
 0x11a   :  { %v296_v54 = vmax.f32 %v292_v49, 0.0  ;;  %v294_v55 = vadd.f32 %v285_v42, %v278_v50 }
 0x11b   :  { %v297_v56 = vmax.f32 %v293_v52, 0.0  ;;  %v295_v57 = vadd.f32 %v289_v44, %v279_v53 }
 0x11c   :  { %300 = vst [vmem:[%s542_s4] sm:$0xff] %v296_v54  ;;  %v298_v58 = vmax.f32 %v294_v55, 0.0 }
 0x11d   :  { %301 = vst [vmem:[%s542_s4 + $0x8] sm:$0xff] %v297_v56  ;;  %v299_v59 = vmax.f32 %v295_v57, 0.0 }
 0x11e   :  { %302 = vst [vmem:[%s542_s4 + $0x10] sm:$0xff] %v298_v58 }
 0x11f   :  { %303 = vst [vmem:[%s542_s4 + $0x18] sm:$0xff] %v299_v59 }

// kernel: my_inception3_forward.38
= control target key start
LH: loop header
LB: loop body
LE: loop exit
PB: predicated region body
PF: predicated region fallthrough
CT: control target
= control target key end

     0   :  { %s576_s1 = inlined_call_operand.vmem [shape: bf16[256,128], index: 1, kind: input, shape index: {}]   ;;  %s577_s0 = inlined_call_operand.vmem [shape: f32[9,16,256], index: 0, kind: input, shape index: {}]   ;;  %s578_s2 = inlined_call_operand.vmem [shape: f32[1,128], index: 2, kind: input, shape index: {}]   ;;  %s579_s3 = inlined_call_operand.vmem [shape: f32[1,128], index: 3, kind: input, shape index: {}]   ;;  %s580_s4 = inlined_call_operand.vmem [shape: f32[16,128], index: 4, kind: output, shape index: {}]  }
   0x1   :  { %v367_v0 = vld [vmem:[%s576_s1 + $0x40] sm:$0xff]   ;;  %v369_v2 = vld [vmem:[%s576_s1 + $0x48] sm:$0xff]   ;;  %v371_v4 = vld [vmem:[%s576_s1 + $0x50] sm:$0xff]  }
   0x2   :  { %v368_v1 = vld [vmem:[%s576_s1] sm:$0xff]   ;;  %345 = vmatprep.subr.bf16.mxu0 %v367_v0  ;;  %v370_v3 = vld [vmem:[%s576_s1 + $0x8] sm:$0xff]   ;;  %v372_v5 = vld [vmem:[%s576_s1 + $0x10] sm:$0xff]  }
   0x3   :  { %346 = vmatpush3.bf16.msra.mxu0 %v368_v1  ;;  %v373_v6 = vld [vmem:[%s576_s1 + $0x58] sm:$0xff]   ;;  %v375_v8 = vld [vmem:[%s576_s1 + $0x60] sm:$0xff]   ;;  %v377_v10 = vld [vmem:[%s576_s1 + $0x68] sm:$0xff]  }
   0x4   :  { %347 = vmatprep.subr.bf16.mxu0 %v369_v2  ;;  %v374_v7 = vld [vmem:[%s576_s1 + $0x18] sm:$0xff]   ;;  %v376_v9 = vld [vmem:[%s576_s1 + $0x20] sm:$0xff]   ;;  %v19_v11 = vld [vmem:[%s577_s0 + $0x8] sm:$0xff] }
   0x5   :  { %v21_v12 = vld [vmem:[%s577_s0 + $0x18] sm:$0xff]  ;;  %v296_v13 = vld [vmem:[%s577_s0 + $0x28] sm:$0xff]  ;;  %v379_v23 = vld [vmem:[%s576_s1 + $0x70] sm:$0xff]  }
   0x6   :  { %v298_v14 = vld [vmem:[%s577_s0 + $0x38] sm:$0xff]  ;;  %v28_v15 = vadd.f32 %v296_v13, %v19_v11  ;;  %v300_v16 = vld [vmem:[%s577_s0 + $0x48] sm:$0xff]  ;;  %v380_v26 = vld [vmem:[%s576_s1 + $0x30] sm:$0xff]  }
   0x7   :  { %348 = vmatpush3.bf16.msra.mxu0 %v370_v3  ;;  %v302_v17 = vld [vmem:[%s577_s0 + $0x58] sm:$0xff]  ;;  %v30_v18 = vadd.f32 %v298_v14, %v21_v12  ;;  %v304_v19 = vld [vmem:[%s577_s0 + $0x68] sm:$0xff]  ;;  %v18_v32 = vld [vmem:[%s577_s0] sm:$0xff] }
   0x8   :  { %349 = vmatprep.subr.bf16.mxu0 %v371_v4  ;;  %v378_v20 = vld [vmem:[%s576_s1 + $0x28] sm:$0xff]   ;;  %v37_v21 = vadd.f32 %v300_v16, %v28_v15  ;;  %v306_v22 = vld [vmem:[%s577_s0 + $0x78] sm:$0xff]  ;;  %v20_v33 = vld [vmem:[%s577_s0 + $0x10] sm:$0xff] }
   0x9   :  { %v39_v24 = vadd.f32 %v302_v17, %v30_v18  ;;  %v308_v25 = vld [vmem:[%s577_s0 + $0x88] sm:$0xff]  ;;  %v310_v28 = vld [vmem:[%s577_s0 + $0x98] sm:$0xff]  ;;  %v295_v34 = vld [vmem:[%s577_s0 + $0x20] sm:$0xff] }
   0xa   :  { %v46_v27 = vadd.f32 %v304_v19, %v37_v21  ;;  %v312_v29 = vld [vmem:[%s577_s0 + $0xa8] sm:$0xff]  ;;  %v314_v30 = vld [vmem:[%s577_s0 + $0xb8] sm:$0xff]  ;;  %v297_v36 = vld [vmem:[%s577_s0 + $0x30] sm:$0xff]  ;;  %v27_v37 = vadd.f32 %v295_v34, %v18_v32 }
   0xb   :  { %350 = vmatpush3.bf16.msra.mxu0 %v372_v5  ;;  %v48_v31 = vadd.f32 %v306_v22, %v39_v24  ;;  %v299_v38 = vld [vmem:[%s577_s0 + $0x40] sm:$0xff]  ;;  %v301_v39 = vld [vmem:[%s577_s0 + $0x50] sm:$0xff]  ;;  %v381_v40 = vld [vmem:[%s576_s1 + $0x78] sm:$0xff]   ;;  %v29_v43 = vadd.f32 %v297_v36, %v20_v33 }
   0xc   :  { %351 = vmatprep.subr.bf16.mxu0 %v373_v6  ;;  %v55_v35 = vadd.f32 %v308_v25, %v46_v27  ;;  %v316_v42 = vld [vmem:[%s577_s0 + $0xc8] sm:$0xff]  ;;  %v303_v44 = vld [vmem:[%s577_s0 + $0x60] sm:$0xff]  ;;  %v318_v46 = vld [vmem:[%s577_s0 + $0xd8] sm:$0xff]  ;;  %v36_v47 = vadd.f32 %v299_v38, %v27_v37 }
   0xd   :  { %v57_v41 = vadd.f32 %v310_v28, %v48_v31  ;;  %v305_v48 = vld [vmem:[%s577_s0 + $0x70] sm:$0xff]  ;;  %v320_v50 = vld [vmem:[%s577_s0 + $0xe8] sm:$0xff]  ;;  %v38_v51 = vadd.f32 %v301_v39, %v29_v43  ;;  %v307_v52 = vld [vmem:[%s577_s0 + $0x80] sm:$0xff] }
   0xe   :  { %v64_v45 = vadd.f32 %v312_v29, %v55_v35  ;;  %v382_v53 = vld [vmem:[%s576_s1 + $0x38] sm:$0xff]   ;;  %v45_v56 = vadd.f32 %v303_v44, %v36_v47  ;;  %v309_v57 = vld [vmem:[%s577_s0 + $0x90] sm:$0xff]  ;;  %v324_v59 = vld [vmem:[%s577_s0 + $0x108] sm:$0xff] }
   0xf   :  { %352 = vmatpush3.bf16.msra.mxu0 %v374_v7  ;;  %v66_v49 = vadd.f32 %v314_v30, %v57_v41  ;;  %v322_v55 = vld [vmem:[%s577_s0 + $0xf8] sm:$0xff]  ;;  %v47_v60 = vadd.f32 %v305_v48, %v38_v51  ;;  %v311_v61 = vld [vmem:[%s577_s0 + $0xa0] sm:$0xff]  ;;  %v313_v1 = vld [vmem:[%s577_s0 + $0xb0] sm:$0xff] }
  0x10   :  { %353 = vmatprep.subr.bf16.mxu0 %v375_v8  ;;  %v73_v54 = vadd.f32 %v316_v42, %v64_v45  ;;  %v326_v63 = vld [vmem:[%s577_s0 + $0x118] sm:$0xff]  ;;  %v54_v0 = vadd.f32 %v307_v52, %v45_v56  ;;  %v315_v4 = vld [vmem:[%s577_s0 + $0xc0] sm:$0xff]  ;;  %v317_v7 = vld [vmem:[%s577_s0 + $0xd0] sm:$0xff] }
  0x11   :  { %v75_v58 = vadd.f32 %v318_v46, %v66_v49  ;;  %v56_v3 = vadd.f32 %v309_v57, %v47_v60  ;;  %v321_v13 = vld [vmem:[%s577_s0 + $0xf0] sm:$0xff]  ;;  %v323_v16 = vld [vmem:[%s577_s0 + $0x100] sm:$0xff] }
  0x12   :  { %v82_v62 = vadd.f32 %v320_v50, %v73_v54  ;;  %v63_v6 = vadd.f32 %v311_v61, %v54_v0  ;;  %v325_v18 = vld [vmem:[%s577_s0 + $0x110] sm:$0xff]  ;;  %v343_v28 = vld [vmem:[%s578_s2] ss:$0 sm:$0xff] }
  0x13   :  { %354 = vmatpush3.bf16.msra.mxu0 %v376_v9  ;;  %v84_v2 = vadd.f32 %v322_v55, %v75_v58  ;;  %v65_v9 = vadd.f32 %v313_v1, %v56_v3  ;;  %v344_v31 = vld [vmem:[%s579_s3] ss:$0 sm:$0xff] }
  0x14   :  { %355 = vmatprep.subr.bf16.mxu0 %v377_v10  ;;  %v91_v5 = vadd.f32 %v324_v59, %v82_v62  ;;  %v319_v10 = vld [vmem:[%s577_s0 + $0xe0] sm:$0xff]  ;;  %v72_v12 = vadd.f32 %v315_v4, %v63_v6 }
  0x15   :  { %v93_v8 = vadd.f32 %v326_v63, %v84_v2  ;;  %v74_v15 = vadd.f32 %v317_v7, %v65_v9 }
  0x16   :  { %v95_v11 = vmul.f32 0.11111111, %v91_v5  ;;  %v81_v17 = vadd.f32 %v319_v10, %v72_v12 }
  0x17   :  { %356 = vmatpush3.bf16.msra.mxu0 %v378_v20  ;;  %v97_v14 = vmul.f32 0.11111111, %v93_v8  ;;  %v83_v20 = vadd.f32 %v321_v13, %v74_v15 }
  0x18   :  { %357 = vmatprep.subr.bf16.mxu0 %v379_v23  ;;  %v90_v21 = vadd.f32 %v323_v16, %v81_v17 }
  0x19   :  { %v99_v19 = vpack.c.bf16 %v97_v14, %v95_v11  ;;  %v92_v22 = vadd.f32 %v325_v18, %v83_v20 }
  0x1a   :  { %v94_v23 = vmul.f32 0.11111111, %v90_v21 }
  0x1b   :  { %358 = vmatpush3.bf16.msra.mxu0 %v380_v26  ;;  %260 = vmatprep.mubr.bf16.mxu0 %v99_v19  ;;  %v96_v24 = vmul.f32 0.11111111, %v92_v22 }
  0x1c   :  { %359 = vmatprep.subr.bf16.mxu0 %v381_v40 }
  0x1d   :  { %v98_v25 = vpack.c.bf16 %v96_v24, %v94_v23 }
  0x1f   :  { %360 = vmatpush3.bf16.msra.mxu0 %v382_v53 }
  0x22   :  { %261 = vmatmul.mubr.bf16.vlgmr.msra.gmra.mrb[0].mxu0 %v98_v25 }
  0xf5   :  { %v361_v26 = vpop.f32.mrb[0].mxu0 }
  0xf6   :  { %v362_v27 = vpop.f32.mrb[1].mxu0 }
  0xf7   :  { %v363_v29 = vadd.f32 %v362_v27, %v361_v26  ;;  %v364_v30 = vpop.f32.mrb[2].mxu0 }
  0xf8   :  { %v365_v32 = vpop.f32.mrb[3].mxu0 }
  0xf9   :  { %v276_v33 = vmul.f32 %v363_v29, %v343_v28  ;;  %v366_v34 = vadd.f32 %v365_v32, %v364_v30 }
  0xfb   :  { %v285_v35 = vadd.f32 %v344_v31, %v276_v33  ;;  %v277_v36 = vmul.f32 %v366_v34, %v343_v28 }
  0xfd   :  { %v287_v37 = vmax.f32 %v285_v35, 0.0  ;;  %v286_v38 = vadd.f32 %v344_v31, %v277_v36 }
  0xff   :  { %289 = vst [vmem:[%s580_s4] sm:$0xff] %v287_v37  ;;  %v288_v39 = vmax.f32 %v286_v38, 0.0 }
 0x101   :  { %290 = vst [vmem:[%s580_s4 + $0x8] sm:$0xff] %v288_v39 }

// kernel: my_inception3_forward.39
= control target key start
LH: loop header
LB: loop body
LE: loop exit
PB: predicated region body
PF: predicated region fallthrough
CT: control target
= control target key end

     0   :  { %v490_v1 = vmov 0   ;;  %vm253_vm0 = vcmask 261120   ;;  %v345_v44 = vlaneseq  ;;  %s651_s1 = inlined_call_operand.vmem [shape: bf16[288,256], index: 1, kind: input, shape index: {}]   ;;  %s652_s0 = inlined_call_operand.vmem [shape: bf16[16,288], index: 0, kind: input, shape index: {}]   ;;  %s653_s2 = inlined_call_operand.vmem [shape: f32[1,256], index: 2, kind: input, shape index: {}]   ;;  %s654_s3 = inlined_call_operand.vmem [shape: f32[1,256], index: 3, kind: input, shape index: {}]   ;;  %s655_s4 = inlined_call_operand.vmem [shape: f32[16,256], index: 4, kind: output, shape index: {}]  }
   0x1   :  { %v432_v0 = vld [vmem:[%s651_s1 + $0x4] ss:$8 sps:$4 sm:$0xff]   ;;  %332 = vmatprep.mubr.bf16.mxu0 %v490_v1  ;;  %v434_v2 = vld [vmem:[%s651_s1] ss:$8 sps:$4 sm:$0xff]   ;;  %v435_v3 = vld [vmem:[%s651_s1 + $0x14] ss:$8 sps:$4 sm:$0xff]  }
   0x2   :  { %257 = vmatprep.subr.bf16.mxu1 %v432_v0  ;;  %v437_v4 = vld [vmem:[%s651_s1 + $0x10] ss:$8 sps:$4 sm:$0xff]   ;;  %v438_v5 = vld [vmem:[%s651_s1 + $0x24] ss:$8 sps:$4 sm:$0xff]   ;;  %v440_v6 = vld [vmem:[%s651_s1 + $0x20] ss:$8 sps:$4 sm:$0xff]  }
   0x3   :  { %258 = vmatpush1.bf16.msra.mxu1 %v434_v2  ;;  %v441_v7 = vld [vmem:[%s651_s1 + $0x34] ss:$8 sps:$4 sm:$0xff]   ;;  %v443_v8 = vld [vmem:[%s651_s1 + $0x30] ss:$8 sps:$4 sm:$0xff]   ;;  %v444_v9 = vld [vmem:[%s651_s1 + $0x44] ss:$8 sps:$4 sm:$0xff]  }
   0x4   :  { %259 = vmatprep.subr.bf16.mxu1 %v435_v3  ;;  %v446_v10 = vld [vmem:[%s651_s1 + $0x40] ss:$8 sps:$4 sm:$0xff]   ;;  %v447_v11 = vld [vmem:[%s651_s1 + $0x54] ss:$8 sps:$4 sm:$0xff]   ;;  %v449_v12 = vld [vmem:[%s651_s1 + $0x50] ss:$8 sps:$4 sm:$0xff]  }
   0x5   :  { %v474_v13 = vld [vmem:[%s651_s1 + $0x104] ss:$8 sps:$4 sm:$0xff]   ;;  %v476_v14 = vld [vmem:[%s651_s1 + $0x100] ss:$8 sps:$4 sm:$0xff]   ;;  %v480_v16 = vld [vmem:[%s651_s1 + $0x114] ss:$8 sps:$4 sm:$0xff]  }
   0x6   :  { %v450_v15 = vld [vmem:[%s651_s1 + $0x64] ss:$8 sps:$4 sm:$0xff]   ;;  %300 = vmatprep.subr.bf16.mxu0 %v474_v13  ;;  %v482_v17 = vld [vmem:[%s651_s1 + $0x110] ss:$8 sps:$4 sm:$0xff]   ;;  %v452_v18 = vld [vmem:[%s651_s1 + $0x60] ss:$8 sps:$4 sm:$0xff]  }
   0x7   :  { %260 = vmatpush1.bf16.msra.mxu1 %v437_v4  ;;  %301 = vmatpush1.bf16.msra.mxu0 %v476_v14  ;;  %v453_v19 = vld [vmem:[%s651_s1 + $0x74] ss:$8 sps:$4 sm:$0xff]   ;;  %v489_v21 = vld [vmem:[%s652_s0 + $0x4] ss:$12 sps:$4 sm:$0xff]   ;;  %v458_v24 = vld [vmem:[%s651_s1 + $0x80] ss:$8 sps:$4 sm:$0xff]  }
   0x8   :  { %261 = vmatprep.subr.bf16.mxu1 %v438_v5  ;;  %302 = vmatprep.subr.bf16.mxu0 %v480_v16  ;;  %v486_v20 = vld [vmem:[%s652_s0 + $0x8] ss:$12 sps:$4 sm:$0xff]   ;;  %v455_v22 = vld [vmem:[%s651_s1 + $0x70] ss:$8 sps:$4 sm:$0xff]   ;;  %v456_v23 = vld [vmem:[%s651_s1 + $0x84] ss:$8 sps:$4 sm:$0xff]  }
   0x9   :  { %289 = vmatprep.mubr.bf16.mxu1 %v489_v21  ;;  %v459_v25 = vld [vmem:[%s651_s1 + $0x94] ss:$8 sps:$4 sm:$0xff]   ;;  %v461_v26 = vld [vmem:[%s651_s1 + $0x90] ss:$8 sps:$4 sm:$0xff]   ;;  %v462_v27 = vld [vmem:[%s651_s1 + $0xa4] ss:$8 sps:$4 sm:$0xff]  }
   0xa   :  { %v464_v28 = vld [vmem:[%s651_s1 + $0xa0] ss:$8 sps:$4 sm:$0xff]   ;;  %v465_v29 = vld [vmem:[%s651_s1 + $0xb4] ss:$8 sps:$4 sm:$0xff]   ;;  %v467_v30 = vld [vmem:[%s651_s1 + $0xb0] ss:$8 sps:$4 sm:$0xff]  }
   0xb   :  { %262 = vmatpush1.bf16.msra.mxu1 %v440_v6  ;;  %303 = vmatpush1.bf16.msra.mxu0 %v482_v17  ;;  %v468_v31 = vld [vmem:[%s651_s1 + $0xc4] ss:$8 sps:$4 sm:$0xff]   ;;  %v470_v32 = vld [vmem:[%s651_s1 + $0xc0] ss:$8 sps:$4 sm:$0xff]   ;;  %v471_v33 = vld [vmem:[%s651_s1 + $0xd4] ss:$8 sps:$4 sm:$0xff]  }
   0xc   :  { %263 = vmatprep.subr.bf16.mxu1 %v441_v7  ;;  %v473_v34 = vld [vmem:[%s651_s1 + $0xd0] ss:$8 sps:$4 sm:$0xff]   ;;  %v477_v35 = vld [vmem:[%s651_s1 + $0xe4] ss:$8 sps:$4 sm:$0xff]   ;;  %v479_v36 = vld [vmem:[%s651_s1 + $0xe0] ss:$8 sps:$4 sm:$0xff]  }
   0xd   :  { %v483_v37 = vld [vmem:[%s651_s1 + $0xf4] ss:$8 sps:$4 sm:$0xff]   ;;  %v485_v38 = vld [vmem:[%s651_s1 + $0xf0] ss:$8 sps:$4 sm:$0xff]   ;;  %v487_v39 = vld [vmem:[%s652_s0] ss:$12 sps:$4 sm:$0xff]  }
   0xe   :  { %426 = vmatmul.mubr.msk.bf16.vlgmr.msra.gmra.mrb[0].mxu0 %vm253_vm0, %v486_v20  ;;  %v346_v45 = vshrl.u32 %v345_v44, 7  ;;  %v343_v47 = vld [vmem:[%s653_s2] sm:$0x3] }
   0xf   :  { %264 = vmatpush1.bf16.msra.mxu1 %v443_v8  ;;  %v359_v49 = vld [vmem:[%s654_s3] sm:$0x3] }
  0x10   :  { %265 = vmatprep.subr.bf16.mxu1 %v444_v9  ;;  %v347_v46 = vsub.s32 0, %v346_v45  ;;  %v351_v48 = vsub.s32 1, %v346_v45 }
  0x12   :  { %v348_v50 = vrot.slane %v343_v47, %v347_v46  ;;  %v352_v52 = vrot.slane %v343_v47, %v351_v48  ;;  %v364_v54 = vrot.slane %v359_v49, %v347_v46  ;;  %v368_v57 = vrot.slane %v359_v49, %v351_v48 }
  0x13   :  { %266 = vmatpush1.bf16.msra.mxu1 %v446_v10 }
  0x14   :  { %267 = vmatprep.subr.bf16.mxu1 %v447_v11 }
  0x17   :  { %268 = vmatpush1.bf16.msra.mxu1 %v449_v12 }
  0x18   :  { %269 = vmatprep.subr.bf16.mxu1 %v450_v15 }
  0x1b   :  { %270 = vmatpush1.bf16.msra.mxu1 %v452_v18 }
  0x1c   :  { %271 = vmatprep.subr.bf16.mxu1 %v453_v19 }
  0x1f   :  { %272 = vmatpush1.bf16.msra.mxu1 %v455_v22 }
  0x20   :  { %273 = vmatprep.subr.bf16.mxu1 %v456_v23 }
  0x23   :  { %274 = vmatpush1.bf16.msra.mxu1 %v458_v24 }
  0x24   :  { %275 = vmatprep.subr.bf16.mxu1 %v459_v25 }
  0x27   :  { %276 = vmatpush1.bf16.msra.mxu1 %v461_v26 }
  0x28   :  { %277 = vmatprep.subr.bf16.mxu1 %v462_v27 }
  0x2b   :  { %278 = vmatpush1.bf16.msra.mxu1 %v464_v28 }
  0x2c   :  { %279 = vmatprep.subr.bf16.mxu1 %v465_v29 }
  0x2f   :  { %280 = vmatpush1.bf16.msra.mxu1 %v467_v30 }
  0x30   :  { %281 = vmatprep.subr.bf16.mxu1 %v468_v31 }
  0x33   :  { %282 = vmatpush1.bf16.msra.mxu1 %v470_v32 }
  0x34   :  { %283 = vmatprep.subr.bf16.mxu1 %v471_v33 }
  0x37   :  { %284 = vmatpush1.bf16.msra.mxu1 %v473_v34 }
  0x38   :  { %285 = vmatprep.subr.bf16.mxu1 %v477_v35 }
  0x3b   :  { %286 = vmatpush1.bf16.msra.mxu1 %v479_v36 }
  0x3c   :  { %287 = vmatprep.subr.bf16.mxu1 %v483_v37 }
  0x3f   :  { %288 = vmatpush1.bf16.msra.mxu1 %v485_v38 }
  0x42   :  { %290 = vmatmul.mubr.bf16.vlgmr.msra.gmra.mrb[0].mxu1 %v487_v39 }
  0xe1   :  { %v334_v40 = vpop.f32.mrb[0].mxu0 }
  0xe2   :  { %v336_v41 = vpop.f32.mrb[1].mxu0 }
  0xe3   :  { %v338_v42 = vpop.f32.mrb[2].mxu0 }
  0xe4   :  { %v340_v43 = vpop.f32.mrb[3].mxu0 }
 0x115   :  { %v291_v51 = vpop.f32.mrb[0].mxu1 }
 0x116   :  { %v335_v53 = vadd.f32 %v334_v40, %v291_v51  ;;  %v293_v55 = vpop.f32.mrb[1].mxu1 }
 0x117   :  { %v337_v56 = vadd.f32 %v336_v41, %v293_v55  ;;  %v295_v58 = vpop.f32.mrb[2].mxu1 }
 0x118   :  { %v355_v59 = vmul.f32 %v348_v50, %v335_v53  ;;  %v339_v60 = vadd.f32 %v338_v42, %v295_v58  ;;  %v297_v61 = vpop.f32.mrb[3].mxu1 }
 0x119   :  { %v356_v62 = vmul.f32 %v352_v52, %v337_v56  ;;  %v341_v63 = vadd.f32 %v340_v43, %v297_v61 }
 0x11a   :  { %v371_v0 = vadd.f32 %v364_v54, %v355_v59  ;;  %v357_v1 = vmul.f32 %v348_v50, %v339_v60 }
 0x11b   :  { %v372_v2 = vadd.f32 %v368_v57, %v356_v62  ;;  %v358_v3 = vmul.f32 %v352_v52, %v341_v63 }
 0x11c   :  { %v375_v4 = vmax.f32 %v371_v0, 0.0  ;;  %v373_v5 = vadd.f32 %v364_v54, %v357_v1 }
 0x11d   :  { %v376_v6 = vmax.f32 %v372_v2, 0.0  ;;  %v374_v7 = vadd.f32 %v368_v57, %v358_v3 }
 0x11e   :  { %379 = vst [vmem:[%s655_s4] sm:$0xff] %v375_v4  ;;  %v377_v8 = vmax.f32 %v373_v5, 0.0 }
 0x11f   :  { %380 = vst [vmem:[%s655_s4 + $0x8] sm:$0xff] %v376_v6  ;;  %v378_v9 = vmax.f32 %v374_v7, 0.0 }
 0x120   :  { %381 = vst [vmem:[%s655_s4 + $0x10] sm:$0xff] %v377_v8 }
 0x121   :  { %382 = vst [vmem:[%s655_s4 + $0x18] sm:$0xff] %v378_v9 }

// kernel: my_inception3_forward.43
= control target key start
LH: loop header
LB: loop body
LE: loop exit
PB: predicated region body
PF: predicated region fallthrough
CT: control target
= control target key end

     0   :  { %v515_v1 = vmov 0.0   ;;  %vm516_vm0 = vmmov 0   ;;  %vm281_vm1 = vcmask 261120   ;;  %s770_s1 = inlined_call_operand.vmem [shape: bf16[288,128], index: 1, kind: input, shape index: {}]   ;;  %s771_s0 = inlined_call_operand.vmem [shape: f32[9,16,288], index: 0, kind: input, shape index: {}]   ;;  %s772_s2 = inlined_call_operand.vmem [shape: f32[1,128], index: 2, kind: input, shape index: {}]   ;;  %s773_s3 = inlined_call_operand.vmem [shape: f32[1,128], index: 3, kind: input, shape index: {}]   ;;  %s774_s4 = inlined_call_operand.vmem [shape: f32[16,128], index: 4, kind: output, shape index: {}]  }
   0x1   :  { %v497_v0 = vld [vmem:[%s770_s1 + $0x40] sm:$0xff]   ;;  %487 = vmatprep.subr.bf16.mxu1 %v515_v1  ;;  %491 = vmatprep.mubr.msk.bf16.mxu1 %vm516_vm0, %v515_v1  ;;  %v499_v3 = vld [vmem:[%s770_s1 + $0x48] sm:$0xff]   ;;  %v501_v5 = vld [vmem:[%s770_s1 + $0x50] sm:$0xff]  }
   0x2   :  { %v498_v2 = vld [vmem:[%s770_s1] sm:$0xff]   ;;  %462 = vmatprep.subr.bf16.mxu0 %v497_v0  ;;  %v500_v4 = vld [vmem:[%s770_s1 + $0x8] sm:$0xff]   ;;  %v502_v6 = vld [vmem:[%s770_s1 + $0x10] sm:$0xff]  }
   0x3   :  { %463 = vmatpush3.bf16.msra.mxu0 %v498_v2  ;;  %v503_v7 = vld [vmem:[%s770_s1 + $0x58] sm:$0xff]   ;;  %v505_v9 = vld [vmem:[%s770_s1 + $0x60] sm:$0xff]   ;;  %v507_v12 = vld [vmem:[%s770_s1 + $0x68] sm:$0xff]  }
   0x4   :  { %464 = vmatprep.subr.bf16.mxu0 %v499_v3  ;;  %v504_v8 = vld [vmem:[%s770_s1 + $0x18] sm:$0xff]   ;;  %v511_v10 = vld [vmem:[%s770_s1 + $0x80] sm:$0xff]   ;;  %v508_v13 = vld [vmem:[%s770_s1 + $0x28] sm:$0xff]  }
   0x5   :  { %v506_v11 = vld [vmem:[%s770_s1 + $0x20] sm:$0xff]   ;;  %488 = vmatpush3.bf16.msra.mxu1 %v511_v10  ;;  %v514_v14 = vld [vmem:[%s770_s1 + $0x88] sm:$0xff]   ;;  %v394_v17 = vld [vmem:[%s771_s0 + $0x38] sm:$0xff] }
   0x6   :  { %489 = vmatprep.subr.bf16.mxu1 %v515_v1  ;;  %v19_v15 = vld [vmem:[%s771_s0 + $0x8] sm:$0xff]  ;;  %v22_v16 = vld [vmem:[%s771_s0 + $0x20] sm:$0xff]  ;;  %v397_v18 = vld [vmem:[%s771_s0 + $0x50] sm:$0xff] }
   0x7   :  { %465 = vmatpush3.bf16.msra.mxu0 %v500_v4  ;;  %v32_v19 = vadd.f32 %v394_v17, %v19_v15  ;;  %v400_v20 = vld [vmem:[%s771_s0 + $0x68] sm:$0xff]  ;;  %v403_v21 = vld [vmem:[%s771_s0 + $0x80] sm:$0xff]  ;;  %v509_v22 = vld [vmem:[%s770_s1 + $0x70] sm:$0xff]   ;;  %v35_v23 = vadd.f32 %v397_v18, %v22_v16 }
   0x8   :  { %466 = vmatprep.subr.bf16.mxu0 %v501_v5  ;;  %v406_v24 = vld [vmem:[%s771_s0 + $0x98] sm:$0xff]  ;;  %v409_v26 = vld [vmem:[%s771_s0 + $0xb0] sm:$0xff]  ;;  %v412_v30 = vld [vmem:[%s771_s0 + $0xc8] sm:$0xff] }
   0x9   :  { %490 = vmatpush3.bf16.msra.mxu1 %v514_v14  ;;  %v45_v25 = vadd.f32 %v400_v20, %v32_v19  ;;  %v510_v27 = vld [vmem:[%s770_s1 + $0x30] sm:$0xff]   ;;  %v512_v28 = vld [vmem:[%s770_s1 + $0x78] sm:$0xff]   ;;  %v48_v29 = vadd.f32 %v403_v21, %v35_v23  ;;  %v415_v32 = vld [vmem:[%s771_s0 + $0xe0] sm:$0xff] }
   0xa   :  { %v418_v33 = vld [vmem:[%s771_s0 + $0xf8] sm:$0xff]  ;;  %v421_v34 = vld [vmem:[%s771_s0 + $0x110] sm:$0xff]  ;;  %v18_v36 = vld [vmem:[%s771_s0] sm:$0xff] }
   0xb   :  { %467 = vmatpush3.bf16.msra.mxu0 %v502_v6  ;;  %v58_v31 = vadd.f32 %v406_v24, %v45_v25  ;;  %v61_v35 = vadd.f32 %v409_v26, %v48_v29  ;;  %v21_v37 = vld [vmem:[%s771_s0 + $0x18] sm:$0xff]  ;;  %v393_v38 = vld [vmem:[%s771_s0 + $0x30] sm:$0xff]  ;;  %v396_v40 = vld [vmem:[%s771_s0 + $0x48] sm:$0xff] }
   0xc   :  { %468 = vmatprep.subr.bf16.mxu0 %v503_v7  ;;  %v31_v41 = vadd.f32 %v393_v38, %v18_v36  ;;  %v399_v42 = vld [vmem:[%s771_s0 + $0x60] sm:$0xff]  ;;  %v402_v43 = vld [vmem:[%s771_s0 + $0x78] sm:$0xff]  ;;  %v424_v46 = vld [vmem:[%s771_s0 + $0x128] sm:$0xff]  ;;  %v34_v47 = vadd.f32 %v396_v40, %v21_v37 }
   0xd   :  { %v71_v39 = vadd.f32 %v412_v30, %v58_v31  ;;  %v513_v44 = vld [vmem:[%s770_s1 + $0x38] sm:$0xff]   ;;  %v74_v45 = vadd.f32 %v415_v32, %v61_v35  ;;  %v405_v48 = vld [vmem:[%s771_s0 + $0x90] sm:$0xff]  ;;  %v427_v50 = vld [vmem:[%s771_s0 + $0x140] sm:$0xff] }
   0xe   :  { %v430_v51 = vld [vmem:[%s771_s0 + $0x158] sm:$0xff]  ;;  %v44_v52 = vadd.f32 %v399_v42, %v31_v41  ;;  %v408_v53 = vld [vmem:[%s771_s0 + $0xa8] sm:$0xff]  ;;  %v433_v55 = vld [vmem:[%s771_s0 + $0x170] sm:$0xff]  ;;  %v47_v57 = vadd.f32 %v402_v43, %v34_v47 }
   0xf   :  { %469 = vmatpush3.bf16.msra.mxu0 %v504_v8  ;;  %v84_v49 = vadd.f32 %v418_v33, %v71_v39  ;;  %v87_v54 = vadd.f32 %v421_v34, %v74_v45  ;;  %v436_v56 = vld [vmem:[%s771_s0 + $0x188] sm:$0xff]  ;;  %v411_v58 = vld [vmem:[%s771_s0 + $0xc0] sm:$0xff]  ;;  %v414_v62 = vld [vmem:[%s771_s0 + $0xd8] sm:$0xff] }
  0x10   :  { %470 = vmatprep.subr.bf16.mxu0 %v505_v9  ;;  %v439_v60 = vld [vmem:[%s771_s0 + $0x1a0] sm:$0xff]  ;;  %v57_v61 = vadd.f32 %v405_v48, %v44_v52  ;;  %v417_v63 = vld [vmem:[%s771_s0 + $0xf0] sm:$0xff]  ;;  %v420_v0 = vld [vmem:[%s771_s0 + $0x108] sm:$0xff]  ;;  %v60_v2 = vadd.f32 %v408_v53, %v47_v57 }
  0x11   :  { %v97_v59 = vadd.f32 %v424_v46, %v84_v49  ;;  %v100_v1 = vadd.f32 %v427_v50, %v87_v54  ;;  %v20_v3 = vld [vmem:[%s771_s0 + $0x10] sm:$0xff]  ;;  %v23_v4 = vld [vmem:[%s771_s0 + $0x28] sm:$0xff]  ;;  %v395_v5 = vld [vmem:[%s771_s0 + $0x40] sm:$0xff] }
  0x12   :  { %v70_v7 = vadd.f32 %v411_v58, %v57_v61  ;;  %v398_v8 = vld [vmem:[%s771_s0 + $0x58] sm:$0xff]  ;;  %v33_v9 = vadd.f32 %v395_v5, %v20_v3  ;;  %v401_v10 = vld [vmem:[%s771_s0 + $0x70] sm:$0xff]  ;;  %v423_v14 = vld [vmem:[%s771_s0 + $0x120] sm:$0xff] }
  0x13   :  { %471 = vmatpush3.bf16.msra.mxu0 %v506_v11  ;;  %v110_v6 = vadd.f32 %v430_v51, %v97_v59  ;;  %v404_v11 = vld [vmem:[%s771_s0 + $0x88] sm:$0xff]  ;;  %v36_v15 = vadd.f32 %v398_v8, %v23_v4  ;;  %v407_v16 = vld [vmem:[%s771_s0 + $0xa0] sm:$0xff]  ;;  %v426_v19 = vld [vmem:[%s771_s0 + $0x138] sm:$0xff] }
  0x14   :  { %472 = vmatprep.subr.bf16.mxu0 %v507_v12  ;;  %v113_v12 = vadd.f32 %v433_v55, %v100_v1  ;;  %v83_v18 = vadd.f32 %v417_v63, %v70_v7  ;;  %v46_v20 = vadd.f32 %v401_v10, %v33_v9  ;;  %v410_v21 = vld [vmem:[%s771_s0 + $0xb8] sm:$0xff]  ;;  %v429_v24 = vld [vmem:[%s771_s0 + $0x150] sm:$0xff]  ;;  %v432_v29 = vld [vmem:[%s771_s0 + $0x168] sm:$0xff] }
  0x15   :  { %v123_v17 = vadd.f32 %v436_v56, %v110_v6  ;;  %v49_v25 = vadd.f32 %v404_v11, %v36_v15  ;;  %v413_v26 = vld [vmem:[%s771_s0 + $0xd0] sm:$0xff]  ;;  %v416_v31 = vld [vmem:[%s771_s0 + $0xe8] sm:$0xff]  ;;  %v435_v34 = vld [vmem:[%s771_s0 + $0x180] sm:$0xff] }
  0x16   :  { %v59_v30 = vadd.f32 %v407_v16, %v46_v20  ;;  %v419_v36 = vld [vmem:[%s771_s0 + $0x100] sm:$0xff]  ;;  %v438_v38 = vld [vmem:[%s771_s0 + $0x198] sm:$0xff]  ;;  %v428_v47 = vld [vmem:[%s771_s0 + $0x148] sm:$0xff] }
  0x17   :  { %473 = vmatpush3.bf16.msra.mxu0 %v508_v13  ;;  %v73_v13 = vadd.f32 %v414_v62, %v60_v2  ;;  %v62_v35 = vadd.f32 %v410_v21, %v49_v25  ;;  %v422_v40 = vld [vmem:[%s771_s0 + $0x118] sm:$0xff]  ;;  %v431_v50 = vld [vmem:[%s771_s0 + $0x160] sm:$0xff]  ;;  %v437_v56 = vld [vmem:[%s771_s0 + $0x190] sm:$0xff] }
  0x18   :  { %474 = vmatprep.subr.bf16.mxu0 %v509_v22  ;;  %v126_v22 = vadd.f32 %v439_v60, %v113_v12  ;;  %v72_v39 = vadd.f32 %v413_v26, %v59_v30  ;;  %v434_v53 = vld [vmem:[%s771_s0 + $0x178] sm:$0xff]  ;;  %v440_v58 = vld [vmem:[%s771_s0 + $0x1a8] sm:$0xff]  ;;  %v460_v9 = vld [vmem:[%s772_s2] ss:$0 sm:$0xff] }
  0x19   :  { %v86_v23 = vadd.f32 %v420_v0, %v73_v13  ;;  %v75_v43 = vadd.f32 %v416_v31, %v62_v35  ;;  %v461_v12 = vld [vmem:[%s773_s3] ss:$0 sm:$0xff] }
  0x1a   :  { %v132_v32 = vmul.f32 0.11111111, %v126_v22  ;;  %v85_v46 = vadd.f32 %v419_v36, %v72_v39 }
  0x1b   :  { %475 = vmatpush3.bf16.msra.mxu0 %v510_v27  ;;  %v129_v27 = vmul.f32 0.11111111, %v123_v17  ;;  %v99_v33 = vadd.f32 %v426_v19, %v86_v23  ;;  %v88_v49 = vadd.f32 %v422_v40, %v75_v43 }
  0x1c   :  { %476 = vmatprep.subr.bf16.mxu0 %v512_v28  ;;  %v96_v28 = vadd.f32 %v423_v14, %v83_v18 }
  0x1d   :  { %v135_v41 = vpack.c.bf16 %v132_v32, %v129_v27  ;;  %v112_v42 = vadd.f32 %v432_v29, %v99_v33  ;;  %v101_v55 = vadd.f32 %v428_v47, %v88_v49 }
  0x1e   :  { %v109_v37 = vadd.f32 %v429_v24, %v96_v28 }
  0x1f   :  { %477 = vmatpush3.bf16.msra.mxu0 %v513_v44  ;;  %v425_v44 = vld [vmem:[%s771_s0 + $0x130] sm:$0xff]  ;;  %317 = vmatprep.mubr.bf16.mxu0 %v135_v41  ;;  %v125_v48 = vadd.f32 %v438_v38, %v112_v42  ;;  %v114_v60 = vadd.f32 %v434_v53, %v101_v55 }
  0x20   :  { %v122_v45 = vadd.f32 %v435_v34, %v109_v37  ;;  %v98_v52 = vadd.f32 %v425_v44, %v85_v46 }
  0x21   :  { %v131_v54 = vmul.f32 0.11111111, %v125_v48  ;;  %v127_v62 = vadd.f32 %v440_v58, %v114_v60 }
  0x22   :  { %v128_v51 = vmul.f32 0.11111111, %v122_v45  ;;  %v111_v57 = vadd.f32 %v431_v50, %v98_v52 }
  0x23   :  { %v133_v0 = vmul.f32 0.11111111, %v127_v62 }
  0x24   :  { %v134_v59 = vpack.c.bf16 %v131_v54, %v128_v51  ;;  %v124_v61 = vadd.f32 %v437_v56, %v111_v57 }
  0x26   :  { %318 = vmatmul.mubr.bf16.vlgmr.msra.gmra.mrb[0].mxu0 %v134_v59  ;;  %v130_v63 = vmul.f32 0.11111111, %v124_v61 }
  0x28   :  { %v136_v1 = vpack.c.bf16 %v133_v0, %v130_v63 }
  0x2a   :  { %492 = vmatmul.mubr.msk.bf16.vlgmr.msra.gmra.mrb[0].mxu1 %vm281_vm1, %v136_v1 }
  0xf9   :  { %v478_v2 = vpop.f32.mrb[0].mxu0 }
  0xfa   :  { %v479_v3 = vpop.f32.mrb[1].mxu0 }
  0xfb   :  { %v480_v4 = vadd.f32 %v479_v3, %v478_v2  ;;  %v481_v5 = vpop.f32.mrb[2].mxu0 }
  0xfc   :  { %v482_v6 = vpop.f32.mrb[3].mxu0 }
  0xfd   :  { %v483_v7 = vadd.f32 %v482_v6, %v481_v5  ;;  %v360_v8 = vpop.f32.mrb[0].mxu1 }
  0xfe   :  { %v361_v10 = vadd.f32 %v480_v4, %v360_v8  ;;  %v493_v11 = vpop.f32.mrb[1].mxu1 }
  0xff   :  { %v363_v13 = vpop.f32.mrb[2].mxu1 }
 0x100   :  { %v374_v14 = vmul.f32 %v460_v9, %v361_v10  ;;  %v364_v15 = vadd.f32 %v483_v7, %v363_v13  ;;  %v494_v16 = vpop.f32.mrb[3].mxu1 }
 0x102   :  { %v383_v17 = vadd.f32 %v461_v12, %v374_v14  ;;  %v375_v18 = vmul.f32 %v460_v9, %v364_v15 }
 0x104   :  { %v385_v19 = vmax.f32 %v383_v17, 0.0  ;;  %v384_v20 = vadd.f32 %v461_v12, %v375_v18 }
 0x106   :  { %387 = vst [vmem:[%s774_s4] sm:$0xff] %v385_v19  ;;  %v386_v21 = vmax.f32 %v384_v20, 0.0 }
 0x108   :  { %388 = vst [vmem:[%s774_s4 + $0x8] sm:$0xff] %v386_v21 }

</bundles_post_ra>
